<compile_context>
chip_gen: v7x
topology: tpu7x:2x2x1
jax: 0.10.0
libtpu: 0.0.40
codegen_flags: <defaults>
</compile_context>

<pallas_src>
import math
from functools import partial

import jax
import jax.numpy as jnp
from jax.experimental import pallas as pl
from jax.experimental.pallas import tpu as pltpu

# ----- config (small, consistent with the module) -----
VOCAB = 64       # config.vocab_size
CONTEXT = 16     # config.context_length
EMBED = 32       # config.embed_dim
HEADS = 4        # config.num_heads
FFN = 128        # config.feedforward_size (= 4 * embed_dim)
LAYERS = 2       # config.num_layers
EPS = 1e-5       # LayerNorm eps
VPAD = 128       # lane-dense padded vocab width for the head / bias slab

BATCH = 2
SEQ = 8

INV_SQRT2 = 0.7071067811865476


# ---------------------------------------------------------------------------
# in-kernel helpers
# ---------------------------------------------------------------------------
def _erf(x):
    # TODO(synk): exact erf has no guaranteed Mosaic lowering; use
    # Abramowitz-Stegun 7.1.26 (max abs err ~1.5e-7) so GELU matches
    # nn.GELU() (exact, erf-based) to float32 working precision.
    p = 0.3275911
    a1, a2, a3, a4, a5 = 0.254829592, -0.284496736, 1.421413741, -1.453152027, 1.061405429
    ax = jnp.abs(x)
    t = pl.reciprocal(1.0 + p * ax, approx=True)          # EUP, not VPU divide
    poly = ((((a5 * t + a4) * t + a3) * t + a2) * t + a1) * t
    y = 1.0 - poly * jnp.exp(-ax * ax)
    return jnp.where(x < 0, -y, y)


def _layernorm(x, gamma, beta):
    # biased variance (correction=0), matches the reference LayerNorm
    u = jnp.mean(x, axis=-1, keepdims=True)
    c = x - u
    v = jnp.mean(c * c, axis=-1, keepdims=True)
    return gamma * (c * jax.lax.rsqrt(v + EPS)) + beta     # rsqrt -> EUP


# ---------------------------------------------------------------------------
# the single fused Pallas kernel: embeddings + all layers + prehead + head
# ---------------------------------------------------------------------------
def minigpt_kernel(tok_ref, emb_ref, wa_ref, w2_ref, wh_ref, vecs_ref, out_ref,
                   *, num_layers, num_heads, batch, seq):
    f32, bf16 = jnp.float32, jnp.bfloat16
    D, F, V, C = EMBED, FFN, VOCAB, CONTEXT
    BT = batch * seq
    dk = D // num_heads
    inv_sqrt = 1.0 / math.sqrt(dk)

    # --- fused vocab + positional embedding gather: one one-hot MXU matmul ---
    tok = tok_ref[...]                                           # (BT, 1) int32
    col = jax.lax.broadcasted_iota(jnp.int32, (BT, V + C), 1)
    row = jax.lax.broadcasted_iota(jnp.int32, (BT, V + C), 0)
    onehot = jnp.logical_or(col == tok, col == (V + row % seq)).astype(f32)
    x = jnp.dot(onehot, emb_ref[...], preferred_element_type=f32)  # (BT, D)
    # embed_dropout / attention dropouts: identity (eval mode)

    # --- causal mask built in-kernel. NOTE: diagonal INCLUDED (triu diag=0)
    #     to preserve the reference module's exact (if unusual) semantics. ---
    qr = jax.lax.broadcasted_iota(jnp.int32, (seq, seq), 0)
    kc = jax.lax.broadcasted_iota(jnp.int32, (seq, seq), 1)
    cmask = jnp.where(kc >= qr, jnp.float32(-1e10), jnp.float32(0.0))

    def vec(r, width):                 # one packed small-vector row, (1, width)
        return vecs_ref[r:r + 1, :width]

    for l in range(num_layers):        # static unroll, LAYERS = 2
        r = 7 * l
        wa = wa_ref[l]                 # (D, 3D + D + F) bf16: [Wq|Wk|Wv|Wo|W1]
        wo = wa[:, 3 * D:4 * D]        # (D, D)

        # --- prenorm 1 + multi-head causal self attention ---
        x1 = _layernorm(x, vec(r, D), vec(r + 1, D))
        qkv = jnp.dot(x1.astype(bf16), wa[:, :3 * D],
                      preferred_element_type=f32)                 # (BT, 3D)

        x2_parts = []
        for b in range(batch):         # static loops: batch=2, heads=4
            rs = slice(b * seq, (b + 1) * seq)
            acc = jnp.zeros((seq, D), f32)
            for h in range(num_heads):
                q = qkv[rs, h * dk:(h + 1) * dk].astype(bf16)
                k = qkv[rs, D + h * dk:D + (h + 1) * dk].astype(bf16)
                v = qkv[rs, 2 * D + h * dk:2 * D + (h + 1) * dk].astype(bf16)
                # q @ k.T without the explicit transpose (no XLU relayout)
                s = jax.lax.dot_general(q, k, (((1,), (1,)), ((), ())),
                                        preferred_element_type=f32)   # (T, T)
                m = (s + cmask) * inv_sqrt              # (S + mask) / sqrt(dk)
                m = m - jnp.max(m, axis=-1, keepdims=True)
                e = jnp.exp(m)
                p = e * pl.reciprocal(jnp.sum(e, axis=-1, keepdims=True),
                                      approx=True)      # softmax(dim=-1)
                hv = jnp.dot(p.astype(bf16), v, preferred_element_type=f32)
                # concat(heads) @ Wo  ==  sum_h head_h @ Wo[h*dk:(h+1)*dk, :]
                acc = acc + jnp.dot(hv.astype(bf16), wo[h * dk:(h + 1) * dk, :],
                                    preferred_element_type=f32)
            x2_parts.append(acc)
        x2 = jnp.concatenate(x2_parts, axis=0) + vec(r + 2, D)    # + bias_o
        x3 = x + x2                    # residual 1

        # --- prenorm 2 + feedforward (exact GELU) ---
        x4 = _layernorm(x3, vec(r + 3, D), vec(r + 4, D))
        h1 = jnp.dot(x4.astype(bf16), wa[:, 4 * D:],
                     preferred_element_type=f32) + vec(r + 5, F)
        h1 = 0.5 * h1 * (1.0 + _erf(h1 * INV_SQRT2))
        x5 = jnp.dot(h1.astype(bf16), w2_ref[l],
                     preferred_element_type=f32) + vec(r + 6, D)
        x = x3 + x5                    # residual 2

    # --- prehead norm + tied, lane-padded language-model head ---
    rg = 7 * num_layers
    xn = _layernorm(x, vec(rg, D), vec(rg + 1, D))
    out_ref[...] = (jnp.dot(xn.astype(bf16), wh_ref[...],
                            preferred_element_type=f32)
                    + vecs_ref[rg + 2:rg + 3, :])                 # (BT, 128)


# ---------------------------------------------------------------------------
# one-time host-side packing (NOT in the per-call path)
# ---------------------------------------------------------------------------
def pack_params(params):
    layers = params["layers"]

    # big matmul slabs, pre-cast to bf16 (f32 accumulation happens in-kernel)
    wa = jnp.stack(
        [jnp.concatenate([lp["wq"], lp["wk"], lp["wv"], lp["wo"], lp["w1"]],
                         axis=1) for lp in layers],
        axis=0).astype(jnp.bfloat16)                       # (L, D, 3D+D+FFN)
    w2 = jnp.stack([lp["w2"] for lp in layers], axis=0).astype(jnp.bfloat16)

    # tied head (vocab_emb.T) zero-padded to 128 lanes for a dense output store
    wh = jnp.zeros((EMBED, VPAD), jnp.float32)
    wh = wh.at[:, :VOCAB].set(params["vocab_emb"].T).astype(jnp.bfloat16)

    # fused embedding slab: rows [0,V) vocab, rows [V, V+CONTEXT) positional
    emb = jnp.concatenate([params["vocab_emb"], params["pos_emb"]], axis=0)

    # all small gamma/beta/bias vectors in ONE (7L+3, 128) slab
    def row(v, width):
        return jnp.zeros((1, VPAD), jnp.float32).at[:, :width].set(v)

    rows = []
    for lp in layers:
        rows += [row(lp["g1"], EMBED), row(lp["b1"], EMBED), row(lp["bo"], EMBED),
                 row(lp["g2"], EMBED), row(lp["b2"], EMBED), row(lp["bf1"], FFN),
                 row(lp["bf2"], EMBED)]
    rows += [row(params["prehead_g"], EMBED), row(params["prehead_b"], EMBED),
             row(params["head_bias"], VOCAB)]
    vecs = jnp.concatenate(rows, axis=0)                   # (7L+3, 128)

    return {"emb": emb, "wa": wa, "w2": w2, "wh": wh, "vecs": vecs}


# ---------------------------------------------------------------------------
# jitted forward: token reshape -> ONE pallas_call -> slice
# ---------------------------------------------------------------------------
def _full_spec(shape):
    nd = len(shape)
    return pl.BlockSpec(shape, lambda i, _nd=nd: (0,) * _nd)


@jax.jit
def minigpt_forward(tokens, packed):
    B, T = tokens.shape
    tok2d = tokens.reshape(B * T, 1).astype(jnp.int32)

    ops = [tok2d, packed["emb"], packed["wa"], packed["w2"],
           packed["wh"], packed["vecs"]]

    out = pl.pallas_call(
        partial(minigpt_kernel, num_layers=LAYERS, num_heads=HEADS,
                batch=B, seq=T),
        out_shape=jax.ShapeDtypeStruct((B * T, VPAD), jnp.float32),
        grid=(1,),                                   # single fused step
        in_specs=[_full_spec(a.shape) for a in ops],
        out_specs=pl.BlockSpec((B * T, VPAD), lambda i: (0, 0)),
        compiler_params=pltpu.CompilerParams(
            dimension_semantics=("arbitrary",)),
    )(*ops)

    return out[:, :VOCAB].reshape(B, T, VOCAB)


# ---------------------------------------------------------------------------
# deterministic parameter init (mirrors _init_weights: normal(0, 0.02),
# fc2 uses 0.02/sqrt(2*num_layers), biases zero, LayerNorm gamma=1 beta=0)
# ---------------------------------------------------------------------------
def init_params(key):
    ks = iter(jax.random.split(key, 2 + LAYERS * 6))

    def n(shape, std=0.02):
        return jax.random.normal(next(ks), shape, jnp.float32) * std

    params = {
        "vocab_emb": n((VOCAB, EMBED)),
        "pos_emb": n((CONTEXT, EMBED)),
        "layers": [],
        "prehead_g": jnp.ones((1, EMBED), jnp.float32),
        "prehead_b": jnp.zeros((1, EMBED), jnp.float32),
        "head_bias": jnp.zeros((1, VOCAB), jnp.float32),
    }
    for _ in range(LAYERS):
        lp = {
            "g1": jnp.ones((1, EMBED), jnp.float32),
            "b1": jnp.zeros((1, EMBED), jnp.float32),
            "wq": n((EMBED, EMBED)),          # stored (in, out)
            "wk": n((EMBED, EMBED)),
            "wv": n((EMBED, EMBED)),
            "wo": n((EMBED, EMBED)),
            "bo": jnp.zeros((1, EMBED), jnp.float32),
            "g2": jnp.ones((1, EMBED), jnp.float32),
            "b2": jnp.zeros((1, EMBED), jnp.float32),
            "w1": n((EMBED, FFN)),
            "bf1": jnp.zeros((1, FFN), jnp.float32),
            "w2": n((FFN, EMBED), 0.02 / math.sqrt(2 * LAYERS)),   # fc2 init
            "bf2": jnp.zeros((1, EMBED), jnp.float32),
        }
        params["layers"].append(lp)
    return params


# ---------------------------------------------------------------------------
# pure-JAX f32 reference (numerical self-check)
# ---------------------------------------------------------------------------
def reference_forward(tokens, params):
    def ln(x, g, b):
        u = jnp.mean(x, -1, keepdims=True)
        v = jnp.mean((x - u) ** 2, -1, keepdims=True)
        return g * ((x - u) / jnp.sqrt(v + EPS)) + b

    B, T = tokens.shape
    x = params["vocab_emb"][tokens] + params["pos_emb"][:T][None]
    mask = jnp.triu(jnp.ones((T, T), jnp.float32)) * -1e10
    dk = EMBED // HEADS
    for lp in params["layers"]:
        x1 = ln(x, lp["g1"][0], lp["b1"][0])
        q, k, v = x1 @ lp["wq"], x1 @ lp["wk"], x1 @ lp["wv"]
        outs = []
        for h in range(HEADS):
            sl = slice(h * dk, (h + 1) * dk)
            sc = jnp.einsum("btd,bsd->bts", q[..., sl], k[..., sl])
            s = jax.nn.softmax((sc + mask) / math.sqrt(dk), axis=-1)
            outs.append(jnp.einsum("bts,bsd->btd", s, v[..., sl]))
        attn = jnp.concatenate(outs, -1)
        x3 = x + attn @ lp["wo"] + lp["bo"][0]
        x4 = ln(x3, lp["g2"][0], lp["b2"][0])
        h1 = jax.nn.gelu(x4 @ lp["w1"] + lp["bf1"][0], approximate=False)
        x = x3 + h1 @ lp["w2"] + lp["bf2"][0]
    x = ln(x, params["prehead_g"][0], params["prehead_b"][0])
    return x @ params["vocab_emb"].T + params["head_bias"][0]


if __name__ == "__main__":
    key = jax.random.PRNGKey(0)
    pkey, tkey = jax.random.split(key)
    params = init_params(pkey)
    packed = pack_params(params)          # one-time packing, outside the hot path
    tokens = jax.random.randint(tkey, (BATCH, SEQ), 0, VOCAB, dtype=jnp.int32)

    logits = jax.block_until_ready(minigpt_forward(tokens, packed))
    assert logits.shape == (BATCH, SEQ, VOCAB)

    ref = reference_forward(tokens, params)
    max_err = float(jnp.max(jnp.abs(logits - ref)))
    # bf16 MXU operands + approx reciprocal/erf: expect ~1e-3 abs error on
    # ~0.1-magnitude logits; 1e-2 is a comfortable but still meaningful bound.
    assert max_err < 1e-2, f"max|err|={max_err}"

    print("KERNEL_OK")
</pallas_src>

<mosaic_0001>
module attributes {stable_mosaic.version = 11 : i64} {
  func.func @minigpt_kernel(%arg0: i32, %arg1: memref<16x1xi32, #tpu.memory_space<vmem>>, %arg2: memref<80x32xf32, #tpu.memory_space<vmem>>, %arg3: memref<2x32x256xbf16, #tpu.memory_space<vmem>>, %arg4: memref<2x128x32xbf16, #tpu.memory_space<vmem>>, %arg5: memref<32x128xbf16, #tpu.memory_space<vmem>>, %arg6: memref<17x128xf32, #tpu.memory_space<vmem>>, %arg7: memref<16x128xf32, #tpu.memory_space<vmem>>) attributes {dimension_semantics = [#tpu.dimension_semantics<arbitrary>], iteration_bounds = array<i64: 1>, scalar_prefetch = 0 : i64, scratch_operands = 0 : i64, tpu.core_type = #tpu.core_type<tc>, window_params = [{pipeline_mode = #tpu.pipeline_mode<synchronous>, transform_indices = @transform_0, window_bounds = array<i64: 16, 1>}, {pipeline_mode = #tpu.pipeline_mode<synchronous>, transform_indices = @transform_1, window_bounds = array<i64: 80, 32>}, {pipeline_mode = #tpu.pipeline_mode<synchronous>, transform_indices = @transform_2, window_bounds = array<i64: 2, 32, 256>}, {pipeline_mode = #tpu.pipeline_mode<synchronous>, transform_indices = @transform_3, window_bounds = array<i64: 2, 128, 32>}, {pipeline_mode = #tpu.pipeline_mode<synchronous>, transform_indices = @transform_4, window_bounds = array<i64: 32, 128>}, {pipeline_mode = #tpu.pipeline_mode<synchronous>, transform_indices = @transform_5, window_bounds = array<i64: 17, 128>}, {pipeline_mode = #tpu.pipeline_mode<synchronous>, transform_indices = @transform_6, window_bounds = array<i64: 16, 128>}]} {
    %c0 = arith.constant 0 : index
    %c0_0 = arith.constant 0 : index
    %0 = vector.load %arg1[%c0, %c0_0] : memref<16x1xi32, #tpu.memory_space<vmem>>, vector<16x1xi32>
    %1 = tpu.iota {dimensions = array<i32: 1>} : vector<16x80xi32>
    %2 = tpu.iota {dimensions = array<i32: 0>} : vector<16x80xi32>
    %3 = vector.broadcast %0 : vector<16x1xi32> to vector<16x80xi32>
    %4 = arith.cmpi eq, %1, %3 : vector<16x80xi32>
    %c8_i32 = arith.constant 8 : i32
    %c0_i32 = arith.constant 0 : i32
    %5 = arith.cmpi eq, %c8_i32, %c0_i32 : i32
    %c1_i32 = arith.constant 1 : i32
    %6 = arith.select %5, %c1_i32, %c8_i32 : i32
    %7 = vector.broadcast %6 : i32 to vector<16x80xi32>
    %8 = arith.remsi %2, %7 : vector<16x80xi32>
    %c0_i32_1 = arith.constant 0 : i32
    %9 = vector.broadcast %c0_i32_1 : i32 to vector<16x80xi32>
    %10 = arith.cmpi ne, %8, %9 : vector<16x80xi32>
    %c0_i32_2 = arith.constant 0 : i32
    %11 = vector.broadcast %c0_i32_2 : i32 to vector<16x80xi32>
    %12 = arith.cmpi slt, %8, %11 : vector<16x80xi32>
    %c0_i32_3 = arith.constant 0 : i32
    %13 = arith.cmpi slt, %6, %c0_i32_3 : i32
    %14 = vector.broadcast %13 : i1 to vector<16x80xi1>
    %15 = vector.broadcast %14 : vector<16x80xi1> to vector<16x80xi1>
    %16 = arith.xori %12, %15 : vector<16x80xi1>
    %17 = arith.andi %16, %10 : vector<16x80xi1>
    %18 = vector.broadcast %6 : i32 to vector<16x80xi32>
    %19 = arith.addi %8, %18 : vector<16x80xi32>
    %20 = arith.select %17, %19, %8 : vector<16x80xi1>, vector<16x80xi32>
    %c64_i32 = arith.constant 64 : i32
    %21 = vector.broadcast %c64_i32 : i32 to vector<16x80xi32>
    %22 = arith.addi %21, %20 : vector<16x80xi32>
    %23 = arith.cmpi eq, %1, %22 : vector<16x80xi32>
    %24 = arith.ori %4, %23 : vector<16x80xi1>
    %25 = arith.extui %24 : vector<16x80xi1> to vector<16x80xi32>
    %26 = arith.sitofp %25 : vector<16x80xi32> to vector<16x80xf32>
    %c0_4 = arith.constant 0 : index
    %c0_5 = arith.constant 0 : index
    %27 = vector.load %arg2[%c0_4, %c0_5] : memref<80x32xf32, #tpu.memory_space<vmem>>, vector<80x32xf32>
    %cst = arith.constant dense<0.000000e+00> : vector<16x32xf32>
    %28 = tpu.matmul %26, %27, %cst {dimension_numbers = #tpu.dot_dimension_numbers<[1], [0], [0], [1], [0, 0, 1, 1], [], []>} : vector<16x80xf32>, vector<80x32xf32>, vector<16x32xf32> -> vector<16x32xf32>
    %29 = tpu.iota {dimensions = array<i32: 0>} : vector<8x8xi32>
    %30 = tpu.iota {dimensions = array<i32: 1>} : vector<8x8xi32>
    %31 = arith.cmpi sge, %30, %29 : vector<8x8xi32>
    %cst_6 = arith.constant -1.000000e+10 : f32
    %cst_7 = arith.constant 0.000000e+00 : f32
    %32 = vector.broadcast %cst_6 : f32 to vector<8x8xf32>
    %33 = vector.broadcast %cst_7 : f32 to vector<8x8xf32>
    %34 = arith.select %31, %32, %33 : vector<8x8xi1>, vector<8x8xf32>
    %c0_8 = arith.constant 0 : index
    %c0_9 = arith.constant 0 : index
    %c0_10 = arith.constant 0 : index
    %35 = vector.load %arg3[%c0_8, %c0_9, %c0_10] : memref<2x32x256xbf16, #tpu.memory_space<vmem>>, vector<1x32x256xbf16>
    %36 = vector.shape_cast %35 : vector<1x32x256xbf16> to vector<32x256xbf16>
    %37 = vector.extract_strided_slice %36 {offsets = [0, 96], sizes = [32, 32], strides = [1, 1]} : vector<32x256xbf16> to vector<32x32xbf16>
    %c0_11 = arith.constant 0 : index
    %c0_12 = arith.constant 0 : index
    %38 = vector.load %arg6[%c0_11, %c0_12] : memref<17x128xf32, #tpu.memory_space<vmem>>, vector<1x32xf32>
    %c1 = arith.constant 1 : index
    %c0_13 = arith.constant 0 : index
    %39 = vector.load %arg6[%c1, %c0_13] : memref<17x128xf32, #tpu.memory_space<vmem>>, vector<1x32xf32>
    %cst_14 = arith.constant dense<0.000000e+00> : vector<16xf32>
    %40 = vector.multi_reduction <add>, %28, %cst_14 [1] : vector<16x32xf32> to vector<16xf32>
    %41 = vector.shape_cast %40 : vector<16xf32> to vector<16x1xf32>
    %cst_15 = arith.constant 3.200000e+01 : f32
    %42 = vector.broadcast %cst_15 : f32 to vector<16x1xf32>
    %43 = arith.divf %41, %42 : vector<16x1xf32>
    %44 = vector.broadcast %43 : vector<16x1xf32> to vector<16x32xf32>
    %45 = arith.subf %28, %44 : vector<16x32xf32>
    %46 = arith.mulf %45, %45 : vector<16x32xf32>
    %cst_16 = arith.constant dense<0.000000e+00> : vector<16xf32>
    %47 = vector.multi_reduction <add>, %46, %cst_16 [1] : vector<16x32xf32> to vector<16xf32>
    %48 = vector.shape_cast %47 : vector<16xf32> to vector<16x1xf32>
    %cst_17 = arith.constant 3.200000e+01 : f32
    %49 = vector.broadcast %cst_17 : f32 to vector<16x1xf32>
    %50 = arith.divf %48, %49 : vector<16x1xf32>
    %cst_18 = arith.constant 9.99999974E-6 : f32
    %51 = vector.broadcast %cst_18 : f32 to vector<16x1xf32>
    %52 = arith.addf %50, %51 : vector<16x1xf32>
    %53 = math.rsqrt %52 : vector<16x1xf32>
    %54 = vector.broadcast %53 : vector<16x1xf32> to vector<16x32xf32>
    %55 = arith.mulf %45, %54 : vector<16x32xf32>
    %56 = vector.broadcast %38 : vector<1x32xf32> to vector<16x32xf32>
    %57 = arith.mulf %56, %55 : vector<16x32xf32>
    %58 = vector.broadcast %39 : vector<1x32xf32> to vector<16x32xf32>
    %59 = arith.addf %57, %58 : vector<16x32xf32>
    %60 = arith.truncf %59 : vector<16x32xf32> to vector<16x32xbf16>
    %61 = vector.extract_strided_slice %36 {offsets = [0, 0], sizes = [32, 96], strides = [1, 1]} : vector<32x256xbf16> to vector<32x96xbf16>
    %cst_19 = arith.constant dense<0.000000e+00> : vector<16x96xf32>
    %62 = tpu.matmul %60, %61, %cst_19 {dimension_numbers = #tpu.dot_dimension_numbers<[1], [0], [0], [1], [0, 0, 1, 1], [], []>} : vector<16x32xbf16>, vector<32x96xbf16>, vector<16x96xf32> -> vector<16x96xf32>
    %cst_20 = arith.constant 0.000000e+00 : f32
    %63 = vector.broadcast %cst_20 : f32 to vector<8x32xf32>
    %64 = vector.extract_strided_slice %62 {offsets = [0, 0], sizes = [8, 8], strides = [1, 1]} : vector<16x96xf32> to vector<8x8xf32>
    %65 = arith.truncf %64 : vector<8x8xf32> to vector<8x8xbf16>
    %66 = vector.extract_strided_slice %62 {offsets = [0, 32], sizes = [8, 8], strides = [1, 1]} : vector<16x96xf32> to vector<8x8xf32>
    %67 = arith.truncf %66 : vector<8x8xf32> to vector<8x8xbf16>
    %68 = vector.extract_strided_slice %62 {offsets = [0, 64], sizes = [8, 8], strides = [1, 1]} : vector<16x96xf32> to vector<8x8xf32>
    %69 = arith.truncf %68 : vector<8x8xf32> to vector<8x8xbf16>
    %cst_21 = arith.constant dense<0.000000e+00> : vector<8x8xf32>
    %70 = tpu.matmul %65, %67, %cst_21 {dimension_numbers = #tpu.dot_dimension_numbers<[1], [1], [0], [0], [0, 0, 1, 0], [], []>} : vector<8x8xbf16>, vector<8x8xbf16>, vector<8x8xf32> -> vector<8x8xf32>
    %71 = arith.addf %70, %34 : vector<8x8xf32>
    %cst_22 = arith.constant 0.353553385 : f32
    %72 = vector.broadcast %cst_22 : f32 to vector<8x8xf32>
    %73 = arith.mulf %71, %72 : vector<8x8xf32>
    %cst_23 = arith.constant dense<0xFF800000> : vector<8xf32>
    %74 = vector.multi_reduction <maximumf>, %73, %cst_23 [1] : vector<8x8xf32> to vector<8xf32>
    %75 = vector.shape_cast %74 : vector<8xf32> to vector<8x1xf32>
    %76 = vector.broadcast %75 : vector<8x1xf32> to vector<8x8xf32>
    %77 = arith.subf %73, %76 : vector<8x8xf32>
    %78 = math.exp %77 : vector<8x8xf32>
    %cst_24 = arith.constant dense<0.000000e+00> : vector<8xf32>
    %79 = vector.multi_reduction <add>, %78, %cst_24 [1] : vector<8x8xf32> to vector<8xf32>
    %80 = vector.shape_cast %79 : vector<8xf32> to vector<8x1xf32>
    %81 = tpu.reciprocal %80 {approx = true} : vector<8x1xf32> -> vector<8x1xf32>
    %82 = vector.broadcast %81 : vector<8x1xf32> to vector<8x8xf32>
    %83 = arith.mulf %78, %82 : vector<8x8xf32>
    %84 = arith.truncf %83 : vector<8x8xf32> to vector<8x8xbf16>
    %cst_25 = arith.constant dense<0.000000e+00> : vector<8x8xf32>
    %85 = tpu.matmul %84, %69, %cst_25 {dimension_numbers = #tpu.dot_dimension_numbers<[1], [0], [0], [1], [0, 0, 1, 1], [], []>} : vector<8x8xbf16>, vector<8x8xbf16>, vector<8x8xf32> -> vector<8x8xf32>
    %86 = arith.truncf %85 : vector<8x8xf32> to vector<8x8xbf16>
    %87 = vector.extract_strided_slice %37 {offsets = [0, 0], sizes = [8, 32], strides = [1, 1]} : vector<32x32xbf16> to vector<8x32xbf16>
    %cst_26 = arith.constant dense<0.000000e+00> : vector<8x32xf32>
    %88 = tpu.matmul %86, %87, %cst_26 {dimension_numbers = #tpu.dot_dimension_numbers<[1], [0], [0], [1], [0, 0, 1, 1], [], []>} : vector<8x8xbf16>, vector<8x32xbf16>, vector<8x32xf32> -> vector<8x32xf32>
    %89 = arith.addf %63, %88 : vector<8x32xf32>
    %90 = vector.extract_strided_slice %62 {offsets = [0, 8], sizes = [8, 8], strides = [1, 1]} : vector<16x96xf32> to vector<8x8xf32>
    %91 = arith.truncf %90 : vector<8x8xf32> to vector<8x8xbf16>
    %92 = vector.extract_strided_slice %62 {offsets = [0, 40], sizes = [8, 8], strides = [1, 1]} : vector<16x96xf32> to vector<8x8xf32>
    %93 = arith.truncf %92 : vector<8x8xf32> to vector<8x8xbf16>
    %94 = vector.extract_strided_slice %62 {offsets = [0, 72], sizes = [8, 8], strides = [1, 1]} : vector<16x96xf32> to vector<8x8xf32>
    %95 = arith.truncf %94 : vector<8x8xf32> to vector<8x8xbf16>
    %cst_27 = arith.constant dense<0.000000e+00> : vector<8x8xf32>
    %96 = tpu.matmul %91, %93, %cst_27 {dimension_numbers = #tpu.dot_dimension_numbers<[1], [1], [0], [0], [0, 0, 1, 0], [], []>} : vector<8x8xbf16>, vector<8x8xbf16>, vector<8x8xf32> -> vector<8x8xf32>
    %97 = arith.addf %96, %34 : vector<8x8xf32>
    %cst_28 = arith.constant 0.353553385 : f32
    %98 = vector.broadcast %cst_28 : f32 to vector<8x8xf32>
    %99 = arith.mulf %97, %98 : vector<8x8xf32>
    %cst_29 = arith.constant dense<0xFF800000> : vector<8xf32>
    %100 = vector.multi_reduction <maximumf>, %99, %cst_29 [1] : vector<8x8xf32> to vector<8xf32>
    %101 = vector.shape_cast %100 : vector<8xf32> to vector<8x1xf32>
    %102 = vector.broadcast %101 : vector<8x1xf32> to vector<8x8xf32>
    %103 = arith.subf %99, %102 : vector<8x8xf32>
    %104 = math.exp %103 : vector<8x8xf32>
    %cst_30 = arith.constant dense<0.000000e+00> : vector<8xf32>
    %105 = vector.multi_reduction <add>, %104, %cst_30 [1] : vector<8x8xf32> to vector<8xf32>
    %106 = vector.shape_cast %105 : vector<8xf32> to vector<8x1xf32>
    %107 = tpu.reciprocal %106 {approx = true} : vector<8x1xf32> -> vector<8x1xf32>
    %108 = vector.broadcast %107 : vector<8x1xf32> to vector<8x8xf32>
    %109 = arith.mulf %104, %108 : vector<8x8xf32>
    %110 = arith.truncf %109 : vector<8x8xf32> to vector<8x8xbf16>
    %cst_31 = arith.constant dense<0.000000e+00> : vector<8x8xf32>
    %111 = tpu.matmul %110, %95, %cst_31 {dimension_numbers = #tpu.dot_dimension_numbers<[1], [0], [0], [1], [0, 0, 1, 1], [], []>} : vector<8x8xbf16>, vector<8x8xbf16>, vector<8x8xf32> -> vector<8x8xf32>
    %112 = arith.truncf %111 : vector<8x8xf32> to vector<8x8xbf16>
    %113 = vector.extract_strided_slice %37 {offsets = [8, 0], sizes = [8, 32], strides = [1, 1]} : vector<32x32xbf16> to vector<8x32xbf16>
    %cst_32 = arith.constant dense<0.000000e+00> : vector<8x32xf32>
    %114 = tpu.matmul %112, %113, %cst_32 {dimension_numbers = #tpu.dot_dimension_numbers<[1], [0], [0], [1], [0, 0, 1, 1], [], []>} : vector<8x8xbf16>, vector<8x32xbf16>, vector<8x32xf32> -> vector<8x32xf32>
    %115 = arith.addf %89, %114 : vector<8x32xf32>
    %116 = vector.extract_strided_slice %62 {offsets = [0, 16], sizes = [8, 8], strides = [1, 1]} : vector<16x96xf32> to vector<8x8xf32>
    %117 = arith.truncf %116 : vector<8x8xf32> to vector<8x8xbf16>
    %118 = vector.extract_strided_slice %62 {offsets = [0, 48], sizes = [8, 8], strides = [1, 1]} : vector<16x96xf32> to vector<8x8xf32>
    %119 = arith.truncf %118 : vector<8x8xf32> to vector<8x8xbf16>
    %120 = vector.extract_strided_slice %62 {offsets = [0, 80], sizes = [8, 8], strides = [1, 1]} : vector<16x96xf32> to vector<8x8xf32>
    %121 = arith.truncf %120 : vector<8x8xf32> to vector<8x8xbf16>
    %cst_33 = arith.constant dense<0.000000e+00> : vector<8x8xf32>
    %122 = tpu.matmul %117, %119, %cst_33 {dimension_numbers = #tpu.dot_dimension_numbers<[1], [1], [0], [0], [0, 0, 1, 0], [], []>} : vector<8x8xbf16>, vector<8x8xbf16>, vector<8x8xf32> -> vector<8x8xf32>
    %123 = arith.addf %122, %34 : vector<8x8xf32>
    %cst_34 = arith.constant 0.353553385 : f32
    %124 = vector.broadcast %cst_34 : f32 to vector<8x8xf32>
    %125 = arith.mulf %123, %124 : vector<8x8xf32>
    %cst_35 = arith.constant dense<0xFF800000> : vector<8xf32>
    %126 = vector.multi_reduction <maximumf>, %125, %cst_35 [1] : vector<8x8xf32> to vector<8xf32>
    %127 = vector.shape_cast %126 : vector<8xf32> to vector<8x1xf32>
    %128 = vector.broadcast %127 : vector<8x1xf32> to vector<8x8xf32>
    %129 = arith.subf %125, %128 : vector<8x8xf32>
    %130 = math.exp %129 : vector<8x8xf32>
    %cst_36 = arith.constant dense<0.000000e+00> : vector<8xf32>
    %131 = vector.multi_reduction <add>, %130, %cst_36 [1] : vector<8x8xf32> to vector<8xf32>
    %132 = vector.shape_cast %131 : vector<8xf32> to vector<8x1xf32>
    %133 = tpu.reciprocal %132 {approx = true} : vector<8x1xf32> -> vector<8x1xf32>
    %134 = vector.broadcast %133 : vector<8x1xf32> to vector<8x8xf32>
    %135 = arith.mulf %130, %134 : vector<8x8xf32>
    %136 = arith.truncf %135 : vector<8x8xf32> to vector<8x8xbf16>
    %cst_37 = arith.constant dense<0.000000e+00> : vector<8x8xf32>
    %137 = tpu.matmul %136, %121, %cst_37 {dimension_numbers = #tpu.dot_dimension_numbers<[1], [0], [0], [1], [0, 0, 1, 1], [], []>} : vector<8x8xbf16>, vector<8x8xbf16>, vector<8x8xf32> -> vector<8x8xf32>
    %138 = arith.truncf %137 : vector<8x8xf32> to vector<8x8xbf16>
    %139 = vector.extract_strided_slice %37 {offsets = [16, 0], sizes = [8, 32], strides = [1, 1]} : vector<32x32xbf16> to vector<8x32xbf16>
    %cst_38 = arith.constant dense<0.000000e+00> : vector<8x32xf32>
    %140 = tpu.matmul %138, %139, %cst_38 {dimension_numbers = #tpu.dot_dimension_numbers<[1], [0], [0], [1], [0, 0, 1, 1], [], []>} : vector<8x8xbf16>, vector<8x32xbf16>, vector<8x32xf32> -> vector<8x32xf32>
    %141 = arith.addf %115, %140 : vector<8x32xf32>
    %142 = vector.extract_strided_slice %62 {offsets = [0, 24], sizes = [8, 8], strides = [1, 1]} : vector<16x96xf32> to vector<8x8xf32>
    %143 = arith.truncf %142 : vector<8x8xf32> to vector<8x8xbf16>
    %144 = vector.extract_strided_slice %62 {offsets = [0, 56], sizes = [8, 8], strides = [1, 1]} : vector<16x96xf32> to vector<8x8xf32>
    %145 = arith.truncf %144 : vector<8x8xf32> to vector<8x8xbf16>
    %146 = vector.extract_strided_slice %62 {offsets = [0, 88], sizes = [8, 8], strides = [1, 1]} : vector<16x96xf32> to vector<8x8xf32>
    %147 = arith.truncf %146 : vector<8x8xf32> to vector<8x8xbf16>
    %cst_39 = arith.constant dense<0.000000e+00> : vector<8x8xf32>
    %148 = tpu.matmul %143, %145, %cst_39 {dimension_numbers = #tpu.dot_dimension_numbers<[1], [1], [0], [0], [0, 0, 1, 0], [], []>} : vector<8x8xbf16>, vector<8x8xbf16>, vector<8x8xf32> -> vector<8x8xf32>
    %149 = arith.addf %148, %34 : vector<8x8xf32>
    %cst_40 = arith.constant 0.353553385 : f32
    %150 = vector.broadcast %cst_40 : f32 to vector<8x8xf32>
    %151 = arith.mulf %149, %150 : vector<8x8xf32>
    %cst_41 = arith.constant dense<0xFF800000> : vector<8xf32>
    %152 = vector.multi_reduction <maximumf>, %151, %cst_41 [1] : vector<8x8xf32> to vector<8xf32>
    %153 = vector.shape_cast %152 : vector<8xf32> to vector<8x1xf32>
    %154 = vector.broadcast %153 : vector<8x1xf32> to vector<8x8xf32>
    %155 = arith.subf %151, %154 : vector<8x8xf32>
    %156 = math.exp %155 : vector<8x8xf32>
    %cst_42 = arith.constant dense<0.000000e+00> : vector<8xf32>
    %157 = vector.multi_reduction <add>, %156, %cst_42 [1] : vector<8x8xf32> to vector<8xf32>
    %158 = vector.shape_cast %157 : vector<8xf32> to vector<8x1xf32>
    %159 = tpu.reciprocal %158 {approx = true} : vector<8x1xf32> -> vector<8x1xf32>
    %160 = vector.broadcast %159 : vector<8x1xf32> to vector<8x8xf32>
    %161 = arith.mulf %156, %160 : vector<8x8xf32>
    %162 = arith.truncf %161 : vector<8x8xf32> to vector<8x8xbf16>
    %cst_43 = arith.constant dense<0.000000e+00> : vector<8x8xf32>
    %163 = tpu.matmul %162, %147, %cst_43 {dimension_numbers = #tpu.dot_dimension_numbers<[1], [0], [0], [1], [0, 0, 1, 1], [], []>} : vector<8x8xbf16>, vector<8x8xbf16>, vector<8x8xf32> -> vector<8x8xf32>
    %164 = arith.truncf %163 : vector<8x8xf32> to vector<8x8xbf16>
    %165 = vector.extract_strided_slice %37 {offsets = [24, 0], sizes = [8, 32], strides = [1, 1]} : vector<32x32xbf16> to vector<8x32xbf16>
    %cst_44 = arith.constant dense<0.000000e+00> : vector<8x32xf32>
    %166 = tpu.matmul %164, %165, %cst_44 {dimension_numbers = #tpu.dot_dimension_numbers<[1], [0], [0], [1], [0, 0, 1, 1], [], []>} : vector<8x8xbf16>, vector<8x32xbf16>, vector<8x32xf32> -> vector<8x32xf32>
    %167 = arith.addf %141, %166 : vector<8x32xf32>
    %cst_45 = arith.constant 0.000000e+00 : f32
    %168 = vector.broadcast %cst_45 : f32 to vector<8x32xf32>
    %169 = vector.extract_strided_slice %62 {offsets = [8, 0], sizes = [8, 8], strides = [1, 1]} : vector<16x96xf32> to vector<8x8xf32>
    %170 = arith.truncf %169 : vector<8x8xf32> to vector<8x8xbf16>
    %171 = vector.extract_strided_slice %62 {offsets = [8, 32], sizes = [8, 8], strides = [1, 1]} : vector<16x96xf32> to vector<8x8xf32>
    %172 = arith.truncf %171 : vector<8x8xf32> to vector<8x8xbf16>
    %173 = vector.extract_strided_slice %62 {offsets = [8, 64], sizes = [8, 8], strides = [1, 1]} : vector<16x96xf32> to vector<8x8xf32>
    %174 = arith.truncf %173 : vector<8x8xf32> to vector<8x8xbf16>
    %cst_46 = arith.constant dense<0.000000e+00> : vector<8x8xf32>
    %175 = tpu.matmul %170, %172, %cst_46 {dimension_numbers = #tpu.dot_dimension_numbers<[1], [1], [0], [0], [0, 0, 1, 0], [], []>} : vector<8x8xbf16>, vector<8x8xbf16>, vector<8x8xf32> -> vector<8x8xf32>
    %176 = arith.addf %175, %34 : vector<8x8xf32>
    %cst_47 = arith.constant 0.353553385 : f32
    %177 = vector.broadcast %cst_47 : f32 to vector<8x8xf32>
    %178 = arith.mulf %176, %177 : vector<8x8xf32>
    %cst_48 = arith.constant dense<0xFF800000> : vector<8xf32>
    %179 = vector.multi_reduction <maximumf>, %178, %cst_48 [1] : vector<8x8xf32> to vector<8xf32>
    %180 = vector.shape_cast %179 : vector<8xf32> to vector<8x1xf32>
    %181 = vector.broadcast %180 : vector<8x1xf32> to vector<8x8xf32>
    %182 = arith.subf %178, %181 : vector<8x8xf32>
    %183 = math.exp %182 : vector<8x8xf32>
    %cst_49 = arith.constant dense<0.000000e+00> : vector<8xf32>
    %184 = vector.multi_reduction <add>, %183, %cst_49 [1] : vector<8x8xf32> to vector<8xf32>
    %185 = vector.shape_cast %184 : vector<8xf32> to vector<8x1xf32>
    %186 = tpu.reciprocal %185 {approx = true} : vector<8x1xf32> -> vector<8x1xf32>
    %187 = vector.broadcast %186 : vector<8x1xf32> to vector<8x8xf32>
    %188 = arith.mulf %183, %187 : vector<8x8xf32>
    %189 = arith.truncf %188 : vector<8x8xf32> to vector<8x8xbf16>
    %cst_50 = arith.constant dense<0.000000e+00> : vector<8x8xf32>
    %190 = tpu.matmul %189, %174, %cst_50 {dimension_numbers = #tpu.dot_dimension_numbers<[1], [0], [0], [1], [0, 0, 1, 1], [], []>} : vector<8x8xbf16>, vector<8x8xbf16>, vector<8x8xf32> -> vector<8x8xf32>
    %191 = arith.truncf %190 : vector<8x8xf32> to vector<8x8xbf16>
    %192 = vector.extract_strided_slice %37 {offsets = [0, 0], sizes = [8, 32], strides = [1, 1]} : vector<32x32xbf16> to vector<8x32xbf16>
    %cst_51 = arith.constant dense<0.000000e+00> : vector<8x32xf32>
    %193 = tpu.matmul %191, %192, %cst_51 {dimension_numbers = #tpu.dot_dimension_numbers<[1], [0], [0], [1], [0, 0, 1, 1], [], []>} : vector<8x8xbf16>, vector<8x32xbf16>, vector<8x32xf32> -> vector<8x32xf32>
    %194 = arith.addf %168, %193 : vector<8x32xf32>
    %195 = vector.extract_strided_slice %62 {offsets = [8, 8], sizes = [8, 8], strides = [1, 1]} : vector<16x96xf32> to vector<8x8xf32>
    %196 = arith.truncf %195 : vector<8x8xf32> to vector<8x8xbf16>
    %197 = vector.extract_strided_slice %62 {offsets = [8, 40], sizes = [8, 8], strides = [1, 1]} : vector<16x96xf32> to vector<8x8xf32>
    %198 = arith.truncf %197 : vector<8x8xf32> to vector<8x8xbf16>
    %199 = vector.extract_strided_slice %62 {offsets = [8, 72], sizes = [8, 8], strides = [1, 1]} : vector<16x96xf32> to vector<8x8xf32>
    %200 = arith.truncf %199 : vector<8x8xf32> to vector<8x8xbf16>
    %cst_52 = arith.constant dense<0.000000e+00> : vector<8x8xf32>
    %201 = tpu.matmul %196, %198, %cst_52 {dimension_numbers = #tpu.dot_dimension_numbers<[1], [1], [0], [0], [0, 0, 1, 0], [], []>} : vector<8x8xbf16>, vector<8x8xbf16>, vector<8x8xf32> -> vector<8x8xf32>
    %202 = arith.addf %201, %34 : vector<8x8xf32>
    %cst_53 = arith.constant 0.353553385 : f32
    %203 = vector.broadcast %cst_53 : f32 to vector<8x8xf32>
    %204 = arith.mulf %202, %203 : vector<8x8xf32>
    %cst_54 = arith.constant dense<0xFF800000> : vector<8xf32>
    %205 = vector.multi_reduction <maximumf>, %204, %cst_54 [1] : vector<8x8xf32> to vector<8xf32>
    %206 = vector.shape_cast %205 : vector<8xf32> to vector<8x1xf32>
    %207 = vector.broadcast %206 : vector<8x1xf32> to vector<8x8xf32>
    %208 = arith.subf %204, %207 : vector<8x8xf32>
    %209 = math.exp %208 : vector<8x8xf32>
    %cst_55 = arith.constant dense<0.000000e+00> : vector<8xf32>
    %210 = vector.multi_reduction <add>, %209, %cst_55 [1] : vector<8x8xf32> to vector<8xf32>
    %211 = vector.shape_cast %210 : vector<8xf32> to vector<8x1xf32>
    %212 = tpu.reciprocal %211 {approx = true} : vector<8x1xf32> -> vector<8x1xf32>
    %213 = vector.broadcast %212 : vector<8x1xf32> to vector<8x8xf32>
    %214 = arith.mulf %209, %213 : vector<8x8xf32>
    %215 = arith.truncf %214 : vector<8x8xf32> to vector<8x8xbf16>
    %cst_56 = arith.constant dense<0.000000e+00> : vector<8x8xf32>
    %216 = tpu.matmul %215, %200, %cst_56 {dimension_numbers = #tpu.dot_dimension_numbers<[1], [0], [0], [1], [0, 0, 1, 1], [], []>} : vector<8x8xbf16>, vector<8x8xbf16>, vector<8x8xf32> -> vector<8x8xf32>
    %217 = arith.truncf %216 : vector<8x8xf32> to vector<8x8xbf16>
    %218 = vector.extract_strided_slice %37 {offsets = [8, 0], sizes = [8, 32], strides = [1, 1]} : vector<32x32xbf16> to vector<8x32xbf16>
    %cst_57 = arith.constant dense<0.000000e+00> : vector<8x32xf32>
    %219 = tpu.matmul %217, %218, %cst_57 {dimension_numbers = #tpu.dot_dimension_numbers<[1], [0], [0], [1], [0, 0, 1, 1], [], []>} : vector<8x8xbf16>, vector<8x32xbf16>, vector<8x32xf32> -> vector<8x32xf32>
    %220 = arith.addf %194, %219 : vector<8x32xf32>
    %221 = vector.extract_strided_slice %62 {offsets = [8, 16], sizes = [8, 8], strides = [1, 1]} : vector<16x96xf32> to vector<8x8xf32>
    %222 = arith.truncf %221 : vector<8x8xf32> to vector<8x8xbf16>
    %223 = vector.extract_strided_slice %62 {offsets = [8, 48], sizes = [8, 8], strides = [1, 1]} : vector<16x96xf32> to vector<8x8xf32>
    %224 = arith.truncf %223 : vector<8x8xf32> to vector<8x8xbf16>
    %225 = vector.extract_strided_slice %62 {offsets = [8, 80], sizes = [8, 8], strides = [1, 1]} : vector<16x96xf32> to vector<8x8xf32>
    %226 = arith.truncf %225 : vector<8x8xf32> to vector<8x8xbf16>
    %cst_58 = arith.constant dense<0.000000e+00> : vector<8x8xf32>
    %227 = tpu.matmul %222, %224, %cst_58 {dimension_numbers = #tpu.dot_dimension_numbers<[1], [1], [0], [0], [0, 0, 1, 0], [], []>} : vector<8x8xbf16>, vector<8x8xbf16>, vector<8x8xf32> -> vector<8x8xf32>
    %228 = arith.addf %227, %34 : vector<8x8xf32>
    %cst_59 = arith.constant 0.353553385 : f32
    %229 = vector.broadcast %cst_59 : f32 to vector<8x8xf32>
    %230 = arith.mulf %228, %229 : vector<8x8xf32>
    %cst_60 = arith.constant dense<0xFF800000> : vector<8xf32>
    %231 = vector.multi_reduction <maximumf>, %230, %cst_60 [1] : vector<8x8xf32> to vector<8xf32>
    %232 = vector.shape_cast %231 : vector<8xf32> to vector<8x1xf32>
    %233 = vector.broadcast %232 : vector<8x1xf32> to vector<8x8xf32>
    %234 = arith.subf %230, %233 : vector<8x8xf32>
    %235 = math.exp %234 : vector<8x8xf32>
    %cst_61 = arith.constant dense<0.000000e+00> : vector<8xf32>
    %236 = vector.multi_reduction <add>, %235, %cst_61 [1] : vector<8x8xf32> to vector<8xf32>
    %237 = vector.shape_cast %236 : vector<8xf32> to vector<8x1xf32>
    %238 = tpu.reciprocal %237 {approx = true} : vector<8x1xf32> -> vector<8x1xf32>
    %239 = vector.broadcast %238 : vector<8x1xf32> to vector<8x8xf32>
    %240 = arith.mulf %235, %239 : vector<8x8xf32>
    %241 = arith.truncf %240 : vector<8x8xf32> to vector<8x8xbf16>
    %cst_62 = arith.constant dense<0.000000e+00> : vector<8x8xf32>
    %242 = tpu.matmul %241, %226, %cst_62 {dimension_numbers = #tpu.dot_dimension_numbers<[1], [0], [0], [1], [0, 0, 1, 1], [], []>} : vector<8x8xbf16>, vector<8x8xbf16>, vector<8x8xf32> -> vector<8x8xf32>
    %243 = arith.truncf %242 : vector<8x8xf32> to vector<8x8xbf16>
    %244 = vector.extract_strided_slice %37 {offsets = [16, 0], sizes = [8, 32], strides = [1, 1]} : vector<32x32xbf16> to vector<8x32xbf16>
    %cst_63 = arith.constant dense<0.000000e+00> : vector<8x32xf32>
    %245 = tpu.matmul %243, %244, %cst_63 {dimension_numbers = #tpu.dot_dimension_numbers<[1], [0], [0], [1], [0, 0, 1, 1], [], []>} : vector<8x8xbf16>, vector<8x32xbf16>, vector<8x32xf32> -> vector<8x32xf32>
    %246 = arith.addf %220, %245 : vector<8x32xf32>
    %247 = vector.extract_strided_slice %62 {offsets = [8, 24], sizes = [8, 8], strides = [1, 1]} : vector<16x96xf32> to vector<8x8xf32>
    %248 = arith.truncf %247 : vector<8x8xf32> to vector<8x8xbf16>
    %249 = vector.extract_strided_slice %62 {offsets = [8, 56], sizes = [8, 8], strides = [1, 1]} : vector<16x96xf32> to vector<8x8xf32>
    %250 = arith.truncf %249 : vector<8x8xf32> to vector<8x8xbf16>
    %251 = vector.extract_strided_slice %62 {offsets = [8, 88], sizes = [8, 8], strides = [1, 1]} : vector<16x96xf32> to vector<8x8xf32>
    %252 = arith.truncf %251 : vector<8x8xf32> to vector<8x8xbf16>
    %cst_64 = arith.constant dense<0.000000e+00> : vector<8x8xf32>
    %253 = tpu.matmul %248, %250, %cst_64 {dimension_numbers = #tpu.dot_dimension_numbers<[1], [1], [0], [0], [0, 0, 1, 0], [], []>} : vector<8x8xbf16>, vector<8x8xbf16>, vector<8x8xf32> -> vector<8x8xf32>
    %254 = arith.addf %253, %34 : vector<8x8xf32>
    %cst_65 = arith.constant 0.353553385 : f32
    %255 = vector.broadcast %cst_65 : f32 to vector<8x8xf32>
    %256 = arith.mulf %254, %255 : vector<8x8xf32>
    %cst_66 = arith.constant dense<0xFF800000> : vector<8xf32>
    %257 = vector.multi_reduction <maximumf>, %256, %cst_66 [1] : vector<8x8xf32> to vector<8xf32>
    %258 = vector.shape_cast %257 : vector<8xf32> to vector<8x1xf32>
    %259 = vector.broadcast %258 : vector<8x1xf32> to vector<8x8xf32>
    %260 = arith.subf %256, %259 : vector<8x8xf32>
    %261 = math.exp %260 : vector<8x8xf32>
    %cst_67 = arith.constant dense<0.000000e+00> : vector<8xf32>
    %262 = vector.multi_reduction <add>, %261, %cst_67 [1] : vector<8x8xf32> to vector<8xf32>
    %263 = vector.shape_cast %262 : vector<8xf32> to vector<8x1xf32>
    %264 = tpu.reciprocal %263 {approx = true} : vector<8x1xf32> -> vector<8x1xf32>
    %265 = vector.broadcast %264 : vector<8x1xf32> to vector<8x8xf32>
    %266 = arith.mulf %261, %265 : vector<8x8xf32>
    %267 = arith.truncf %266 : vector<8x8xf32> to vector<8x8xbf16>
    %cst_68 = arith.constant dense<0.000000e+00> : vector<8x8xf32>
    %268 = tpu.matmul %267, %252, %cst_68 {dimension_numbers = #tpu.dot_dimension_numbers<[1], [0], [0], [1], [0, 0, 1, 1], [], []>} : vector<8x8xbf16>, vector<8x8xbf16>, vector<8x8xf32> -> vector<8x8xf32>
    %269 = arith.truncf %268 : vector<8x8xf32> to vector<8x8xbf16>
    %270 = vector.extract_strided_slice %37 {offsets = [24, 0], sizes = [8, 32], strides = [1, 1]} : vector<32x32xbf16> to vector<8x32xbf16>
    %cst_69 = arith.constant dense<0.000000e+00> : vector<8x32xf32>
    %271 = tpu.matmul %269, %270, %cst_69 {dimension_numbers = #tpu.dot_dimension_numbers<[1], [0], [0], [1], [0, 0, 1, 1], [], []>} : vector<8x8xbf16>, vector<8x32xbf16>, vector<8x32xf32> -> vector<8x32xf32>
    %272 = arith.addf %246, %271 : vector<8x32xf32>
    %273 = tpu.concatenate %167, %272 in 0 : vector<8x32xf32>, vector<8x32xf32> -> vector<16x32xf32>
    %c2 = arith.constant 2 : index
    %c0_70 = arith.constant 0 : index
    %274 = vector.load %arg6[%c2, %c0_70] : memref<17x128xf32, #tpu.memory_space<vmem>>, vector<1x32xf32>
    %275 = vector.broadcast %274 : vector<1x32xf32> to vector<16x32xf32>
    %276 = arith.addf %273, %275 : vector<16x32xf32>
    %277 = arith.addf %28, %276 : vector<16x32xf32>
    %c3 = arith.constant 3 : index
    %c0_71 = arith.constant 0 : index
    %278 = vector.load %arg6[%c3, %c0_71] : memref<17x128xf32, #tpu.memory_space<vmem>>, vector<1x32xf32>
    %c4 = arith.constant 4 : index
    %c0_72 = arith.constant 0 : index
    %279 = vector.load %arg6[%c4, %c0_72] : memref<17x128xf32, #tpu.memory_space<vmem>>, vector<1x32xf32>
    %cst_73 = arith.constant dense<0.000000e+00> : vector<16xf32>
    %280 = vector.multi_reduction <add>, %277, %cst_73 [1] : vector<16x32xf32> to vector<16xf32>
    %281 = vector.shape_cast %280 : vector<16xf32> to vector<16x1xf32>
    %cst_74 = arith.constant 3.200000e+01 : f32
    %282 = vector.broadcast %cst_74 : f32 to vector<16x1xf32>
    %283 = arith.divf %281, %282 : vector<16x1xf32>
    %284 = vector.broadcast %283 : vector<16x1xf32> to vector<16x32xf32>
    %285 = arith.subf %277, %284 : vector<16x32xf32>
    %286 = arith.mulf %285, %285 : vector<16x32xf32>
    %cst_75 = arith.constant dense<0.000000e+00> : vector<16xf32>
    %287 = vector.multi_reduction <add>, %286, %cst_75 [1] : vector<16x32xf32> to vector<16xf32>
    %288 = vector.shape_cast %287 : vector<16xf32> to vector<16x1xf32>
    %cst_76 = arith.constant 3.200000e+01 : f32
    %289 = vector.broadcast %cst_76 : f32 to vector<16x1xf32>
    %290 = arith.divf %288, %289 : vector<16x1xf32>
    %cst_77 = arith.constant 9.99999974E-6 : f32
    %291 = vector.broadcast %cst_77 : f32 to vector<16x1xf32>
    %292 = arith.addf %290, %291 : vector<16x1xf32>
    %293 = math.rsqrt %292 : vector<16x1xf32>
    %294 = vector.broadcast %293 : vector<16x1xf32> to vector<16x32xf32>
    %295 = arith.mulf %285, %294 : vector<16x32xf32>
    %296 = vector.broadcast %278 : vector<1x32xf32> to vector<16x32xf32>
    %297 = arith.mulf %296, %295 : vector<16x32xf32>
    %298 = vector.broadcast %279 : vector<1x32xf32> to vector<16x32xf32>
    %299 = arith.addf %297, %298 : vector<16x32xf32>
    %300 = arith.truncf %299 : vector<16x32xf32> to vector<16x32xbf16>
    %301 = vector.extract_strided_slice %36 {offsets = [0, 128], sizes = [32, 128], strides = [1, 1]} : vector<32x256xbf16> to vector<32x128xbf16>
    %cst_78 = arith.constant dense<0.000000e+00> : vector<16x128xf32>
    %302 = tpu.matmul %300, %301, %cst_78 {dimension_numbers = #tpu.dot_dimension_numbers<[1], [0], [0], [1], [0, 0, 1, 1], [], []>} : vector<16x32xbf16>, vector<32x128xbf16>, vector<16x128xf32> -> vector<16x128xf32>
    %c5 = arith.constant 5 : index
    %c0_79 = arith.constant 0 : index
    %303 = vector.load %arg6[%c5, %c0_79] : memref<17x128xf32, #tpu.memory_space<vmem>>, vector<1x128xf32>
    %304 = vector.broadcast %303 : vector<1x128xf32> to vector<16x128xf32>
    %305 = arith.addf %302, %304 : vector<16x128xf32>
    %cst_80 = arith.constant 5.000000e-01 : f32
    %306 = vector.broadcast %cst_80 : f32 to vector<16x128xf32>
    %307 = arith.mulf %306, %305 : vector<16x128xf32>
    %cst_81 = arith.constant 0.707106769 : f32
    %308 = vector.broadcast %cst_81 : f32 to vector<16x128xf32>
    %309 = arith.mulf %305, %308 : vector<16x128xf32>
    %310 = math.absf %309 : vector<16x128xf32>
    %cst_82 = arith.constant 0.327591091 : f32
    %311 = vector.broadcast %cst_82 : f32 to vector<16x128xf32>
    %312 = arith.mulf %311, %310 : vector<16x128xf32>
    %cst_83 = arith.constant 1.000000e+00 : f32
    %313 = vector.broadcast %cst_83 : f32 to vector<16x128xf32>
    %314 = arith.addf %313, %312 : vector<16x128xf32>
    %315 = tpu.reciprocal %314 {approx = true} : vector<16x128xf32> -> vector<16x128xf32>
    %cst_84 = arith.constant 1.06140542 : f32
    %316 = vector.broadcast %cst_84 : f32 to vector<16x128xf32>
    %317 = arith.mulf %316, %315 : vector<16x128xf32>
    %cst_85 = arith.constant -1.45315206 : f32
    %318 = vector.broadcast %cst_85 : f32 to vector<16x128xf32>
    %319 = arith.addf %317, %318 : vector<16x128xf32>
    %320 = arith.mulf %319, %315 : vector<16x128xf32>
    %cst_86 = arith.constant 1.42141378 : f32
    %321 = vector.broadcast %cst_86 : f32 to vector<16x128xf32>
    %322 = arith.addf %320, %321 : vector<16x128xf32>
    %323 = arith.mulf %322, %315 : vector<16x128xf32>
    %cst_87 = arith.constant -0.284496725 : f32
    %324 = vector.broadcast %cst_87 : f32 to vector<16x128xf32>
    %325 = arith.addf %323, %324 : vector<16x128xf32>
    %326 = arith.mulf %325, %315 : vector<16x128xf32>
    %cst_88 = arith.constant 0.254829586 : f32
    %327 = vector.broadcast %cst_88 : f32 to vector<16x128xf32>
    %328 = arith.addf %326, %327 : vector<16x128xf32>
    %329 = arith.mulf %328, %315 : vector<16x128xf32>
    %cst_89 = arith.constant 0.000000e+00 : f32
    %330 = vector.broadcast %cst_89 : f32 to vector<16x128xf32>
    %331 = arith.subf %330, %310 : vector<16x128xf32>
    %332 = arith.mulf %331, %310 : vector<16x128xf32>
    %333 = math.exp %332 : vector<16x128xf32>
    %334 = arith.mulf %329, %333 : vector<16x128xf32>
    %cst_90 = arith.constant 1.000000e+00 : f32
    %335 = vector.broadcast %cst_90 : f32 to vector<16x128xf32>
    %336 = arith.subf %335, %334 : vector<16x128xf32>
    %cst_91 = arith.constant 0.000000e+00 : f32
    %337 = vector.broadcast %cst_91 : f32 to vector<16x128xf32>
    %338 = arith.cmpf olt, %309, %337 : vector<16x128xf32>
    %cst_92 = arith.constant 0.000000e+00 : f32
    %339 = vector.broadcast %cst_92 : f32 to vector<16x128xf32>
    %340 = arith.subf %339, %336 : vector<16x128xf32>
    %341 = arith.select %338, %340, %336 : vector<16x128xi1>, vector<16x128xf32>
    %cst_93 = arith.constant 1.000000e+00 : f32
    %342 = vector.broadcast %cst_93 : f32 to vector<16x128xf32>
    %343 = arith.addf %342, %341 : vector<16x128xf32>
    %344 = arith.mulf %307, %343 : vector<16x128xf32>
    %345 = arith.truncf %344 : vector<16x128xf32> to vector<16x128xbf16>
    %c0_94 = arith.constant 0 : index
    %c0_95 = arith.constant 0 : index
    %c0_96 = arith.constant 0 : index
    %346 = vector.load %arg4[%c0_94, %c0_95, %c0_96] : memref<2x128x32xbf16, #tpu.memory_space<vmem>>, vector<1x128x32xbf16>
    %347 = vector.shape_cast %346 : vector<1x128x32xbf16> to vector<128x32xbf16>
    %cst_97 = arith.constant dense<0.000000e+00> : vector<16x32xf32>
    %348 = tpu.matmul %345, %347, %cst_97 {dimension_numbers = #tpu.dot_dimension_numbers<[1], [0], [0], [1], [0, 0, 1, 1], [], []>} : vector<16x128xbf16>, vector<128x32xbf16>, vector<16x32xf32> -> vector<16x32xf32>
    %c6 = arith.constant 6 : index
    %c0_98 = arith.constant 0 : index
    %349 = vector.load %arg6[%c6, %c0_98] : memref<17x128xf32, #tpu.memory_space<vmem>>, vector<1x32xf32>
    %350 = vector.broadcast %349 : vector<1x32xf32> to vector<16x32xf32>
    %351 = arith.addf %348, %350 : vector<16x32xf32>
    %352 = arith.addf %277, %351 : vector<16x32xf32>
    %c1_99 = arith.constant 1 : index
    %c0_100 = arith.constant 0 : index
    %c0_101 = arith.constant 0 : index
    %353 = vector.load %arg3[%c1_99, %c0_100, %c0_101] : memref<2x32x256xbf16, #tpu.memory_space<vmem>>, vector<1x32x256xbf16>
    %354 = vector.shape_cast %353 : vector<1x32x256xbf16> to vector<32x256xbf16>
    %355 = vector.extract_strided_slice %354 {offsets = [0, 96], sizes = [32, 32], strides = [1, 1]} : vector<32x256xbf16> to vector<32x32xbf16>
    %c7 = arith.constant 7 : index
    %c0_102 = arith.constant 0 : index
    %356 = vector.load %arg6[%c7, %c0_102] : memref<17x128xf32, #tpu.memory_space<vmem>>, vector<1x32xf32>
    %c8 = arith.constant 8 : index
    %c0_103 = arith.constant 0 : index
    %357 = vector.load %arg6[%c8, %c0_103] : memref<17x128xf32, #tpu.memory_space<vmem>>, vector<1x32xf32>
    %cst_104 = arith.constant dense<0.000000e+00> : vector<16xf32>
    %358 = vector.multi_reduction <add>, %352, %cst_104 [1] : vector<16x32xf32> to vector<16xf32>
    %359 = vector.shape_cast %358 : vector<16xf32> to vector<16x1xf32>
    %cst_105 = arith.constant 3.200000e+01 : f32
    %360 = vector.broadcast %cst_105 : f32 to vector<16x1xf32>
    %361 = arith.divf %359, %360 : vector<16x1xf32>
    %362 = vector.broadcast %361 : vector<16x1xf32> to vector<16x32xf32>
    %363 = arith.subf %352, %362 : vector<16x32xf32>
    %364 = arith.mulf %363, %363 : vector<16x32xf32>
    %cst_106 = arith.constant dense<0.000000e+00> : vector<16xf32>
    %365 = vector.multi_reduction <add>, %364, %cst_106 [1] : vector<16x32xf32> to vector<16xf32>
    %366 = vector.shape_cast %365 : vector<16xf32> to vector<16x1xf32>
    %cst_107 = arith.constant 3.200000e+01 : f32
    %367 = vector.broadcast %cst_107 : f32 to vector<16x1xf32>
    %368 = arith.divf %366, %367 : vector<16x1xf32>
    %cst_108 = arith.constant 9.99999974E-6 : f32
    %369 = vector.broadcast %cst_108 : f32 to vector<16x1xf32>
    %370 = arith.addf %368, %369 : vector<16x1xf32>
    %371 = math.rsqrt %370 : vector<16x1xf32>
    %372 = vector.broadcast %371 : vector<16x1xf32> to vector<16x32xf32>
    %373 = arith.mulf %363, %372 : vector<16x32xf32>
    %374 = vector.broadcast %356 : vector<1x32xf32> to vector<16x32xf32>
    %375 = arith.mulf %374, %373 : vector<16x32xf32>
    %376 = vector.broadcast %357 : vector<1x32xf32> to vector<16x32xf32>
    %377 = arith.addf %375, %376 : vector<16x32xf32>
    %378 = arith.truncf %377 : vector<16x32xf32> to vector<16x32xbf16>
    %379 = vector.extract_strided_slice %354 {offsets = [0, 0], sizes = [32, 96], strides = [1, 1]} : vector<32x256xbf16> to vector<32x96xbf16>
    %cst_109 = arith.constant dense<0.000000e+00> : vector<16x96xf32>
    %380 = tpu.matmul %378, %379, %cst_109 {dimension_numbers = #tpu.dot_dimension_numbers<[1], [0], [0], [1], [0, 0, 1, 1], [], []>} : vector<16x32xbf16>, vector<32x96xbf16>, vector<16x96xf32> -> vector<16x96xf32>
    %cst_110 = arith.constant 0.000000e+00 : f32
    %381 = vector.broadcast %cst_110 : f32 to vector<8x32xf32>
    %382 = vector.extract_strided_slice %380 {offsets = [0, 0], sizes = [8, 8], strides = [1, 1]} : vector<16x96xf32> to vector<8x8xf32>
    %383 = arith.truncf %382 : vector<8x8xf32> to vector<8x8xbf16>
    %384 = vector.extract_strided_slice %380 {offsets = [0, 32], sizes = [8, 8], strides = [1, 1]} : vector<16x96xf32> to vector<8x8xf32>
    %385 = arith.truncf %384 : vector<8x8xf32> to vector<8x8xbf16>
    %386 = vector.extract_strided_slice %380 {offsets = [0, 64], sizes = [8, 8], strides = [1, 1]} : vector<16x96xf32> to vector<8x8xf32>
    %387 = arith.truncf %386 : vector<8x8xf32> to vector<8x8xbf16>
    %cst_111 = arith.constant dense<0.000000e+00> : vector<8x8xf32>
    %388 = tpu.matmul %383, %385, %cst_111 {dimension_numbers = #tpu.dot_dimension_numbers<[1], [1], [0], [0], [0, 0, 1, 0], [], []>} : vector<8x8xbf16>, vector<8x8xbf16>, vector<8x8xf32> -> vector<8x8xf32>
    %389 = arith.addf %388, %34 : vector<8x8xf32>
    %cst_112 = arith.constant 0.353553385 : f32
    %390 = vector.broadcast %cst_112 : f32 to vector<8x8xf32>
    %391 = arith.mulf %389, %390 : vector<8x8xf32>
    %cst_113 = arith.constant dense<0xFF800000> : vector<8xf32>
    %392 = vector.multi_reduction <maximumf>, %391, %cst_113 [1] : vector<8x8xf32> to vector<8xf32>
    %393 = vector.shape_cast %392 : vector<8xf32> to vector<8x1xf32>
    %394 = vector.broadcast %393 : vector<8x1xf32> to vector<8x8xf32>
    %395 = arith.subf %391, %394 : vector<8x8xf32>
    %396 = math.exp %395 : vector<8x8xf32>
    %cst_114 = arith.constant dense<0.000000e+00> : vector<8xf32>
    %397 = vector.multi_reduction <add>, %396, %cst_114 [1] : vector<8x8xf32> to vector<8xf32>
    %398 = vector.shape_cast %397 : vector<8xf32> to vector<8x1xf32>
    %399 = tpu.reciprocal %398 {approx = true} : vector<8x1xf32> -> vector<8x1xf32>
    %400 = vector.broadcast %399 : vector<8x1xf32> to vector<8x8xf32>
    %401 = arith.mulf %396, %400 : vector<8x8xf32>
    %402 = arith.truncf %401 : vector<8x8xf32> to vector<8x8xbf16>
    %cst_115 = arith.constant dense<0.000000e+00> : vector<8x8xf32>
    %403 = tpu.matmul %402, %387, %cst_115 {dimension_numbers = #tpu.dot_dimension_numbers<[1], [0], [0], [1], [0, 0, 1, 1], [], []>} : vector<8x8xbf16>, vector<8x8xbf16>, vector<8x8xf32> -> vector<8x8xf32>
    %404 = arith.truncf %403 : vector<8x8xf32> to vector<8x8xbf16>
    %405 = vector.extract_strided_slice %355 {offsets = [0, 0], sizes = [8, 32], strides = [1, 1]} : vector<32x32xbf16> to vector<8x32xbf16>
    %cst_116 = arith.constant dense<0.000000e+00> : vector<8x32xf32>
    %406 = tpu.matmul %404, %405, %cst_116 {dimension_numbers = #tpu.dot_dimension_numbers<[1], [0], [0], [1], [0, 0, 1, 1], [], []>} : vector<8x8xbf16>, vector<8x32xbf16>, vector<8x32xf32> -> vector<8x32xf32>
    %407 = arith.addf %381, %406 : vector<8x32xf32>
    %408 = vector.extract_strided_slice %380 {offsets = [0, 8], sizes = [8, 8], strides = [1, 1]} : vector<16x96xf32> to vector<8x8xf32>
    %409 = arith.truncf %408 : vector<8x8xf32> to vector<8x8xbf16>
    %410 = vector.extract_strided_slice %380 {offsets = [0, 40], sizes = [8, 8], strides = [1, 1]} : vector<16x96xf32> to vector<8x8xf32>
    %411 = arith.truncf %410 : vector<8x8xf32> to vector<8x8xbf16>
    %412 = vector.extract_strided_slice %380 {offsets = [0, 72], sizes = [8, 8], strides = [1, 1]} : vector<16x96xf32> to vector<8x8xf32>
    %413 = arith.truncf %412 : vector<8x8xf32> to vector<8x8xbf16>
    %cst_117 = arith.constant dense<0.000000e+00> : vector<8x8xf32>
    %414 = tpu.matmul %409, %411, %cst_117 {dimension_numbers = #tpu.dot_dimension_numbers<[1], [1], [0], [0], [0, 0, 1, 0], [], []>} : vector<8x8xbf16>, vector<8x8xbf16>, vector<8x8xf32> -> vector<8x8xf32>
    %415 = arith.addf %414, %34 : vector<8x8xf32>
    %cst_118 = arith.constant 0.353553385 : f32
    %416 = vector.broadcast %cst_118 : f32 to vector<8x8xf32>
    %417 = arith.mulf %415, %416 : vector<8x8xf32>
    %cst_119 = arith.constant dense<0xFF800000> : vector<8xf32>
    %418 = vector.multi_reduction <maximumf>, %417, %cst_119 [1] : vector<8x8xf32> to vector<8xf32>
    %419 = vector.shape_cast %418 : vector<8xf32> to vector<8x1xf32>
    %420 = vector.broadcast %419 : vector<8x1xf32> to vector<8x8xf32>
    %421 = arith.subf %417, %420 : vector<8x8xf32>
    %422 = math.exp %421 : vector<8x8xf32>
    %cst_120 = arith.constant dense<0.000000e+00> : vector<8xf32>
    %423 = vector.multi_reduction <add>, %422, %cst_120 [1] : vector<8x8xf32> to vector<8xf32>
    %424 = vector.shape_cast %423 : vector<8xf32> to vector<8x1xf32>
    %425 = tpu.reciprocal %424 {approx = true} : vector<8x1xf32> -> vector<8x1xf32>
    %426 = vector.broadcast %425 : vector<8x1xf32> to vector<8x8xf32>
    %427 = arith.mulf %422, %426 : vector<8x8xf32>
    %428 = arith.truncf %427 : vector<8x8xf32> to vector<8x8xbf16>
    %cst_121 = arith.constant dense<0.000000e+00> : vector<8x8xf32>
    %429 = tpu.matmul %428, %413, %cst_121 {dimension_numbers = #tpu.dot_dimension_numbers<[1], [0], [0], [1], [0, 0, 1, 1], [], []>} : vector<8x8xbf16>, vector<8x8xbf16>, vector<8x8xf32> -> vector<8x8xf32>
    %430 = arith.truncf %429 : vector<8x8xf32> to vector<8x8xbf16>
    %431 = vector.extract_strided_slice %355 {offsets = [8, 0], sizes = [8, 32], strides = [1, 1]} : vector<32x32xbf16> to vector<8x32xbf16>
    %cst_122 = arith.constant dense<0.000000e+00> : vector<8x32xf32>
    %432 = tpu.matmul %430, %431, %cst_122 {dimension_numbers = #tpu.dot_dimension_numbers<[1], [0], [0], [1], [0, 0, 1, 1], [], []>} : vector<8x8xbf16>, vector<8x32xbf16>, vector<8x32xf32> -> vector<8x32xf32>
    %433 = arith.addf %407, %432 : vector<8x32xf32>
    %434 = vector.extract_strided_slice %380 {offsets = [0, 16], sizes = [8, 8], strides = [1, 1]} : vector<16x96xf32> to vector<8x8xf32>
    %435 = arith.truncf %434 : vector<8x8xf32> to vector<8x8xbf16>
    %436 = vector.extract_strided_slice %380 {offsets = [0, 48], sizes = [8, 8], strides = [1, 1]} : vector<16x96xf32> to vector<8x8xf32>
    %437 = arith.truncf %436 : vector<8x8xf32> to vector<8x8xbf16>
    %438 = vector.extract_strided_slice %380 {offsets = [0, 80], sizes = [8, 8], strides = [1, 1]} : vector<16x96xf32> to vector<8x8xf32>
    %439 = arith.truncf %438 : vector<8x8xf32> to vector<8x8xbf16>
    %cst_123 = arith.constant dense<0.000000e+00> : vector<8x8xf32>
    %440 = tpu.matmul %435, %437, %cst_123 {dimension_numbers = #tpu.dot_dimension_numbers<[1], [1], [0], [0], [0, 0, 1, 0], [], []>} : vector<8x8xbf16>, vector<8x8xbf16>, vector<8x8xf32> -> vector<8x8xf32>
    %441 = arith.addf %440, %34 : vector<8x8xf32>
    %cst_124 = arith.constant 0.353553385 : f32
    %442 = vector.broadcast %cst_124 : f32 to vector<8x8xf32>
    %443 = arith.mulf %441, %442 : vector<8x8xf32>
    %cst_125 = arith.constant dense<0xFF800000> : vector<8xf32>
    %444 = vector.multi_reduction <maximumf>, %443, %cst_125 [1] : vector<8x8xf32> to vector<8xf32>
    %445 = vector.shape_cast %444 : vector<8xf32> to vector<8x1xf32>
    %446 = vector.broadcast %445 : vector<8x1xf32> to vector<8x8xf32>
    %447 = arith.subf %443, %446 : vector<8x8xf32>
    %448 = math.exp %447 : vector<8x8xf32>
    %cst_126 = arith.constant dense<0.000000e+00> : vector<8xf32>
    %449 = vector.multi_reduction <add>, %448, %cst_126 [1] : vector<8x8xf32> to vector<8xf32>
    %450 = vector.shape_cast %449 : vector<8xf32> to vector<8x1xf32>
    %451 = tpu.reciprocal %450 {approx = true} : vector<8x1xf32> -> vector<8x1xf32>
    %452 = vector.broadcast %451 : vector<8x1xf32> to vector<8x8xf32>
    %453 = arith.mulf %448, %452 : vector<8x8xf32>
    %454 = arith.truncf %453 : vector<8x8xf32> to vector<8x8xbf16>
    %cst_127 = arith.constant dense<0.000000e+00> : vector<8x8xf32>
    %455 = tpu.matmul %454, %439, %cst_127 {dimension_numbers = #tpu.dot_dimension_numbers<[1], [0], [0], [1], [0, 0, 1, 1], [], []>} : vector<8x8xbf16>, vector<8x8xbf16>, vector<8x8xf32> -> vector<8x8xf32>
    %456 = arith.truncf %455 : vector<8x8xf32> to vector<8x8xbf16>
    %457 = vector.extract_strided_slice %355 {offsets = [16, 0], sizes = [8, 32], strides = [1, 1]} : vector<32x32xbf16> to vector<8x32xbf16>
    %cst_128 = arith.constant dense<0.000000e+00> : vector<8x32xf32>
    %458 = tpu.matmul %456, %457, %cst_128 {dimension_numbers = #tpu.dot_dimension_numbers<[1], [0], [0], [1], [0, 0, 1, 1], [], []>} : vector<8x8xbf16>, vector<8x32xbf16>, vector<8x32xf32> -> vector<8x32xf32>
    %459 = arith.addf %433, %458 : vector<8x32xf32>
    %460 = vector.extract_strided_slice %380 {offsets = [0, 24], sizes = [8, 8], strides = [1, 1]} : vector<16x96xf32> to vector<8x8xf32>
    %461 = arith.truncf %460 : vector<8x8xf32> to vector<8x8xbf16>
    %462 = vector.extract_strided_slice %380 {offsets = [0, 56], sizes = [8, 8], strides = [1, 1]} : vector<16x96xf32> to vector<8x8xf32>
    %463 = arith.truncf %462 : vector<8x8xf32> to vector<8x8xbf16>
    %464 = vector.extract_strided_slice %380 {offsets = [0, 88], sizes = [8, 8], strides = [1, 1]} : vector<16x96xf32> to vector<8x8xf32>
    %465 = arith.truncf %464 : vector<8x8xf32> to vector<8x8xbf16>
    %cst_129 = arith.constant dense<0.000000e+00> : vector<8x8xf32>
    %466 = tpu.matmul %461, %463, %cst_129 {dimension_numbers = #tpu.dot_dimension_numbers<[1], [1], [0], [0], [0, 0, 1, 0], [], []>} : vector<8x8xbf16>, vector<8x8xbf16>, vector<8x8xf32> -> vector<8x8xf32>
    %467 = arith.addf %466, %34 : vector<8x8xf32>
    %cst_130 = arith.constant 0.353553385 : f32
    %468 = vector.broadcast %cst_130 : f32 to vector<8x8xf32>
    %469 = arith.mulf %467, %468 : vector<8x8xf32>
    %cst_131 = arith.constant dense<0xFF800000> : vector<8xf32>
    %470 = vector.multi_reduction <maximumf>, %469, %cst_131 [1] : vector<8x8xf32> to vector<8xf32>
    %471 = vector.shape_cast %470 : vector<8xf32> to vector<8x1xf32>
    %472 = vector.broadcast %471 : vector<8x1xf32> to vector<8x8xf32>
    %473 = arith.subf %469, %472 : vector<8x8xf32>
    %474 = math.exp %473 : vector<8x8xf32>
    %cst_132 = arith.constant dense<0.000000e+00> : vector<8xf32>
    %475 = vector.multi_reduction <add>, %474, %cst_132 [1] : vector<8x8xf32> to vector<8xf32>
    %476 = vector.shape_cast %475 : vector<8xf32> to vector<8x1xf32>
    %477 = tpu.reciprocal %476 {approx = true} : vector<8x1xf32> -> vector<8x1xf32>
    %478 = vector.broadcast %477 : vector<8x1xf32> to vector<8x8xf32>
    %479 = arith.mulf %474, %478 : vector<8x8xf32>
    %480 = arith.truncf %479 : vector<8x8xf32> to vector<8x8xbf16>
    %cst_133 = arith.constant dense<0.000000e+00> : vector<8x8xf32>
    %481 = tpu.matmul %480, %465, %cst_133 {dimension_numbers = #tpu.dot_dimension_numbers<[1], [0], [0], [1], [0, 0, 1, 1], [], []>} : vector<8x8xbf16>, vector<8x8xbf16>, vector<8x8xf32> -> vector<8x8xf32>
    %482 = arith.truncf %481 : vector<8x8xf32> to vector<8x8xbf16>
    %483 = vector.extract_strided_slice %355 {offsets = [24, 0], sizes = [8, 32], strides = [1, 1]} : vector<32x32xbf16> to vector<8x32xbf16>
    %cst_134 = arith.constant dense<0.000000e+00> : vector<8x32xf32>
    %484 = tpu.matmul %482, %483, %cst_134 {dimension_numbers = #tpu.dot_dimension_numbers<[1], [0], [0], [1], [0, 0, 1, 1], [], []>} : vector<8x8xbf16>, vector<8x32xbf16>, vector<8x32xf32> -> vector<8x32xf32>
    %485 = arith.addf %459, %484 : vector<8x32xf32>
    %cst_135 = arith.constant 0.000000e+00 : f32
    %486 = vector.broadcast %cst_135 : f32 to vector<8x32xf32>
    %487 = vector.extract_strided_slice %380 {offsets = [8, 0], sizes = [8, 8], strides = [1, 1]} : vector<16x96xf32> to vector<8x8xf32>
    %488 = arith.truncf %487 : vector<8x8xf32> to vector<8x8xbf16>
    %489 = vector.extract_strided_slice %380 {offsets = [8, 32], sizes = [8, 8], strides = [1, 1]} : vector<16x96xf32> to vector<8x8xf32>
    %490 = arith.truncf %489 : vector<8x8xf32> to vector<8x8xbf16>
    %491 = vector.extract_strided_slice %380 {offsets = [8, 64], sizes = [8, 8], strides = [1, 1]} : vector<16x96xf32> to vector<8x8xf32>
    %492 = arith.truncf %491 : vector<8x8xf32> to vector<8x8xbf16>
    %cst_136 = arith.constant dense<0.000000e+00> : vector<8x8xf32>
    %493 = tpu.matmul %488, %490, %cst_136 {dimension_numbers = #tpu.dot_dimension_numbers<[1], [1], [0], [0], [0, 0, 1, 0], [], []>} : vector<8x8xbf16>, vector<8x8xbf16>, vector<8x8xf32> -> vector<8x8xf32>
    %494 = arith.addf %493, %34 : vector<8x8xf32>
    %cst_137 = arith.constant 0.353553385 : f32
    %495 = vector.broadcast %cst_137 : f32 to vector<8x8xf32>
    %496 = arith.mulf %494, %495 : vector<8x8xf32>
    %cst_138 = arith.constant dense<0xFF800000> : vector<8xf32>
    %497 = vector.multi_reduction <maximumf>, %496, %cst_138 [1] : vector<8x8xf32> to vector<8xf32>
    %498 = vector.shape_cast %497 : vector<8xf32> to vector<8x1xf32>
    %499 = vector.broadcast %498 : vector<8x1xf32> to vector<8x8xf32>
    %500 = arith.subf %496, %499 : vector<8x8xf32>
    %501 = math.exp %500 : vector<8x8xf32>
    %cst_139 = arith.constant dense<0.000000e+00> : vector<8xf32>
    %502 = vector.multi_reduction <add>, %501, %cst_139 [1] : vector<8x8xf32> to vector<8xf32>
    %503 = vector.shape_cast %502 : vector<8xf32> to vector<8x1xf32>
    %504 = tpu.reciprocal %503 {approx = true} : vector<8x1xf32> -> vector<8x1xf32>
    %505 = vector.broadcast %504 : vector<8x1xf32> to vector<8x8xf32>
    %506 = arith.mulf %501, %505 : vector<8x8xf32>
    %507 = arith.truncf %506 : vector<8x8xf32> to vector<8x8xbf16>
    %cst_140 = arith.constant dense<0.000000e+00> : vector<8x8xf32>
    %508 = tpu.matmul %507, %492, %cst_140 {dimension_numbers = #tpu.dot_dimension_numbers<[1], [0], [0], [1], [0, 0, 1, 1], [], []>} : vector<8x8xbf16>, vector<8x8xbf16>, vector<8x8xf32> -> vector<8x8xf32>
    %509 = arith.truncf %508 : vector<8x8xf32> to vector<8x8xbf16>
    %510 = vector.extract_strided_slice %355 {offsets = [0, 0], sizes = [8, 32], strides = [1, 1]} : vector<32x32xbf16> to vector<8x32xbf16>
    %cst_141 = arith.constant dense<0.000000e+00> : vector<8x32xf32>
    %511 = tpu.matmul %509, %510, %cst_141 {dimension_numbers = #tpu.dot_dimension_numbers<[1], [0], [0], [1], [0, 0, 1, 1], [], []>} : vector<8x8xbf16>, vector<8x32xbf16>, vector<8x32xf32> -> vector<8x32xf32>
    %512 = arith.addf %486, %511 : vector<8x32xf32>
    %513 = vector.extract_strided_slice %380 {offsets = [8, 8], sizes = [8, 8], strides = [1, 1]} : vector<16x96xf32> to vector<8x8xf32>
    %514 = arith.truncf %513 : vector<8x8xf32> to vector<8x8xbf16>
    %515 = vector.extract_strided_slice %380 {offsets = [8, 40], sizes = [8, 8], strides = [1, 1]} : vector<16x96xf32> to vector<8x8xf32>
    %516 = arith.truncf %515 : vector<8x8xf32> to vector<8x8xbf16>
    %517 = vector.extract_strided_slice %380 {offsets = [8, 72], sizes = [8, 8], strides = [1, 1]} : vector<16x96xf32> to vector<8x8xf32>
    %518 = arith.truncf %517 : vector<8x8xf32> to vector<8x8xbf16>
    %cst_142 = arith.constant dense<0.000000e+00> : vector<8x8xf32>
    %519 = tpu.matmul %514, %516, %cst_142 {dimension_numbers = #tpu.dot_dimension_numbers<[1], [1], [0], [0], [0, 0, 1, 0], [], []>} : vector<8x8xbf16>, vector<8x8xbf16>, vector<8x8xf32> -> vector<8x8xf32>
    %520 = arith.addf %519, %34 : vector<8x8xf32>
    %cst_143 = arith.constant 0.353553385 : f32
    %521 = vector.broadcast %cst_143 : f32 to vector<8x8xf32>
    %522 = arith.mulf %520, %521 : vector<8x8xf32>
    %cst_144 = arith.constant dense<0xFF800000> : vector<8xf32>
    %523 = vector.multi_reduction <maximumf>, %522, %cst_144 [1] : vector<8x8xf32> to vector<8xf32>
    %524 = vector.shape_cast %523 : vector<8xf32> to vector<8x1xf32>
    %525 = vector.broadcast %524 : vector<8x1xf32> to vector<8x8xf32>
    %526 = arith.subf %522, %525 : vector<8x8xf32>
    %527 = math.exp %526 : vector<8x8xf32>
    %cst_145 = arith.constant dense<0.000000e+00> : vector<8xf32>
    %528 = vector.multi_reduction <add>, %527, %cst_145 [1] : vector<8x8xf32> to vector<8xf32>
    %529 = vector.shape_cast %528 : vector<8xf32> to vector<8x1xf32>
    %530 = tpu.reciprocal %529 {approx = true} : vector<8x1xf32> -> vector<8x1xf32>
    %531 = vector.broadcast %530 : vector<8x1xf32> to vector<8x8xf32>
    %532 = arith.mulf %527, %531 : vector<8x8xf32>
    %533 = arith.truncf %532 : vector<8x8xf32> to vector<8x8xbf16>
    %cst_146 = arith.constant dense<0.000000e+00> : vector<8x8xf32>
    %534 = tpu.matmul %533, %518, %cst_146 {dimension_numbers = #tpu.dot_dimension_numbers<[1], [0], [0], [1], [0, 0, 1, 1], [], []>} : vector<8x8xbf16>, vector<8x8xbf16>, vector<8x8xf32> -> vector<8x8xf32>
    %535 = arith.truncf %534 : vector<8x8xf32> to vector<8x8xbf16>
    %536 = vector.extract_strided_slice %355 {offsets = [8, 0], sizes = [8, 32], strides = [1, 1]} : vector<32x32xbf16> to vector<8x32xbf16>
    %cst_147 = arith.constant dense<0.000000e+00> : vector<8x32xf32>
    %537 = tpu.matmul %535, %536, %cst_147 {dimension_numbers = #tpu.dot_dimension_numbers<[1], [0], [0], [1], [0, 0, 1, 1], [], []>} : vector<8x8xbf16>, vector<8x32xbf16>, vector<8x32xf32> -> vector<8x32xf32>
    %538 = arith.addf %512, %537 : vector<8x32xf32>
    %539 = vector.extract_strided_slice %380 {offsets = [8, 16], sizes = [8, 8], strides = [1, 1]} : vector<16x96xf32> to vector<8x8xf32>
    %540 = arith.truncf %539 : vector<8x8xf32> to vector<8x8xbf16>
    %541 = vector.extract_strided_slice %380 {offsets = [8, 48], sizes = [8, 8], strides = [1, 1]} : vector<16x96xf32> to vector<8x8xf32>
    %542 = arith.truncf %541 : vector<8x8xf32> to vector<8x8xbf16>
    %543 = vector.extract_strided_slice %380 {offsets = [8, 80], sizes = [8, 8], strides = [1, 1]} : vector<16x96xf32> to vector<8x8xf32>
    %544 = arith.truncf %543 : vector<8x8xf32> to vector<8x8xbf16>
    %cst_148 = arith.constant dense<0.000000e+00> : vector<8x8xf32>
    %545 = tpu.matmul %540, %542, %cst_148 {dimension_numbers = #tpu.dot_dimension_numbers<[1], [1], [0], [0], [0, 0, 1, 0], [], []>} : vector<8x8xbf16>, vector<8x8xbf16>, vector<8x8xf32> -> vector<8x8xf32>
    %546 = arith.addf %545, %34 : vector<8x8xf32>
    %cst_149 = arith.constant 0.353553385 : f32
    %547 = vector.broadcast %cst_149 : f32 to vector<8x8xf32>
    %548 = arith.mulf %546, %547 : vector<8x8xf32>
    %cst_150 = arith.constant dense<0xFF800000> : vector<8xf32>
    %549 = vector.multi_reduction <maximumf>, %548, %cst_150 [1] : vector<8x8xf32> to vector<8xf32>
    %550 = vector.shape_cast %549 : vector<8xf32> to vector<8x1xf32>
    %551 = vector.broadcast %550 : vector<8x1xf32> to vector<8x8xf32>
    %552 = arith.subf %548, %551 : vector<8x8xf32>
    %553 = math.exp %552 : vector<8x8xf32>
    %cst_151 = arith.constant dense<0.000000e+00> : vector<8xf32>
    %554 = vector.multi_reduction <add>, %553, %cst_151 [1] : vector<8x8xf32> to vector<8xf32>
    %555 = vector.shape_cast %554 : vector<8xf32> to vector<8x1xf32>
    %556 = tpu.reciprocal %555 {approx = true} : vector<8x1xf32> -> vector<8x1xf32>
    %557 = vector.broadcast %556 : vector<8x1xf32> to vector<8x8xf32>
    %558 = arith.mulf %553, %557 : vector<8x8xf32>
    %559 = arith.truncf %558 : vector<8x8xf32> to vector<8x8xbf16>
    %cst_152 = arith.constant dense<0.000000e+00> : vector<8x8xf32>
    %560 = tpu.matmul %559, %544, %cst_152 {dimension_numbers = #tpu.dot_dimension_numbers<[1], [0], [0], [1], [0, 0, 1, 1], [], []>} : vector<8x8xbf16>, vector<8x8xbf16>, vector<8x8xf32> -> vector<8x8xf32>
    %561 = arith.truncf %560 : vector<8x8xf32> to vector<8x8xbf16>
    %562 = vector.extract_strided_slice %355 {offsets = [16, 0], sizes = [8, 32], strides = [1, 1]} : vector<32x32xbf16> to vector<8x32xbf16>
    %cst_153 = arith.constant dense<0.000000e+00> : vector<8x32xf32>
    %563 = tpu.matmul %561, %562, %cst_153 {dimension_numbers = #tpu.dot_dimension_numbers<[1], [0], [0], [1], [0, 0, 1, 1], [], []>} : vector<8x8xbf16>, vector<8x32xbf16>, vector<8x32xf32> -> vector<8x32xf32>
    %564 = arith.addf %538, %563 : vector<8x32xf32>
    %565 = vector.extract_strided_slice %380 {offsets = [8, 24], sizes = [8, 8], strides = [1, 1]} : vector<16x96xf32> to vector<8x8xf32>
    %566 = arith.truncf %565 : vector<8x8xf32> to vector<8x8xbf16>
    %567 = vector.extract_strided_slice %380 {offsets = [8, 56], sizes = [8, 8], strides = [1, 1]} : vector<16x96xf32> to vector<8x8xf32>
    %568 = arith.truncf %567 : vector<8x8xf32> to vector<8x8xbf16>
    %569 = vector.extract_strided_slice %380 {offsets = [8, 88], sizes = [8, 8], strides = [1, 1]} : vector<16x96xf32> to vector<8x8xf32>
    %570 = arith.truncf %569 : vector<8x8xf32> to vector<8x8xbf16>
    %cst_154 = arith.constant dense<0.000000e+00> : vector<8x8xf32>
    %571 = tpu.matmul %566, %568, %cst_154 {dimension_numbers = #tpu.dot_dimension_numbers<[1], [1], [0], [0], [0, 0, 1, 0], [], []>} : vector<8x8xbf16>, vector<8x8xbf16>, vector<8x8xf32> -> vector<8x8xf32>
    %572 = arith.addf %571, %34 : vector<8x8xf32>
    %cst_155 = arith.constant 0.353553385 : f32
    %573 = vector.broadcast %cst_155 : f32 to vector<8x8xf32>
    %574 = arith.mulf %572, %573 : vector<8x8xf32>
    %cst_156 = arith.constant dense<0xFF800000> : vector<8xf32>
    %575 = vector.multi_reduction <maximumf>, %574, %cst_156 [1] : vector<8x8xf32> to vector<8xf32>
    %576 = vector.shape_cast %575 : vector<8xf32> to vector<8x1xf32>
    %577 = vector.broadcast %576 : vector<8x1xf32> to vector<8x8xf32>
    %578 = arith.subf %574, %577 : vector<8x8xf32>
    %579 = math.exp %578 : vector<8x8xf32>
    %cst_157 = arith.constant dense<0.000000e+00> : vector<8xf32>
    %580 = vector.multi_reduction <add>, %579, %cst_157 [1] : vector<8x8xf32> to vector<8xf32>
    %581 = vector.shape_cast %580 : vector<8xf32> to vector<8x1xf32>
    %582 = tpu.reciprocal %581 {approx = true} : vector<8x1xf32> -> vector<8x1xf32>
    %583 = vector.broadcast %582 : vector<8x1xf32> to vector<8x8xf32>
    %584 = arith.mulf %579, %583 : vector<8x8xf32>
    %585 = arith.truncf %584 : vector<8x8xf32> to vector<8x8xbf16>
    %cst_158 = arith.constant dense<0.000000e+00> : vector<8x8xf32>
    %586 = tpu.matmul %585, %570, %cst_158 {dimension_numbers = #tpu.dot_dimension_numbers<[1], [0], [0], [1], [0, 0, 1, 1], [], []>} : vector<8x8xbf16>, vector<8x8xbf16>, vector<8x8xf32> -> vector<8x8xf32>
    %587 = arith.truncf %586 : vector<8x8xf32> to vector<8x8xbf16>
    %588 = vector.extract_strided_slice %355 {offsets = [24, 0], sizes = [8, 32], strides = [1, 1]} : vector<32x32xbf16> to vector<8x32xbf16>
    %cst_159 = arith.constant dense<0.000000e+00> : vector<8x32xf32>
    %589 = tpu.matmul %587, %588, %cst_159 {dimension_numbers = #tpu.dot_dimension_numbers<[1], [0], [0], [1], [0, 0, 1, 1], [], []>} : vector<8x8xbf16>, vector<8x32xbf16>, vector<8x32xf32> -> vector<8x32xf32>
    %590 = arith.addf %564, %589 : vector<8x32xf32>
    %591 = tpu.concatenate %485, %590 in 0 : vector<8x32xf32>, vector<8x32xf32> -> vector<16x32xf32>
    %c9 = arith.constant 9 : index
    %c0_160 = arith.constant 0 : index
    %592 = vector.load %arg6[%c9, %c0_160] : memref<17x128xf32, #tpu.memory_space<vmem>>, vector<1x32xf32>
    %593 = vector.broadcast %592 : vector<1x32xf32> to vector<16x32xf32>
    %594 = arith.addf %591, %593 : vector<16x32xf32>
    %595 = arith.addf %352, %594 : vector<16x32xf32>
    %c10 = arith.constant 10 : index
    %c0_161 = arith.constant 0 : index
    %596 = vector.load %arg6[%c10, %c0_161] : memref<17x128xf32, #tpu.memory_space<vmem>>, vector<1x32xf32>
    %c11 = arith.constant 11 : index
    %c0_162 = arith.constant 0 : index
    %597 = vector.load %arg6[%c11, %c0_162] : memref<17x128xf32, #tpu.memory_space<vmem>>, vector<1x32xf32>
    %cst_163 = arith.constant dense<0.000000e+00> : vector<16xf32>
    %598 = vector.multi_reduction <add>, %595, %cst_163 [1] : vector<16x32xf32> to vector<16xf32>
    %599 = vector.shape_cast %598 : vector<16xf32> to vector<16x1xf32>
    %cst_164 = arith.constant 3.200000e+01 : f32
    %600 = vector.broadcast %cst_164 : f32 to vector<16x1xf32>
    %601 = arith.divf %599, %600 : vector<16x1xf32>
    %602 = vector.broadcast %601 : vector<16x1xf32> to vector<16x32xf32>
    %603 = arith.subf %595, %602 : vector<16x32xf32>
    %604 = arith.mulf %603, %603 : vector<16x32xf32>
    %cst_165 = arith.constant dense<0.000000e+00> : vector<16xf32>
    %605 = vector.multi_reduction <add>, %604, %cst_165 [1] : vector<16x32xf32> to vector<16xf32>
    %606 = vector.shape_cast %605 : vector<16xf32> to vector<16x1xf32>
    %cst_166 = arith.constant 3.200000e+01 : f32
    %607 = vector.broadcast %cst_166 : f32 to vector<16x1xf32>
    %608 = arith.divf %606, %607 : vector<16x1xf32>
    %cst_167 = arith.constant 9.99999974E-6 : f32
    %609 = vector.broadcast %cst_167 : f32 to vector<16x1xf32>
    %610 = arith.addf %608, %609 : vector<16x1xf32>
    %611 = math.rsqrt %610 : vector<16x1xf32>
    %612 = vector.broadcast %611 : vector<16x1xf32> to vector<16x32xf32>
    %613 = arith.mulf %603, %612 : vector<16x32xf32>
    %614 = vector.broadcast %596 : vector<1x32xf32> to vector<16x32xf32>
    %615 = arith.mulf %614, %613 : vector<16x32xf32>
    %616 = vector.broadcast %597 : vector<1x32xf32> to vector<16x32xf32>
    %617 = arith.addf %615, %616 : vector<16x32xf32>
    %618 = arith.truncf %617 : vector<16x32xf32> to vector<16x32xbf16>
    %619 = vector.extract_strided_slice %354 {offsets = [0, 128], sizes = [32, 128], strides = [1, 1]} : vector<32x256xbf16> to vector<32x128xbf16>
    %cst_168 = arith.constant dense<0.000000e+00> : vector<16x128xf32>
    %620 = tpu.matmul %618, %619, %cst_168 {dimension_numbers = #tpu.dot_dimension_numbers<[1], [0], [0], [1], [0, 0, 1, 1], [], []>} : vector<16x32xbf16>, vector<32x128xbf16>, vector<16x128xf32> -> vector<16x128xf32>
    %c12 = arith.constant 12 : index
    %c0_169 = arith.constant 0 : index
    %621 = vector.load %arg6[%c12, %c0_169] : memref<17x128xf32, #tpu.memory_space<vmem>>, vector<1x128xf32>
    %622 = vector.broadcast %621 : vector<1x128xf32> to vector<16x128xf32>
    %623 = arith.addf %620, %622 : vector<16x128xf32>
    %cst_170 = arith.constant 5.000000e-01 : f32
    %624 = vector.broadcast %cst_170 : f32 to vector<16x128xf32>
    %625 = arith.mulf %624, %623 : vector<16x128xf32>
    %cst_171 = arith.constant 0.707106769 : f32
    %626 = vector.broadcast %cst_171 : f32 to vector<16x128xf32>
    %627 = arith.mulf %623, %626 : vector<16x128xf32>
    %628 = math.absf %627 : vector<16x128xf32>
    %cst_172 = arith.constant 0.327591091 : f32
    %629 = vector.broadcast %cst_172 : f32 to vector<16x128xf32>
    %630 = arith.mulf %629, %628 : vector<16x128xf32>
    %cst_173 = arith.constant 1.000000e+00 : f32
    %631 = vector.broadcast %cst_173 : f32 to vector<16x128xf32>
    %632 = arith.addf %631, %630 : vector<16x128xf32>
    %633 = tpu.reciprocal %632 {approx = true} : vector<16x128xf32> -> vector<16x128xf32>
    %cst_174 = arith.constant 1.06140542 : f32
    %634 = vector.broadcast %cst_174 : f32 to vector<16x128xf32>
    %635 = arith.mulf %634, %633 : vector<16x128xf32>
    %cst_175 = arith.constant -1.45315206 : f32
    %636 = vector.broadcast %cst_175 : f32 to vector<16x128xf32>
    %637 = arith.addf %635, %636 : vector<16x128xf32>
    %638 = arith.mulf %637, %633 : vector<16x128xf32>
    %cst_176 = arith.constant 1.42141378 : f32
    %639 = vector.broadcast %cst_176 : f32 to vector<16x128xf32>
    %640 = arith.addf %638, %639 : vector<16x128xf32>
    %641 = arith.mulf %640, %633 : vector<16x128xf32>
    %cst_177 = arith.constant -0.284496725 : f32
    %642 = vector.broadcast %cst_177 : f32 to vector<16x128xf32>
    %643 = arith.addf %641, %642 : vector<16x128xf32>
    %644 = arith.mulf %643, %633 : vector<16x128xf32>
    %cst_178 = arith.constant 0.254829586 : f32
    %645 = vector.broadcast %cst_178 : f32 to vector<16x128xf32>
    %646 = arith.addf %644, %645 : vector<16x128xf32>
    %647 = arith.mulf %646, %633 : vector<16x128xf32>
    %cst_179 = arith.constant 0.000000e+00 : f32
    %648 = vector.broadcast %cst_179 : f32 to vector<16x128xf32>
    %649 = arith.subf %648, %628 : vector<16x128xf32>
    %650 = arith.mulf %649, %628 : vector<16x128xf32>
    %651 = math.exp %650 : vector<16x128xf32>
    %652 = arith.mulf %647, %651 : vector<16x128xf32>
    %cst_180 = arith.constant 1.000000e+00 : f32
    %653 = vector.broadcast %cst_180 : f32 to vector<16x128xf32>
    %654 = arith.subf %653, %652 : vector<16x128xf32>
    %cst_181 = arith.constant 0.000000e+00 : f32
    %655 = vector.broadcast %cst_181 : f32 to vector<16x128xf32>
    %656 = arith.cmpf olt, %627, %655 : vector<16x128xf32>
    %cst_182 = arith.constant 0.000000e+00 : f32
    %657 = vector.broadcast %cst_182 : f32 to vector<16x128xf32>
    %658 = arith.subf %657, %654 : vector<16x128xf32>
    %659 = arith.select %656, %658, %654 : vector<16x128xi1>, vector<16x128xf32>
    %cst_183 = arith.constant 1.000000e+00 : f32
    %660 = vector.broadcast %cst_183 : f32 to vector<16x128xf32>
    %661 = arith.addf %660, %659 : vector<16x128xf32>
    %662 = arith.mulf %625, %661 : vector<16x128xf32>
    %663 = arith.truncf %662 : vector<16x128xf32> to vector<16x128xbf16>
    %c1_184 = arith.constant 1 : index
    %c0_185 = arith.constant 0 : index
    %c0_186 = arith.constant 0 : index
    %664 = vector.load %arg4[%c1_184, %c0_185, %c0_186] : memref<2x128x32xbf16, #tpu.memory_space<vmem>>, vector<1x128x32xbf16>
    %665 = vector.shape_cast %664 : vector<1x128x32xbf16> to vector<128x32xbf16>
    %cst_187 = arith.constant dense<0.000000e+00> : vector<16x32xf32>
    %666 = tpu.matmul %663, %665, %cst_187 {dimension_numbers = #tpu.dot_dimension_numbers<[1], [0], [0], [1], [0, 0, 1, 1], [], []>} : vector<16x128xbf16>, vector<128x32xbf16>, vector<16x32xf32> -> vector<16x32xf32>
    %c13 = arith.constant 13 : index
    %c0_188 = arith.constant 0 : index
    %667 = vector.load %arg6[%c13, %c0_188] : memref<17x128xf32, #tpu.memory_space<vmem>>, vector<1x32xf32>
    %668 = vector.broadcast %667 : vector<1x32xf32> to vector<16x32xf32>
    %669 = arith.addf %666, %668 : vector<16x32xf32>
    %670 = arith.addf %595, %669 : vector<16x32xf32>
    %c14 = arith.constant 14 : index
    %c0_189 = arith.constant 0 : index
    %671 = vector.load %arg6[%c14, %c0_189] : memref<17x128xf32, #tpu.memory_space<vmem>>, vector<1x32xf32>
    %c15 = arith.constant 15 : index
    %c0_190 = arith.constant 0 : index
    %672 = vector.load %arg6[%c15, %c0_190] : memref<17x128xf32, #tpu.memory_space<vmem>>, vector<1x32xf32>
    %cst_191 = arith.constant dense<0.000000e+00> : vector<16xf32>
    %673 = vector.multi_reduction <add>, %670, %cst_191 [1] : vector<16x32xf32> to vector<16xf32>
    %674 = vector.shape_cast %673 : vector<16xf32> to vector<16x1xf32>
    %cst_192 = arith.constant 3.200000e+01 : f32
    %675 = vector.broadcast %cst_192 : f32 to vector<16x1xf32>
    %676 = arith.divf %674, %675 : vector<16x1xf32>
    %677 = vector.broadcast %676 : vector<16x1xf32> to vector<16x32xf32>
    %678 = arith.subf %670, %677 : vector<16x32xf32>
    %679 = arith.mulf %678, %678 : vector<16x32xf32>
    %cst_193 = arith.constant dense<0.000000e+00> : vector<16xf32>
    %680 = vector.multi_reduction <add>, %679, %cst_193 [1] : vector<16x32xf32> to vector<16xf32>
    %681 = vector.shape_cast %680 : vector<16xf32> to vector<16x1xf32>
    %cst_194 = arith.constant 3.200000e+01 : f32
    %682 = vector.broadcast %cst_194 : f32 to vector<16x1xf32>
    %683 = arith.divf %681, %682 : vector<16x1xf32>
    %cst_195 = arith.constant 9.99999974E-6 : f32
    %684 = vector.broadcast %cst_195 : f32 to vector<16x1xf32>
    %685 = arith.addf %683, %684 : vector<16x1xf32>
    %686 = math.rsqrt %685 : vector<16x1xf32>
    %687 = vector.broadcast %686 : vector<16x1xf32> to vector<16x32xf32>
    %688 = arith.mulf %678, %687 : vector<16x32xf32>
    %689 = vector.broadcast %671 : vector<1x32xf32> to vector<16x32xf32>
    %690 = arith.mulf %689, %688 : vector<16x32xf32>
    %691 = vector.broadcast %672 : vector<1x32xf32> to vector<16x32xf32>
    %692 = arith.addf %690, %691 : vector<16x32xf32>
    %693 = arith.truncf %692 : vector<16x32xf32> to vector<16x32xbf16>
    %c0_196 = arith.constant 0 : index
    %c0_197 = arith.constant 0 : index
    %694 = vector.load %arg5[%c0_196, %c0_197] : memref<32x128xbf16, #tpu.memory_space<vmem>>, vector<32x128xbf16>
    %cst_198 = arith.constant dense<0.000000e+00> : vector<16x128xf32>
    %695 = tpu.matmul %693, %694, %cst_198 {dimension_numbers = #tpu.dot_dimension_numbers<[1], [0], [0], [1], [0, 0, 1, 1], [], []>} : vector<16x32xbf16>, vector<32x128xbf16>, vector<16x128xf32> -> vector<16x128xf32>
    %c16 = arith.constant 16 : index
    %c0_199 = arith.constant 0 : index
    %696 = vector.load %arg6[%c16, %c0_199] : memref<17x128xf32, #tpu.memory_space<vmem>>, vector<1x128xf32>
    %697 = vector.broadcast %696 : vector<1x128xf32> to vector<16x128xf32>
    %698 = arith.addf %695, %697 : vector<16x128xf32>
    %c0_200 = arith.constant 0 : index
    %c0_201 = arith.constant 0 : index
    %699 = vector.load %arg7[%c0_200, %c0_201] : memref<16x128xf32, #tpu.memory_space<vmem>>, vector<16x128xf32>
    tpu.vector_store %arg7[%c0_200, %c0_201], %698 {strides = array<i32>} : memref<16x128xf32, #tpu.memory_space<vmem>>, vector<16x128xf32>,
    return
  }
  func.func @transform_0(%arg0: i32) -> (i32, i32) {
    %c0_i32 = arith.constant 0 : i32
    %c0_i32_0 = arith.constant 0 : i32
    %c0_i32_1 = arith.constant 0 : i32
    return %c0_i32, %c0_i32_0 : i32, i32
  }
  func.func @transform_1(%arg0: i32) -> (i32, i32) {
    %c0_i32 = arith.constant 0 : i32
    %c0_i32_0 = arith.constant 0 : i32
    %c0_i32_1 = arith.constant 0 : i32
    return %c0_i32, %c0_i32_0 : i32, i32
  }
  func.func @transform_2(%arg0: i32) -> (i32, i32, i32) {
    %c0_i32 = arith.constant 0 : i32
    %c0_i32_0 = arith.constant 0 : i32
    %c0_i32_1 = arith.constant 0 : i32
    %c0_i32_2 = arith.constant 0 : i32
    return %c0_i32, %c0_i32_0, %c0_i32_1 : i32, i32, i32
  }
  func.func @transform_3(%arg0: i32) -> (i32, i32, i32) {
    %c0_i32 = arith.constant 0 : i32
    %c0_i32_0 = arith.constant 0 : i32
    %c0_i32_1 = arith.constant 0 : i32
    %c0_i32_2 = arith.constant 0 : i32
    return %c0_i32, %c0_i32_0, %c0_i32_1 : i32, i32, i32
  }
  func.func @transform_4(%arg0: i32) -> (i32, i32) {
    %c0_i32 = arith.constant 0 : i32
    %c0_i32_0 = arith.constant 0 : i32
    %c0_i32_1 = arith.constant 0 : i32
    return %c0_i32, %c0_i32_0 : i32, i32
  }
  func.func @transform_5(%arg0: i32) -> (i32, i32) {
    %c0_i32 = arith.constant 0 : i32
    %c0_i32_0 = arith.constant 0 : i32
    %c0_i32_1 = arith.constant 0 : i32
    return %c0_i32, %c0_i32_0 : i32, i32
  }
  func.func @transform_6(%arg0: i32) -> (i32, i32) {
    %c0_i32 = arith.constant 0 : i32
    %c0_i32_0 = arith.constant 0 : i32
    %c0_i32_1 = arith.constant 0 : i32
    return %c0_i32, %c0_i32_0 : i32, i32
  }
}

</mosaic_0001>

<bundles_post_ra>
// kernel: minigpt_forward.1
= control target key start
LH: loop header
LB: loop body
LE: loop exit
PB: predicated region body
PF: predicated region fallthrough
CT: control target
= control target key end

     0   :  { %v4397_v0 = vmov 0   ;;  %v4398_v11 = vmov 0.0   ;;  %v26_v19 = vlaneseq  ;;  %vm83_vm2 = vcmask 654336   ;;  %s4400_s7 = smov 64   ;;  %s4401_s8 = smov 96   ;;  %s5246_s0 = inlined_call_operand.vmem [shape: s32[16,1], index: 0, kind: input, shape index: {}]   ;;  %s5247_s1 = inlined_call_operand.vmem [shape: f32[80,32], index: 1, kind: input, shape index: {}]   ;;  %s5248_s2 = inlined_call_operand.vmem [shape: bf16[2,32,256], index: 2, kind: input, shape index: {}]   ;;  %s5249_s5 = inlined_call_operand.vmem [shape: f32[17,128], index: 5, kind: input, shape index: {}]   ;;  %s5250_s3 = inlined_call_operand.vmem [shape: bf16[2,128,32], index: 3, kind: input, shape index: {}]   ;;  %s5251_s4 = inlined_call_operand.vmem [shape: bf16[32,128], index: 4, kind: input, shape index: {}]   ;;  %s5252_s6 = inlined_call_operand.vmem [shape: f32[16,128], index: 6, kind: output, shape index: {}]  }
   0x1   :  { %4262 = vset.pattern.permute.xlu0 %v4397_v0  ;;  %v24_v1 = vld [vmem:[%s5246_s0] sm:$0xff]  ;;  %v74_v3 = vld [vmem:[%s5247_s1 + $0x8] sm:$0xff]  ;;  %v75_v4 = vld [vmem:[%s5247_s1 + $0x10] sm:$0xff]  ;;  %3859 = vmatprep.subr.bf16.mxu1 %v4398_v11  ;;  %vm173_vm7 = vcmask 261120   ;;  %vm4399_vm8 = vmmov 0   ;;  %vm274_vm9 = vcmask 64512  }
   0x2   :  { %v73_v2 = vld [vmem:[%s5247_s1] sm:$0xff]  ;;  %32 = vperm.xlu0 %4262, %v24_v1   ;;  %v76_v5 = vld [vmem:[%s5247_s1 + $0x18] sm:$0xff]  ;;  %v25_v6 = vld [vmem:[%s5246_s0 + $0x8] sm:$0xff]  ;;  %v4485_v20 = vshrl.u32 %v26_v19, 7  ;;  %v4489_v23 = vand.u32 127, %v26_v19  ;;  %3863 = vmatprep.mubr.msk.bf16.mxu1 %vm4399_vm8, %v4398_v11  ;;  %vm339_vm10 = vcmask 1043456  }
   0x3   :  { %v4227_v7 = vpack.c.bf16 %v74_v3, %v73_v2  ;;  %v4231_v8 = vpack.c.bf16 %v76_v5, %v75_v4  ;;  %v77_v9 = vld [vmem:[%s5247_s1 + $0x20] sm:$0xff]  ;;  %v78_v10 = vld [vmem:[%s5247_s1 + $0x28] sm:$0xff]  ;;  %v79_v13 = vld [vmem:[%s5247_s1 + $0x30] sm:$0xff]  ;;  %s4402_s9 = smov 120   ;;  %s4403_s10 = smov 88  }
   0x4   :  { %v4235_v12 = vpack.c.bf16 %v78_v10, %v77_v9  ;;  %v80_v14 = vld [vmem:[%s5247_s1 + $0x38] sm:$0xff]  ;;  %v81_v16 = vld [vmem:[%s5247_s1 + $0x40] sm:$0xff]  ;;  %v82_v17 = vld [vmem:[%s5247_s1 + $0x48] sm:$0xff]  ;;  %v43_v21 = vand.u32 7, %v4485_v20  ;;  %v30_v22 = vadd.s32 8, %v4485_v20  ;;  %vm165_vm11 = vcmp.ge.s32.totalorder %v4489_v23, %v4485_v20  ;;  %s4404_s11 = smov 56  }
   0x5   :  { %4228 = vmatprep.subr.bf16.mxu0 %v4227_v7  ;;  %v4239_v15 = vpack.c.bf16 %v80_v14, %v79_v13  ;;  %v4243_v18 = vpack.c.bf16 %v82_v17, %v81_v16  ;;  %v4512_v45 = vld [vmem:[%s5248_s2] sm:$0xff]  ;;  %v4517_v46 = vld [vmem:[%s5248_s2 + $0x8] sm:$0xff]  ;;  %v4522_v47 = vld [vmem:[%s5248_s2 + $0x10] sm:$0xff]  ;;  %v4567_v14 = vsel %vm165_vm11, -1e+10, %v4398_v11  ;;  %s4405_s12 = smov 80  }
   0x6   :  { %35 = vperm.xlu0 %4262, %v25_v6   ;;  %4230 = vmatpush3.bf16.msra.mxu0 %v4227_v7  ;;  %v63_v24 = vadd.s32 64, %v43_v21  ;;  %v50_v25 = vand.u32 7, %v30_v22  ;;  %v3573_v48 = vcombine.low %v4512_v45, %v4517_v46  ;;  %v4533_v49 = vld [vmem:[%s5248_s2 + $0x18] sm:$0xff]  ;;  %v3571_v59 = vld [vmem:[%s5249_s5] ss:$0 sm:$0xff]  ;;  %s4406_s13 = smov 112  }
   0x7   :  { %4232 = vmatprep.subr.bf16.mxu0 %v4231_v8  ;;  %v3574_v50 = vcombine.low %v4522_v47, %v4533_v49  ;;  %v3572_v63 = vld [vmem:[%s5249_s5 + $0x1] ss:$0 sm:$0xff]  ;;  %s4407_s0 = smov 32   ;;  %s4408_s14 = smov 72  }
   0x8   :  { %vm65_vm0 = vcmp.eq.s32.totalorder %v4489_v23, %v63_v24  ;;  %v64_v26 = vadd.s32 64, %v50_v25  ;;  %3860 = vmatpush3.bf16.msra.mxu1 %v3573_v48  ;;  %s4409_s15 = smov 104   ;;  %s4410_s16 = smov 48  }
   0x9   :  { %3861 = vmatprep.subr.bf16.mxu1 %v4398_v11  ;;  %s4411_s17 = smov 40  }
   0xa   :  { %4234 = vmatpush3.bf16.msra.mxu0 %v4231_v8  ;;  %vm66_vm4 = vcmp.eq.s32.totalorder %v4489_v23, %v64_v26 }
   0xb   :  { %4236 = vmatprep.subr.bf16.mxu0 %v4235_v12 }
   0xc   :  { %3862 = vmatpush3.bf16.msra.mxu1 %v3574_v50 }
   0xd   :  { %3867 = vmatprep.subr.bf16.mxu1 %v4398_v11 }
   0xe   :  { %4238 = vmatpush3.bf16.msra.mxu0 %v4235_v12 }
   0xf   :  { %4240 = vmatprep.subr.bf16.mxu0 %v4239_v15 }
  0x12   :  { %4242 = vmatpush3.bf16.msra.mxu0 %v4239_v15 }
  0x13   :  { %4244 = vmatprep.subr.bf16.mxu0 %v4243_v18 }
  0x16   :  { %4246 = vmatpush3.bf16.msra.mxu0 %v4243_v18 }
  0x17   :  { %3885 = vmatprep.subr.bf16.mxu0 %v4398_v11 }
  0x81   :  { %v33_v27 = vpop.permute.xlu0 %32 }
  0x82   :  { %vm37_vm1 = vcmp.eq.s32.totalorder %v4489_v23, %v33_v27 }
  0x83   :  { %vm67_vm3 = vmor %vm37_vm1, %vm65_vm0 }
  0x84   :  { %v3567_v28 = vsel %vm67_vm3, 1.0, %v4398_v11 }
  0x85   :  { %3856 = vmatprep.mubr.msk.f32.mxu0 %vm83_vm2, %v3567_v28  ;;  %v36_v29 = vpop.permute.xlu0 %35 }
  0x86   :  { %vm38_vm5 = vcmp.eq.s32.totalorder %v4489_v23, %v36_v29 }
  0x87   :  { %vm68_vm6 = vmor %vm38_vm5, %vm66_vm4 }
  0x88   :  { %v3568_v30 = vsel %vm68_vm6, 1.0, %v4398_v11 }
  0x89   :  { %3857 = vmatmul.mubr.msk.f32.vlgmr.msra.gmra.mrb[0].mxu0 %vm83_vm2, %v3568_v30 }
  0x8a   :  { %3887 = vmatprep.mubr.msk.bf16.mxu0 %vm4399_vm8, %v4398_v11 }
 0x15c   :  { %v4497_v31 = vpop.f32.mrb[0].mxu0 }
 0x15d   :  { %v4499_v32 = vpop.f32.mrb[1].mxu0  ;;  %v177_v34 = vsel %vm173_vm7, %v4497_v31, 0.0 }
 0x15e   :  { %v174_v33 = vsel %vm173_vm7, %v4499_v32, 0.0 }
 0x15f   :  { %175 = vadd.xlane.f32.xlu1 %v174_v33 }
 0x163   :  { %178 = vadd.xlane.f32.xlu1 %v177_v34 }
 0x1ec   :  { %v176_v35 = vpop.xlane.xlu1 %175 }
 0x1ed   :  { %v181_v36 = vmul.f32 0.03125, %v176_v35 }
 0x1ef   :  { %v183_v37 = vsub.f32 %v4499_v32, %v181_v36 }
 0x1f0   :  { %v179_v38 = vpop.xlane.xlu1 %178 }
 0x1f1   :  { %v182_v39 = vmul.f32 0.03125, %v179_v38  ;;  %v185_v40 = vmul.f32 %v183_v37, %v183_v37 }
 0x1f3   :  { %v184_v41 = vsub.f32 %v4497_v31, %v182_v39  ;;  %v187_v42 = vsel %vm173_vm7, %v185_v40, 0.0 }
 0x1f4   :  { %188 = vadd.xlane.f32.xlu0 %v187_v42 }
 0x1f5   :  { %v186_v43 = vmul.f32 %v184_v41, %v184_v41 }
 0x1f7   :  { %v190_v44 = vsel %vm173_vm7, %v186_v43, 0.0 }
 0x1f8   :  { %191 = vadd.xlane.f32.xlu1 %v190_v44 }
 0x281   :  { %v189_v51 = vpop.xlane.xlu0 %188 }
 0x282   :  { %v193_v52 = vmul.f32 0.03125, %v189_v51 }
 0x284   :  { %v195_v53 = vadd.f32 1e-05, %v193_v52 }
 0x285   :  { %v192_v54 = vpop.xlane.xlu1 %191 }
 0x286   :  { %4297 = vrsqrt.f32 %v195_v53  ;;  %v194_v55 = vmul.f32 0.03125, %v192_v54 }
 0x288   :  { %v196_v56 = vadd.f32 1e-05, %v194_v55 }
 0x28a   :  { %4299 = vrsqrt.f32 %v196_v56 }
 0x290   :  { %v4298_v57 = vpop.eup %4297 }
 0x291   :  { %v199_v58 = vmul.f32 %v4298_v57, %v183_v37 }
 0x293   :  { %v205_v62 = vmul.f32 %v3571_v59, %v199_v58  ;;  %v3580_v58 = vcombine.low %v4517_v46, %v4517_v46 }
 0x294   :  { %v4300_v60 = vpop.eup %4299 }
 0x295   :  { %v200_v61 = vmul.f32 %v4300_v60, %v184_v41  ;;  %v211_v1 = vadd.f32 %v3572_v63, %v205_v62 }
 0x297   :  { %v206_v0 = vmul.f32 %v3571_v59, %v200_v61 }
 0x299   :  { %v212_v2 = vadd.f32 %v3572_v63, %v206_v0 }
 0x29b   :  { %v213_v3 = vpack.c.bf16 %v212_v2, %v211_v1 }
 0x29d   :  { %3864 = vmatmul.mubr.msk.bf16.vlgmr.msra.gmra.mrb[0].mxu1 %vm173_vm7, %v213_v3 }
 0x29e   :  { %3869 = vmatprep.mubr.msk.bf16.mxu1 %vm4399_vm8, %v4398_v11 }
 0x370   :  { %v263_v4 = vpop.f32.mrb[0].mxu1 }
 0x371   :  { %v4548_v5 = vpack.c.bf16 %v263_v4, %v263_v4  ;;  %v3865_v6 = vpop.f32.mrb[1].mxu1 }
 0x372   :  { %v4550_v7 = vpop.f32.mrb[2].mxu1 }
 0x373   :  { %334 = vrot.lane.b32.xlu0 %v4548_v5, %s4400_s7  ;;  %272 = vrot.lane.b32.xlu1 %v4548_v5, %s4401_s8  ;;  %v3866_v8 = vpop.f32.mrb[3].mxu1 }
 0x3e5   :  { %v273_v9 = vpop.permute.xlu1 %272  ;;  %v335_v12 = vpop.permute.xlu0 %334 }
 0x3e6   :  { %v279_v10 = vsel %vm274_vm9, %v273_v9, 0  ;;  %v341_v13 = vsel %vm339_vm10, %v335_v12, 0 }
 0x3e7   :  { %3868 = vmatpush3.bf16.xpose.msra.mxu1 %v279_v10 }
 0x3e8   :  { %3873 = vmatprep.subr.bf16.mxu1 %v4398_v11 }
 0x3ee   :  { %3870 = vmatmul.mubr.msk.bf16.vlgmr.msra.gmra.mrb[4].mxu1 %vm274_vm9, %v4548_v5 }
 0x3ef   :  { %3874 = vmatpush3.bf16.msra.mxu1 %v341_v13  ;;  %3875 = vmatprep.mubr.msk.bf16.mxu1 %vm4399_vm8, %v4398_v11 }
 0x3f0   :  { %3879 = vmatprep.subr.bf16.mxu1 %v4398_v11 }
 0x4c1   :  { %v315_v15 = vpop.f32.mrb[4].mxu1 }
 0x4c2   :  { %v316_v16 = vadd.f32 %v315_v15, %v4567_v14  ;;  %v3871_v17 = vpop.f32.mrb[5].mxu1 }
 0x4c3   :  { %v318_v18 = vpop.f32.mrb[6].mxu1 }
 0x4c4   :  { %v321_v19 = vmul.f32 0.35355338, %v316_v16  ;;  %v3872_v21 = vpop.f32.mrb[7].mxu1 }
 0x4c6   :  { %v322_v22 = vsel %vm274_vm9, %v321_v19, -inf }
 0x4c7   :  { %323 = vmax.xlane.f32.xlu1 %v322_v22 }
 0x4d8   :  { %384 = vrot.lane.b32.xlu1 %v4548_v5, %s4402_s9 }
 0x554   :  { %v324_v24 = vpop.xlane.xlu1 %323 }
 0x555   :  { %v325_v25 = vsub.f32 %v321_v19, %v324_v24 }
 0x557   :  { %v326_v20 = vmul.f32 1.442695, %v325_v25 }
 0x558   :  { %v385_v35 = vpop.permute.xlu1 %384 }
 0x559   :  { %4301 = vpow2.f32 %v326_v20  ;;  %v3582_v20 = vcombine.low %v4512_v45, %v4512_v45 }
 0x563   :  { %v4302_v23 = vpop.eup %4301 }
 0x564   :  { %v328_v26 = vsel %vm274_vm9, %v4302_v23, 0.0 }
 0x565   :  { %329 = vadd.xlane.f32.xlu0 %v328_v26 }
 0x57b   :  { %386 = vrot.lane.b32.xlu0 %v4548_v5, %s4403_s10 }
 0x5f2   :  { %v330_v27 = vpop.xlane.xlu0 %329 }
 0x5f3   :  { %4303 = vrcp.f32 %v330_v27 }
 0x5f6   :  { %v387_v30 = vpop.permute.xlu0 %386 }
 0x5f7   :  { %v392_v34 = vsel %vm274_vm9, %v387_v30, 0 }
 0x5fd   :  { %v4304_v28 = vpop.eup %4303 }
 0x5fe   :  { %v332_v29 = vmul.f32 %v4304_v28, %v4302_v23 }
 0x600   :  { %v333_v33 = vpack.c.bf16 %v332_v29, %v332_v29 }
 0x602   :  { %3876 = vmatmul.mubr.msk.bf16.vlgmr.msra.gmra.mrb[8].mxu1 %vm274_vm9, %v333_v33 }
 0x603   :  { %3880 = vmatpush3.bf16.xpose.msra.mxu1 %v392_v34  ;;  %3881 = vmatprep.mubr.msk.bf16.mxu1 %vm4399_vm8, %v4398_v11 }
 0x604   :  { %3891 = vmatprep.subr.bf16.mxu1 %v4398_v11 }
 0x60a   :  { %3882 = vmatmul.mubr.msk.bf16.vlgmr.msra.gmra.mrb[12].mxu1 %vm274_vm9, %v385_v35 }
 0x60b   :  { %3893 = vmatprep.mubr.msk.bf16.mxu1 %vm4399_vm8, %v4398_v11 }
 0x6d5   :  { %v4584_v36 = vpop.f32.mrb[8].mxu1 }
 0x6d6   :  { %v3877_v37 = vpop.f32.mrb[9].mxu1  ;;  %v383_v30 = vpack.c.bf16 %v4584_v36, %v4584_v36 }
 0x6d7   :  { %v380_v38 = vpop.f32.mrb[10].mxu1 }
 0x6d8   :  { %v3878_v39 = vpop.f32.mrb[11].mxu1 }
 0x6dd   :  { %v428_v40 = vpop.f32.mrb[12].mxu1 }
 0x6de   :  { %v429_v41 = vadd.f32 %v428_v40, %v4567_v14  ;;  %v3883_v42 = vpop.f32.mrb[13].mxu1 }
 0x6df   :  { %v431_v43 = vpop.f32.mrb[14].mxu1 }
 0x6e0   :  { %v434_v44 = vmul.f32 0.35355338, %v429_v41  ;;  %v3884_v48 = vpop.f32.mrb[15].mxu1 }
 0x6e2   :  { %v435_v50 = vsel %vm274_vm9, %v434_v44, -inf }
 0x6e3   :  { %436 = vmax.xlane.f32.xlu0 %v435_v50 }
 0x6f9   :  { %447 = vrot.lane.b32.xlu0 %v4548_v5, %s4404_s11 }
 0x6fd   :  { %596 = vrot.lane.b32.xlu0 %v4548_v5, %s4405_s12 }
 0x701   :  { %594 = vrot.lane.b32.xlu0 %v4548_v5, %s4406_s13 }
 0x770   :  { %v437_v51 = vpop.xlane.xlu0 %436 }
 0x771   :  { %v438_v52 = vsub.f32 %v434_v44, %v437_v51 }
 0x773   :  { %v439_v53 = vmul.f32 1.442695, %v438_v52 }
 0x774   :  { %v448_v54 = vpop.permute.xlu0 %447 }
 0x775   :  { %4305 = vpow2.f32 %v439_v53  ;;  %v453_v55 = vsel %vm339_vm10, %v448_v54, 0 }
 0x776   :  { %3886 = vmatpush3.bf16.msra.mxu0 %v453_v55 }
 0x777   :  { %3897 = vmatprep.subr.bf16.mxu0 %v4398_v11 }
 0x778   :  { %v597_v1 = vpop.permute.xlu0 %596 }
 0x779   :  { %v602_v8 = vsel %vm274_vm9, %v597_v1, 0  ;;  %v4656_v1 = vpack.c.bf16 %v4550_v7, %v4550_v7 }
 0x77c   :  { %v595_v10 = vpop.permute.xlu0 %594 }
 0x77f   :  { %v4306_v56 = vpop.eup %4305 }
 0x780   :  { %v441_v57 = vsel %vm274_vm9, %v4306_v56, 0.0 }
 0x781   :  { %442 = vadd.xlane.f32.xlu1 %v441_v57 }
 0x792   :  { %497 = vrot.lane.b32.xlu1 %v3580_v58, %s4407_s0 }
 0x80e   :  { %v443_v59 = vpop.xlane.xlu1 %442 }
 0x80f   :  { %4307 = vrcp.f32 %v443_v59 }
 0x812   :  { %v498_v60 = vpop.permute.xlu1 %497 }
 0x813   :  { %v4601_v61 = vsel %vm339_vm10, %v498_v60, 0 }
 0x814   :  { %3892 = vmatpush3.bf16.msra.mxu1 %v4601_v61 }
 0x815   :  { %3903 = vmatprep.subr.bf16.mxu1 %v4398_v11 }
 0x819   :  { %v4308_v62 = vpop.eup %4307 }
 0x81a   :  { %v445_v63 = vmul.f32 %v4308_v62, %v4306_v56 }
 0x81c   :  { %v446_v0 = vpack.c.bf16 %v445_v63, %v445_v63 }
 0x81e   :  { %3888 = vmatmul.mubr.msk.bf16.vlgmr.msra.gmra.mrb[4].mxu0 %vm274_vm9, %v446_v0 }
 0x81f   :  { %3899 = vmatprep.mubr.msk.bf16.mxu0 %vm4399_vm8, %v4398_v11 }
 0x8f1   :  { %v489_v2 = vpop.f32.mrb[4].mxu0 }
 0x8f2   :  { %v495_v3 = vpack.c.bf16 %v489_v2, %v489_v2  ;;  %v3889_v4 = vpop.f32.mrb[5].mxu0 }
 0x8f3   :  { %v492_v6 = vpop.f32.mrb[6].mxu0 }
 0x8f4   :  { %v3890_v9 = vpop.f32.mrb[7].mxu0  ;;  %3894 = vmatmul.mubr.msk.bf16.vlgmr.msra.gmra.mrb[16].mxu1 %vm274_vm9, %v495_v3 }
 0x8f5   :  { %3904 = vmatpush3.bf16.xpose.msra.mxu1 %v602_v8  ;;  %3905 = vmatprep.mubr.msk.bf16.mxu1 %vm4399_vm8, %v4398_v11 }
 0x8f6   :  { %3915 = vmatprep.subr.bf16.mxu1 %v4398_v11 }
 0x8fc   :  { %3906 = vmatmul.mubr.msk.bf16.vlgmr.msra.gmra.mrb[20].mxu1 %vm274_vm9, %v595_v10 }
 0x8fd   :  { %3917 = vmatprep.mubr.msk.bf16.mxu1 %vm4399_vm8, %v4398_v11 }
 0x9c7   :  { %v539_v12 = vpop.f32.mrb[16].mxu1 }
 0x9c8   :  { %v3895_v13 = vpop.f32.mrb[17].mxu1 }
 0x9c9   :  { %v542_v15 = vpop.f32.mrb[18].mxu1 }
 0x9ca   :  { %v3896_v16 = vpop.f32.mrb[19].mxu1 }
 0x9cf   :  { %v638_v17 = vpop.f32.mrb[20].mxu1 }
 0x9d0   :  { %v639_v18 = vadd.f32 %v638_v17, %v4567_v14  ;;  %v3907_v19 = vpop.f32.mrb[21].mxu1 }
 0x9d1   :  { %v641_v21 = vpop.f32.mrb[22].mxu1 }
 0x9d2   :  { %v644_v22 = vmul.f32 0.35355338, %v639_v18  ;;  %v3908_v24 = vpop.f32.mrb[23].mxu1 }
 0x9d4   :  { %v645_v25 = vsel %vm274_vm9, %v644_v22, -inf }
 0x9d5   :  { %646 = vmax.xlane.f32.xlu0 %v645_v25 }
 0x9eb   :  { %546 = vrot.lane.b32.xlu0 %v3582_v20, %s4407_s0 }
 0x9ef   :  { %758 = vrot.lane.b32.xlu0 %v4548_v5, %s4408_s14 }
 0x9f3   :  { %756 = vrot.lane.b32.xlu0 %v4548_v5, %s4409_s15 }
 0xa62   :  { %v647_v23 = vpop.xlane.xlu0 %646 }
 0xa63   :  { %v648_v26 = vsub.f32 %v644_v22, %v647_v23 }
 0xa65   :  { %v649_v27 = vmul.f32 1.442695, %v648_v26 }
 0xa66   :  { %v547_v28 = vpop.permute.xlu0 %546 }
 0xa67   :  { %4309 = vpow2.f32 %v649_v27  ;;  %v4626_v29 = vsel %vm339_vm10, %v547_v28, 0 }
 0xa68   :  { %3898 = vmatpush3.bf16.msra.mxu0 %v4626_v29 }
 0xa69   :  { %3909 = vmatprep.subr.bf16.mxu0 %v4398_v11 }
 0xa6a   :  { %v759_v40 = vpop.permute.xlu0 %758 }
 0xa6b   :  { %3900 = vmatmul.mubr.msk.bf16.vlgmr.msra.gmra.mrb[8].mxu0 %vm274_vm9, %v383_v30  ;;  %v764_v42 = vsel %vm274_vm9, %v759_v40, 0 }
 0xa6c   :  { %3911 = vmatprep.mubr.msk.bf16.mxu0 %vm4399_vm8, %v4398_v11 }
 0xa6e   :  { %v757_v43 = vpop.permute.xlu0 %756 }
 0xa71   :  { %v4310_v33 = vpop.eup %4309 }
 0xa72   :  { %v651_v34 = vsel %vm274_vm9, %v4310_v33, 0.0 }
 0xa73   :  { %652 = vadd.xlane.f32.xlu1 %v651_v34 }
 0xa84   :  { %657 = vrot.lane.b32.xlu1 %v4548_v5, %s4410_s16 }
 0xb00   :  { %v653_v35 = vpop.xlane.xlu1 %652 }
 0xb01   :  { %4311 = vrcp.f32 %v653_v35 }
 0xb04   :  { %v658_v37 = vpop.permute.xlu1 %657 }
 0xb05   :  { %v663_v36 = vsel %vm339_vm10, %v658_v37, 0 }
 0xb06   :  { %3910 = vmatpush3.bf16.msra.mxu0 %v663_v36 }
 0xb07   :  { %3921 = vmatprep.subr.bf16.mxu0 %v4398_v11 }
 0xb0b   :  { %v4312_v38 = vpop.eup %4311 }
 0xb0c   :  { %v655_v39 = vmul.f32 %v4312_v38, %v4310_v33 }
 0xb0e   :  { %v656_v41 = vpack.c.bf16 %v655_v39, %v655_v39 }
 0xb10   :  { %3912 = vmatmul.mubr.msk.bf16.vlgmr.msra.gmra.mrb[12].mxu0 %vm274_vm9, %v656_v41 }
 0xb11   :  { %3922 = vmatpush3.bf16.xpose.msra.mxu0 %v764_v42  ;;  %3923 = vmatprep.mubr.msk.bf16.mxu0 %vm4399_vm8, %v4398_v11 }
 0xb12   :  { %3933 = vmatprep.subr.bf16.mxu0 %v4398_v11 }
 0xb18   :  { %3924 = vmatmul.mubr.msk.bf16.vlgmr.msra.gmra.mrb[16].mxu0 %vm274_vm9, %v757_v43 }
 0xb19   :  { %3935 = vmatprep.mubr.msk.bf16.mxu0 %vm4399_vm8, %v4398_v11 }
 0xb3e   :  { %v588_v44 = vpop.f32.mrb[8].mxu0 }
 0xb3f   :  { %v4648_v48 = vadd.f32 %v588_v44, %v539_v12  ;;  %v3901_v50 = vpop.f32.mrb[9].mxu0 }
 0xb40   :  { %v591_v51 = vpop.f32.mrb[10].mxu0 }
 0xb41   :  { %v3902_v52 = vpop.f32.mrb[11].mxu0 }
 0xbe3   :  { %v699_v53 = vpop.f32.mrb[12].mxu0 }
 0xbe4   :  { %v3913_v54 = vpop.f32.mrb[13].mxu0  ;;  %v705_v13 = vpack.c.bf16 %v699_v53, %v699_v53  ;;  %v3590_v53 = vcombine.low %v4533_v49, %v4533_v49 }
 0xbe5   :  { %v702_v55 = vpop.f32.mrb[14].mxu0 }
 0xbe6   :  { %v3914_v56 = vpop.f32.mrb[15].mxu0 }
 0xbeb   :  { %v800_v57 = vpop.f32.mrb[16].mxu0 }
 0xbec   :  { %v801_v58 = vadd.f32 %v800_v57, %v4567_v14  ;;  %v3925_v59 = vpop.f32.mrb[17].mxu0 }
 0xbed   :  { %v803_v60 = vpop.f32.mrb[18].mxu0 }
 0xbee   :  { %v806_v62 = vmul.f32 0.35355338, %v801_v58  ;;  %v3926_v63 = vpop.f32.mrb[19].mxu0 }
 0xbf0   :  { %v807_v0 = vsel %vm274_vm9, %v806_v62, -inf }
 0xbf1   :  { %808 = vmax.xlane.f32.xlu1 %v807_v0 }
 0xc02   :  { %819 = vrot.lane.b32.xlu1 %v4548_v5, %s4411_s17  ;;  %v3586_v5 = vcombine.low %v4522_v47, %v4522_v47 }
 0xc06   :  { %920 = vrot.lane.b32.xlu1 %v4656_v1, %s4401_s8 }
 0xc0a   :  { %1030 = vrot.lane.b32.xlu1 %v4656_v1, %s4402_s9 }
 0xc7e   :  { %v809_v2 = vpop.xlane.xlu1 %808 }
 0xc7f   :  { %v810_v3 = vsub.f32 %v806_v62, %v809_v2 }
 0xc81   :  { %v811_v4 = vmul.f32 1.442695, %v810_v3 }
 0xc82   :  { %v820_v12 = vpop.permute.xlu1 %819 }
 0xc83   :  { %4313 = vpow2.f32 %v811_v4  ;;  %v825_v15 = vsel %vm339_vm10, %v820_v12, 0 }
 0xc86   :  { %v921_v19 = vpop.permute.xlu1 %920 }
 0xc87   :  { %v926_v21 = vsel %vm274_vm9, %v921_v19, 0 }
 0xc8a   :  { %v1031_v25 = vpop.permute.xlu1 %1030 }
 0xc8d   :  { %v4314_v6 = vpop.eup %4313 }
 0xc8e   :  { %v813_v8 = vsel %vm274_vm9, %v4314_v6, 0.0 }
 0xc8f   :  { %814 = vadd.xlane.f32.xlu0 %v813_v8 }
 0xca5   :  { %707 = vrot.lane.b32.xlu0 %v3586_v5, %s4407_s0 }
 0xca9   :  { %1032 = vrot.lane.b32.xlu0 %v4656_v1, %s4403_s10 }
 0xd1c   :  { %v815_v7 = vpop.xlane.xlu0 %814 }
 0xd1d   :  { %4315 = vrcp.f32 %v815_v7 }
 0xd20   :  { %v708_v9 = vpop.permute.xlu0 %707 }
 0xd21   :  { %v4669_v10 = vsel %vm339_vm10, %v708_v9, 0 }
 0xd22   :  { %3916 = vmatpush3.bf16.msra.mxu1 %v4669_v10 }
 0xd23   :  { %3927 = vmatprep.subr.bf16.mxu1 %v4398_v11 }
 0xd24   :  { %v1033_v22 = vpop.permute.xlu0 %1032 }
 0xd25   :  { %3918 = vmatmul.mubr.msk.bf16.vlgmr.msra.gmra.mrb[24].mxu1 %vm274_vm9, %v705_v13  ;;  %v1038_v24 = vsel %vm274_vm9, %v1033_v22, 0  ;;  %v4737_v22 = vld [vmem:[%s5249_s5 + $0x2] ss:$0 sm:$0xff] }
 0xd26   :  { %3928 = vmatpush3.bf16.msra.mxu1 %v825_v15  ;;  %3929 = vmatprep.mubr.msk.bf16.mxu1 %vm4399_vm8, %v4398_v11 }
 0xd27   :  { %v4316_v16 = vpop.eup %4315  ;;  %3939 = vmatprep.subr.bf16.mxu1 %v4398_v11 }
 0xd28   :  { %v817_v17 = vmul.f32 %v4316_v16, %v4314_v6 }
 0xd2a   :  { %v818_v18 = vpack.c.bf16 %v817_v17, %v817_v17 }
 0xd2d   :  { %3930 = vmatmul.mubr.msk.bf16.vlgmr.msra.gmra.mrb[28].mxu1 %vm274_vm9, %v818_v18 }
 0xd2e   :  { %3941 = vmatprep.mubr.msk.bf16.mxu1 %vm4399_vm8, %v4398_v11 }
 0xd2f   :  { %3940 = vmatpush3.bf16.xpose.msra.mxu1 %v926_v21 }
 0xd30   :  { %3951 = vmatprep.subr.bf16.mxu1 %v4398_v11 }
 0xd36   :  { %3942 = vmatmul.mubr.msk.bf16.vlgmr.msra.gmra.mrb[32].mxu1 %vm274_vm9, %v4656_v1 }
 0xd37   :  { %3952 = vmatpush3.bf16.xpose.msra.mxu1 %v1038_v24  ;;  %3953 = vmatprep.mubr.msk.bf16.mxu1 %vm4399_vm8, %v4398_v11 }
 0xd38   :  { %3963 = vmatprep.subr.bf16.mxu1 %v4398_v11 }
 0xd3e   :  { %3954 = vmatmul.mubr.msk.bf16.vlgmr.msra.gmra.mrb[36].mxu1 %vm274_vm9, %v1031_v25 }
 0xd3f   :  { %3964 = vmatpush3.bf16.msra.mxu1 %v4601_v61  ;;  %3965 = vmatprep.mubr.msk.bf16.mxu1 %vm4399_vm8, %v4398_v11 }
 0xd40   :  { %3975 = vmatprep.subr.bf16.mxu1 %v4398_v11 }
 0xdf8   :  { %v749_v20 = vpop.f32.mrb[24].mxu1 }
 0xdf9   :  { %v4695_v23 = vadd.f32 %v749_v20, %v4648_v48  ;;  %v3919_v26 = vpop.f32.mrb[25].mxu1 }
 0xdfa   :  { %v752_v27 = vpop.f32.mrb[26].mxu1 }
 0xdfb   :  { %v3920_v28 = vpop.f32.mrb[27].mxu1 }
 0xe00   :  { %v861_v30 = vpop.f32.mrb[28].mxu1 }
 0xe01   :  { %v3931_v33 = vpop.f32.mrb[29].mxu1  ;;  %v867_v0 = vpack.c.bf16 %v861_v30, %v861_v30 }
 0xe02   :  { %v864_v34 = vpop.f32.mrb[30].mxu1 }
 0xe03   :  { %v3932_v35 = vpop.f32.mrb[31].mxu1 }
 0xe09   :  { %v962_v37 = vpop.f32.mrb[32].mxu1 }
 0xe0a   :  { %v963_v36 = vadd.f32 %v962_v37, %v4567_v14  ;;  %v3943_v61 = vpop.f32.mrb[33].mxu1 }
 0xe0b   :  { %v965_v38 = vpop.f32.mrb[34].mxu1 }
 0xe0c   :  { %v968_v39 = vmul.f32 0.35355338, %v963_v36  ;;  %v3944_v40 = vpop.f32.mrb[35].mxu1 }
 0xe0e   :  { %v969_v41 = vsel %vm274_vm9, %v968_v39, -inf }
 0xe0f   :  { %970 = vmax.xlane.f32.xlu0 %v969_v41 }
 0xe11   :  { %v1074_v42 = vpop.f32.mrb[36].mxu1 }
 0xe12   :  { %v1075_v43 = vadd.f32 %v1074_v42, %v4567_v14  ;;  %v3955_v44 = vpop.f32.mrb[37].mxu1 }
 0xe13   :  { %v1077_v48 = vpop.f32.mrb[38].mxu1 }
 0xe14   :  { %v1080_v50 = vmul.f32 0.35355338, %v1075_v43  ;;  %v3956_v51 = vpop.f32.mrb[39].mxu1 }
 0xe16   :  { %v1081_v52 = vsel %vm274_vm9, %v1080_v50, -inf }
 0xe17   :  { %1082 = vmax.xlane.f32.xlu1 %v1081_v52 }
 0xe28   :  { %869 = vrot.lane.b32.xlu1 %v3590_v53, %s4407_s0 }
 0xe2c   :  { %1093 = vrot.lane.b32.xlu1 %v4656_v1, %s4404_s11 }
 0xe30   :  { %1230 = vrot.lane.b32.xlu1 %v4656_v1, %s4405_s12 }
 0xe9c   :  { %v971_v54 = vpop.xlane.xlu0 %970 }
 0xe9d   :  { %v972_v55 = vsub.f32 %v968_v39, %v971_v54 }
 0xe9f   :  { %v973_v56 = vmul.f32 1.442695, %v972_v55 }
 0xea1   :  { %4317 = vpow2.f32 %v973_v56 }
 0xea4   :  { %v1083_v57 = vpop.xlane.xlu1 %1082 }
 0xea5   :  { %v1084_v58 = vsub.f32 %v1080_v50, %v1083_v57 }
 0xea7   :  { %v1085_v59 = vmul.f32 1.442695, %v1084_v58 }
 0xea8   :  { %v870_v60 = vpop.permute.xlu1 %869 }
 0xea9   :  { %4319 = vpow2.f32 %v1085_v59  ;;  %v4709_v62 = vsel %vm339_vm10, %v870_v60, 0 }
 0xeaa   :  { %3934 = vmatpush3.bf16.msra.mxu0 %v4709_v62 }
 0xeab   :  { %v4318_v63 = vpop.eup %4317  ;;  %3945 = vmatprep.subr.bf16.mxu0 %v4398_v11 }
 0xeac   :  { %v975_v2 = vsel %vm274_vm9, %v4318_v63, 0.0  ;;  %v1094_v13 = vpop.permute.xlu1 %1093 }
 0xead   :  { %976 = vadd.xlane.f32.xlu0 %v975_v2  ;;  %3936 = vmatmul.mubr.msk.bf16.vlgmr.msra.gmra.mrb[20].mxu0 %vm274_vm9, %v867_v0  ;;  %v1099_v16 = vsel %vm339_vm10, %v1094_v13, 0 }
 0xeae   :  { %3947 = vmatprep.mubr.msk.bf16.mxu0 %vm4399_vm8, %v4398_v11 }
 0xeb0   :  { %v1231_v37 = vpop.permute.xlu1 %1230 }
 0xeb1   :  { %v1236_v39 = vsel %vm274_vm9, %v1231_v37, 0 }
 0xeb3   :  { %v4320_v3 = vpop.eup %4319 }
 0xeb4   :  { %v1087_v4 = vsel %vm274_vm9, %v4320_v3, 0.0 }
 0xeb5   :  { %1088 = vadd.xlane.f32.xlu0 %v1087_v4 }
 0xecb   :  { %981 = vrot.lane.b32.xlu0 %v4656_v1, %s4400_s7 }
 0xecf   :  { %1228 = vrot.lane.b32.xlu0 %v4656_v1, %s4406_s13 }
 0xf3a   :  { %v977_v6 = vpop.xlane.xlu0 %976 }
 0xf3b   :  { %4321 = vrcp.f32 %v977_v6 }
 0xf42   :  { %v1089_v8 = vpop.xlane.xlu0 %1088 }
 0xf43   :  { %4323 = vrcp.f32 %v1089_v8 }
 0xf45   :  { %v4322_v5 = vpop.eup %4321 }
 0xf46   :  { %v979_v7 = vmul.f32 %v4322_v5, %v4318_v63  ;;  %v982_v9 = vpop.permute.xlu0 %981 }
 0xf47   :  { %v987_v12 = vsel %vm339_vm10, %v982_v9, 0 }
 0xf48   :  { %3946 = vmatpush3.bf16.msra.mxu0 %v987_v12  ;;  %v980_v15 = vpack.c.bf16 %v979_v7, %v979_v7 }
 0xf49   :  { %3957 = vmatprep.subr.bf16.mxu0 %v4398_v11 }
 0xf4b   :  { %3948 = vmatmul.mubr.msk.bf16.vlgmr.msra.gmra.mrb[24].mxu0 %vm274_vm9, %v980_v15 }
 0xf4c   :  { %3958 = vmatpush3.bf16.msra.mxu0 %v1099_v16  ;;  %3959 = vmatprep.mubr.msk.bf16.mxu0 %vm4399_vm8, %v4398_v11 }
 0xf4d   :  { %v4324_v17 = vpop.eup %4323  ;;  %3969 = vmatprep.subr.bf16.mxu0 %v4398_v11 }
 0xf4e   :  { %v1091_v18 = vmul.f32 %v4324_v17, %v4320_v3 }
 0xf50   :  { %v1092_v19 = vpack.c.bf16 %v1091_v18, %v1091_v18 }
 0xf53   :  { %3960 = vmatmul.mubr.msk.bf16.vlgmr.msra.gmra.mrb[28].mxu0 %vm274_vm9, %v1092_v19 }
 0xf54   :  { %3970 = vmatpush3.bf16.msra.mxu0 %v4626_v29  ;;  %3971 = vmatprep.mubr.msk.bf16.mxu0 %vm4399_vm8, %v4398_v11 }
 0xf55   :  { %3981 = vmatprep.subr.bf16.mxu0 %v4398_v11 }
 0xf80   :  { %v911_v21 = vpop.f32.mrb[20].mxu0 }
 0xf81   :  { %v917_v24 = vadd.f32 %v911_v21, %v4695_v23  ;;  %v3937_v25 = vpop.f32.mrb[21].mxu0 }
 0xf82   :  { %v914_v20 = vpop.f32.mrb[22].mxu0 }
 0xf83   :  { %v1545_v26 = vadd.f32 %v4737_v22, %v917_v24  ;;  %v3938_v27 = vpop.f32.mrb[23].mxu0 }
 0xf85   :  { %v4742_v29 = vadd.f32 %v1545_v26, %v4499_v32  ;;  %v1229_v32 = vpop.permute.xlu0 %1228 }
0x101e   :  { %v1023_v28 = vpop.f32.mrb[24].mxu0 }
0x101f   :  { %v1029_v30 = vpack.c.bf16 %v1023_v28, %v1023_v28  ;;  %v3949_v33 = vpop.f32.mrb[25].mxu0 }
0x1020   :  { %v1026_v34 = vpop.f32.mrb[26].mxu0 }
0x1021   :  { %v3950_v35 = vpop.f32.mrb[27].mxu0  ;;  %3972 = vmatmul.mubr.msk.bf16.vlgmr.msra.gmra.mrb[32].mxu0 %vm274_vm9, %v1029_v30 }
0x1022   :  { %3983 = vmatprep.mubr.msk.bf16.mxu0 %vm4399_vm8, %v4398_v11 }
0x1026   :  { %v1135_v23 = vpop.f32.mrb[28].mxu0 }
0x1027   :  { %v1141_v36 = vpack.c.bf16 %v1135_v23, %v1135_v23  ;;  %v3961_v61 = vpop.f32.mrb[29].mxu0 }
0x1028   :  { %v1138_v38 = vpop.f32.mrb[30].mxu0  ;;  %v1551_v61 = vsel %vm173_vm7, %v4742_v29, 0.0 }
0x1029   :  { %v3962_v40 = vpop.f32.mrb[31].mxu0  ;;  %3966 = vmatmul.mubr.msk.bf16.vlgmr.msra.gmra.mrb[40].mxu1 %vm274_vm9, %v1141_v36 }
0x102a   :  { %3976 = vmatpush3.bf16.xpose.msra.mxu1 %v1236_v39  ;;  %3977 = vmatprep.mubr.msk.bf16.mxu1 %vm4399_vm8, %v4398_v11 }
0x102b   :  { %3987 = vmatprep.subr.bf16.mxu1 %v4398_v11 }
0x1031   :  { %3978 = vmatmul.mubr.msk.bf16.vlgmr.msra.gmra.mrb[44].mxu1 %vm274_vm9, %v1229_v32 }
0x1032   :  { %3988 = vmatpush3.bf16.msra.mxu1 %v4669_v10  ;;  %3989 = vmatprep.mubr.msk.bf16.mxu1 %vm4399_vm8, %v4398_v11 }
0x1033   :  { %3999 = vmatprep.subr.bf16.mxu1 %v4398_v11 }
0x10f4   :  { %v1222_v41 = vpop.f32.mrb[32].mxu0 }
0x10f5   :  { %v3973_v42 = vpop.f32.mrb[33].mxu0 }
0x10f6   :  { %v1225_v43 = vpop.f32.mrb[34].mxu0 }
0x10f7   :  { %v3974_v44 = vpop.f32.mrb[35].mxu0 }
0x10f8   :  { %v3608_v44 = vcombine.high %v4512_v45, %v4517_v46 }
0x10fc   :  { %v1179_v48 = vpop.f32.mrb[40].mxu1 }
0x10fd   :  { %v4757_v50 = vadd.f32 %v1222_v41, %v1179_v48  ;;  %v3967_v51 = vpop.f32.mrb[41].mxu1 }
0x10fe   :  { %v1182_v52 = vpop.f32.mrb[42].mxu1 }
0x10ff   :  { %v3968_v53 = vpop.f32.mrb[43].mxu1 }
0x1104   :  { %v1272_v54 = vpop.f32.mrb[44].mxu1 }
0x1105   :  { %v1273_v55 = vadd.f32 %v1272_v54, %v4567_v14  ;;  %v3979_v56 = vpop.f32.mrb[45].mxu1 }
0x1106   :  { %v1275_v10 = vpop.f32.mrb[46].mxu1 }
0x1107   :  { %v1278_v57 = vmul.f32 0.35355338, %v1273_v55  ;;  %v3980_v58 = vpop.f32.mrb[47].mxu1 }
0x1109   :  { %v1279_v59 = vsel %vm274_vm9, %v1278_v57, -inf }
0x110a   :  { %1280 = vmax.xlane.f32.xlu1 %v1279_v59 }
0x111b   :  { %1386 = vrot.lane.b32.xlu1 %v4656_v1, %s4408_s14 }
0x111f   :  { %1384 = vrot.lane.b32.xlu1 %v4656_v1, %s4409_s15 }
0x1197   :  { %v1281_v60 = vpop.xlane.xlu1 %1280 }
0x1198   :  { %v1282_v63 = vsub.f32 %v1278_v57, %v1281_v60 }
0x119a   :  { %v1283_v0 = vmul.f32 1.442695, %v1282_v63 }
0x119b   :  { %v1387_v9 = vpop.permute.xlu1 %1386 }
0x119c   :  { %4325 = vpow2.f32 %v1283_v0  ;;  %v1392_v13 = vsel %vm274_vm9, %v1387_v9, 0 }
0x119f   :  { %v1385_v15 = vpop.permute.xlu1 %1384 }
0x11a6   :  { %v4326_v2 = vpop.eup %4325 }
0x11a7   :  { %v1285_v3 = vsel %vm274_vm9, %v4326_v2, 0.0 }
0x11a8   :  { %1286 = vadd.xlane.f32.xlu0 %v1285_v3 }
0x11be   :  { %1291 = vrot.lane.b32.xlu0 %v4656_v1, %s4410_s16 }
0x1235   :  { %v1287_v4 = vpop.xlane.xlu0 %1286 }
0x1236   :  { %4327 = vrcp.f32 %v1287_v4 }
0x1239   :  { %v1292_v6 = vpop.permute.xlu0 %1291 }
0x123a   :  { %v1297_v8 = vsel %vm339_vm10, %v1292_v6, 0 }
0x123b   :  { %3982 = vmatpush3.bf16.msra.mxu0 %v1297_v8 }
0x123c   :  { %3993 = vmatprep.subr.bf16.mxu0 %v4398_v11 }
0x1240   :  { %v4328_v5 = vpop.eup %4327 }
0x1241   :  { %v1289_v7 = vmul.f32 %v4328_v5, %v4326_v2 }
0x1243   :  { %v1290_v12 = vpack.c.bf16 %v1289_v7, %v1289_v7 }
0x1245   :  { %3984 = vmatmul.mubr.msk.bf16.vlgmr.msra.gmra.mrb[36].mxu0 %vm274_vm9, %v1290_v12 }
0x1246   :  { %3994 = vmatpush3.bf16.xpose.msra.mxu0 %v1392_v13  ;;  %3995 = vmatprep.mubr.msk.bf16.mxu0 %vm4399_vm8, %v4398_v11 }
0x1247   :  { %4005 = vmatprep.subr.bf16.mxu0 %v4398_v11 }
0x124d   :  { %3996 = vmatmul.mubr.msk.bf16.vlgmr.msra.gmra.mrb[40].mxu0 %vm274_vm9, %v1385_v15 }
0x124e   :  { %4006 = vmatpush3.bf16.msra.mxu0 %v4709_v62  ;;  %4007 = vmatprep.mubr.msk.bf16.mxu0 %vm4399_vm8, %v4398_v11 }
0x124f   :  { %4019 = vmatprep.subr.bf16.mxu0 %v4398_v11 }
0x1318   :  { %v1333_v16 = vpop.f32.mrb[36].mxu0 }
0x1319   :  { %v1339_v17 = vpack.c.bf16 %v1333_v16, %v1333_v16  ;;  %v3985_v18 = vpop.f32.mrb[37].mxu0 }
0x131a   :  { %v1336_v19 = vpop.f32.mrb[38].mxu0 }
0x131b   :  { %v3986_v21 = vpop.f32.mrb[39].mxu0  ;;  %3990 = vmatmul.mubr.msk.bf16.vlgmr.msra.gmra.mrb[48].mxu1 %vm274_vm9, %v1339_v17  ;;  %v3605_v19 = vld [vmem:[%s5249_s5 + $0x3] ss:$0 sm:$0xff] }
0x131c   :  { %4001 = vmatprep.mubr.msk.bf16.mxu1 %vm4399_vm8, %v4398_v11 }
0x1320   :  { %v1428_v24 = vpop.f32.mrb[40].mxu0 }
0x1321   :  { %v1429_v25 = vadd.f32 %v1428_v24, %v4567_v14  ;;  %v3997_v20 = vpop.f32.mrb[41].mxu0 }
0x1322   :  { %v1431_v62 = vpop.f32.mrb[42].mxu0 }
0x1323   :  { %v1434_v26 = vmul.f32 0.35355338, %v1429_v25  ;;  %v3998_v27 = vpop.f32.mrb[43].mxu0 }
0x1324   :  { %v4271_v27 = vld [vmem:[%s5250_s3] sm:$0xff]  }
0x1325   :  { %v1435_v28 = vsel %vm274_vm9, %v1434_v26, -inf }
0x1326   :  { %1436 = vmax.xlane.f32.xlu0 %v1435_v28  ;;  %v4272_v28 = vld [vmem:[%s5250_s3 + $0x8] sm:$0xff]  }
0x133c   :  { %1447 = vrot.lane.b32.xlu0 %v4656_v1, %s4411_s17 }
0x13b3   :  { %v1437_v30 = vpop.xlane.xlu0 %1436 }
0x13b4   :  { %v1438_v33 = vsub.f32 %v1434_v26, %v1437_v30  ;;  %v4273_v30 = vld [vmem:[%s5250_s3 + $0x10] sm:$0xff]  }
0x13b6   :  { %v1439_v34 = vmul.f32 1.442695, %v1438_v33  ;;  %v4274_v33 = vld [vmem:[%s5250_s3 + $0x18] sm:$0xff]  }
0x13b7   :  { %v1448_v35 = vpop.permute.xlu0 %1447 }
0x13b8   :  { %4329 = vpow2.f32 %v1439_v34  ;;  %v1453_v37 = vsel %vm339_vm10, %v1448_v35, 0  ;;  %v4275_v34 = vld [vmem:[%s5250_s3 + $0x20] sm:$0xff]   ;;  %v4276_v35 = vld [vmem:[%s5250_s3 + $0x28] sm:$0xff]  }
0x13b9   :  { %4000 = vmatpush3.bf16.msra.mxu1 %v1453_v37  ;;  %v4277_v37 = vld [vmem:[%s5250_s3 + $0x30] sm:$0xff]  }
0x13ba   :  { %4011 = vmatprep.subr.bf16.mxu1 %v4398_v11 }
0x13c2   :  { %v4330_v23 = vpop.eup %4329 }
0x13c3   :  { %v1441_v36 = vsel %vm274_vm9, %v4330_v23, 0.0 }
0x13c4   :  { %1442 = vadd.xlane.f32.xlu1 %v1441_v36  ;;  %v3607_v36 = vld [vmem:[%s5249_s5 + $0x5] ss:$0 sm:$0xff] }
0x13c8   :  { %1552 = vadd.xlane.f32.xlu1 %v1551_v61 }
0x13ee   :  { %v1377_v38 = vpop.f32.mrb[48].mxu1 }
0x13ef   :  { %v1383_v1 = vadd.f32 %v1377_v38, %v4757_v50  ;;  %v3991_v39 = vpop.f32.mrb[49].mxu1 }
0x13f0   :  { %v1380_v40 = vpop.f32.mrb[50].mxu1 }
0x13f1   :  { %v3992_v32 = vpop.f32.mrb[51].mxu1 }
0x1451   :  { %v1443_v41 = vpop.xlane.xlu1 %1442 }
0x1452   :  { %4331 = vrcp.f32 %v1443_v41 }
0x1455   :  { %v1553_v45 = vpop.xlane.xlu1 %1552 }
0x1456   :  { %v1557_v46 = vmul.f32 0.03125, %v1553_v45 }
0x1458   :  { %v1559_v58 = vsub.f32 %v4742_v29, %v1557_v46 }
0x145a   :  { %v1561_v2 = vmul.f32 %v1559_v58, %v1559_v58 }
0x145c   :  { %v4332_v42 = vpop.eup %4331  ;;  %v1563_v3 = vsel %vm173_vm7, %v1561_v2, 0.0 }
0x145d   :  { %v1445_v43 = vmul.f32 %v4332_v42, %v4330_v23  ;;  %v4278_v23 = vld [vmem:[%s5250_s3 + $0x38] sm:$0xff]  }
0x145f   :  { %v1446_v48 = vpack.c.bf16 %v1445_v43, %v1445_v43 }
0x1461   :  { %4002 = vmatmul.mubr.msk.bf16.vlgmr.msra.gmra.mrb[52].mxu1 %vm274_vm9, %v1446_v48 }
0x1462   :  { %4012 = vmatpush3.bf16.msra.mxu1 %v3608_v44  ;;  %4015 = vmatprep.mubr.msk.bf16.mxu1 %vm4399_vm8, %v4398_v11 }
0x1463   :  { %4013 = vmatprep.subr.bf16.mxu1 %v4398_v11 }
0x1534   :  { %v1489_v50 = vpop.f32.mrb[52].mxu1 }
0x1535   :  { %v1495_v51 = vpack.c.bf16 %v1489_v50, %v1489_v50  ;;  %v4003_v52 = vpop.f32.mrb[53].mxu1 }
0x1536   :  { %v1492_v53 = vpop.f32.mrb[54].mxu1 }
0x1537   :  { %v4004_v54 = vpop.f32.mrb[55].mxu1  ;;  %4008 = vmatmul.mubr.msk.bf16.vlgmr.msra.gmra.mrb[44].mxu0 %vm274_vm9, %v1495_v51 }
0x1538   :  { %4035 = vmatprep.mubr.msk.bf16.mxu0 %vm4399_vm8, %v4398_v11  ;;  %4020 = vmatpush3.bf16.msra.mxu0 %v4271_v27 }
0x1539   :  { %4021 = vmatprep.subr.bf16.mxu0 %v4398_v11 }
0x153c   :  { %4022 = vmatpush3.bf16.msra.mxu0 %v4272_v28 }
0x153d   :  { %4023 = vmatprep.subr.bf16.mxu0 %v4398_v11 }
0x1540   :  { %4024 = vmatpush3.bf16.msra.mxu0 %v4273_v30 }
0x1541   :  { %4025 = vmatprep.subr.bf16.mxu0 %v4398_v11 }
0x1544   :  { %4026 = vmatpush3.bf16.msra.mxu0 %v4274_v33 }
0x1545   :  { %4027 = vmatprep.subr.bf16.mxu0 %v4398_v11 }
0x1548   :  { %4028 = vmatpush3.bf16.msra.mxu0 %v4275_v34 }
0x1549   :  { %4029 = vmatprep.subr.bf16.mxu0 %v4398_v11 }
0x154c   :  { %4030 = vmatpush3.bf16.msra.mxu0 %v4276_v35 }
0x154d   :  { %4031 = vmatprep.subr.bf16.mxu0 %v4398_v11 }
0x1550   :  { %4032 = vmatpush3.bf16.msra.mxu0 %v4277_v37  ;;  %v3611_v37 = vld [vmem:[%s5249_s5 + $0x6] ss:$0 sm:$0xff] }
0x1551   :  { %4033 = vmatprep.subr.bf16.mxu0 %v4398_v11 }
0x1554   :  { %4034 = vmatpush3.bf16.msra.mxu0 %v4278_v23 }
0x1555   :  { %4065 = vmatprep.subr.bf16.mxu0 %v4398_v11 }
0x160a   :  { %v1533_v55 = vpop.f32.mrb[44].mxu0 }
0x160b   :  { %v1539_v56 = vadd.f32 %v1533_v55, %v1383_v1  ;;  %v4009_v10 = vpop.f32.mrb[45].mxu0 }
0x160c   :  { %v1536_v57 = vpop.f32.mrb[46].mxu0 }
0x160d   :  { %v1546_v59 = vadd.f32 %v4737_v22, %v1539_v56  ;;  %v4010_v60 = vpop.f32.mrb[47].mxu0 }
0x160f   :  { %v4805_v63 = vadd.f32 %v4497_v31, %v1546_v59  ;;  %v3609_v31 = vcombine.high %v4522_v47, %v4533_v49  ;;  %v3606_v49 = vld [vmem:[%s5249_s5 + $0x4] ss:$0 sm:$0xff] }
0x1611   :  { %v1554_v0 = vsel %vm173_vm7, %v4805_v63, 0.0  ;;  %4014 = vmatpush3.bf16.msra.mxu1 %v3609_v31 }
0x1612   :  { %1555 = vadd.xlane.f32.xlu1 %v1554_v0  ;;  %4039 = vmatprep.subr.bf16.mxu1 %v4398_v11 }
0x1616   :  { %1564 = vadd.xlane.f32.xlu1 %v1563_v3 }
0x169f   :  { %v1556_v4 = vpop.xlane.xlu1 %1555 }
0x16a0   :  { %v1558_v6 = vmul.f32 0.03125, %v1556_v4 }
0x16a2   :  { %v1560_v8 = vsub.f32 %v4805_v63, %v1558_v6 }
0x16a3   :  { %v1565_v22 = vpop.xlane.xlu1 %1564 }
0x16a4   :  { %v1562_v5 = vmul.f32 %v1560_v8, %v1560_v8  ;;  %v1569_v9 = vmul.f32 0.03125, %v1565_v22 }
0x16a6   :  { %v1566_v7 = vsel %vm173_vm7, %v1562_v5, 0.0  ;;  %v1571_v12 = vadd.f32 1e-05, %v1569_v9 }
0x16a7   :  { %1567 = vadd.xlane.f32.xlu1 %v1566_v7 }
0x16a8   :  { %4333 = vrsqrt.f32 %v1571_v12 }
0x16b2   :  { %v4334_v17 = vpop.eup %4333 }
0x16b3   :  { %v1575_v18 = vmul.f32 %v4334_v17, %v1559_v58 }
0x16b5   :  { %v1581_v24 = vmul.f32 %v3605_v19, %v1575_v18 }
0x16b7   :  { %v1587_v20 = vadd.f32 %v3606_v49, %v1581_v24 }
0x1734   :  { %v1568_v13 = vpop.xlane.xlu1 %1567 }
0x1735   :  { %v1570_v15 = vmul.f32 0.03125, %v1568_v13 }
0x1737   :  { %v1572_v16 = vadd.f32 1e-05, %v1570_v15 }
0x1739   :  { %4335 = vrsqrt.f32 %v1572_v16 }
0x1743   :  { %v4336_v21 = vpop.eup %4335 }
0x1744   :  { %v1576_v47 = vmul.f32 %v4336_v21, %v1560_v8 }
0x1746   :  { %v1582_v25 = vmul.f32 %v3605_v19, %v1576_v47 }
0x1748   :  { %v1588_v62 = vadd.f32 %v3606_v49, %v1582_v25 }
0x174a   :  { %v1589_v26 = vpack.c.bf16 %v1588_v62, %v1587_v20 }
0x174c   :  { %4016 = vmatmul.mubr.msk.bf16.vlgmr.msra.gmra.mrb[56].mxu1 %vm173_vm7, %v1589_v26 }
0x174d   :  { %4043 = vmatprep.mubr.msk.bf16.mxu1 %vm4399_vm8, %v4398_v11 }
0x181f   :  { %v1640_v61 = vpop.f32.mrb[56].mxu1 }
0x1820   :  { %v1641_v38 = vadd.f32 %v3607_v36, %v1640_v61  ;;  %v4017_v1 = vpop.f32.mrb[57].mxu1 }
0x1821   :  { %v1643_v39 = vpop.f32.mrb[58].mxu1 }
0x1822   :  { %v1649_v40 = vmul.f32 0.70710677, %v1641_v38  ;;  %v1644_v32 = vadd.f32 %v3607_v36, %v1643_v39  ;;  %v4018_v41 = vpop.f32.mrb[59].mxu1  ;;  %v1647_v27 = vmul.f32 0.5, %v1641_v38 }
0x1824   :  { %v1651_v42 = vand.u32 2147483647, %v1649_v40  ;;  %v1650_v43 = vmul.f32 0.70710677, %v1644_v32  ;;  %vm1689_vm12 = vcmp.lt.f32.partialorder %v1649_v40, 0.0  ;;  %v1648_v28 = vmul.f32 0.5, %v1644_v32 }
0x1826   :  { %v1653_v44 = vmul.f32 0.3275911, %v1651_v42  ;;  %v1652_v48 = vand.u32 2147483647, %v1650_v43  ;;  %v1677_v53 = vsub.f32 0.0, %v1651_v42  ;;  %vm1690_vm13 = vcmp.lt.f32.partialorder %v1650_v43, 0.0 }
0x1828   :  { %v1655_v50 = vadd.f32 1.0, %v1653_v44  ;;  %v1654_v51 = vmul.f32 0.3275911, %v1652_v48  ;;  %v1678_v54 = vsub.f32 0.0, %v1652_v48  ;;  %v1679_v46 = vmul.f32 %v1677_v53, %v1651_v42 }
0x182a   :  { %4337 = vrcp.f32 %v1655_v50  ;;  %v1656_v52 = vadd.f32 1.0, %v1654_v51  ;;  %v1680_v57 = vmul.f32 %v1678_v54, %v1652_v48  ;;  %v1681_v58 = vmul.f32 1.442695, %v1679_v46  ;;  %v4886_v46 = vld [vmem:[%s5248_s2 + $0x28] sm:$0xff] }
0x182c   :  { %4339 = vrcp.f32 %v1656_v52  ;;  %v1683_v3 = vmul.f32 1.442695, %v1680_v57 }
0x182d   :  { %4341 = vpow2.f32 %v1681_v58 }
0x182e   :  { %4343 = vpow2.f32 %v1683_v3 }
0x1834   :  { %v4338_v45 = vpop.eup %4337 }
0x1835   :  { %v1659_v55 = vmul.f32 1.0614054, %v4338_v45 }
0x1836   :  { %v4340_v56 = vpop.eup %4339 }
0x1837   :  { %v1661_v10 = vadd.f32 -1.4531521, %v1659_v55  ;;  %v1660_v59 = vmul.f32 1.0614054, %v4340_v56  ;;  %v4342_v15 = vpop.eup %4341 }
0x1838   :  { %v4344_v19 = vpop.eup %4343 }
0x1839   :  { %v1663_v60 = vmul.f32 %v4338_v45, %v1661_v10  ;;  %v1662_v0 = vadd.f32 -1.4531521, %v1660_v59  ;;  %v4899_v10 = vld [vmem:[%s5248_s2 + $0x38] sm:$0xff] }
0x183b   :  { %v1665_v2 = vadd.f32 1.4214138, %v1663_v60  ;;  %v1664_v4 = vmul.f32 %v4340_v56, %v1662_v0 }
0x183d   :  { %v1667_v6 = vmul.f32 %v4338_v45, %v1665_v2  ;;  %v1666_v8 = vadd.f32 1.4214138, %v1664_v4 }
0x183f   :  { %v1669_v5 = vadd.f32 -0.28449672, %v1667_v6  ;;  %v1668_v7 = vmul.f32 %v4340_v56, %v1666_v8  ;;  %v3624_v8 = vld [vmem:[%s5249_s5 + $0x7] ss:$0 sm:$0xff] }
0x1841   :  { %v1671_v31 = vmul.f32 %v4338_v45, %v1669_v5  ;;  %v1670_v22 = vadd.f32 -0.28449672, %v1668_v7 }
0x1843   :  { %v1673_v9 = vadd.f32 0.2548296, %v1671_v31  ;;  %v1672_v12 = vmul.f32 %v4340_v56, %v1670_v22  ;;  %v3625_v22 = vld [vmem:[%s5249_s5 + $0x8] ss:$0 sm:$0xff] }
0x1845   :  { %v1675_v13 = vmul.f32 %v4338_v45, %v1673_v9  ;;  %v1674_v16 = vadd.f32 0.2548296, %v1672_v12  ;;  %v4881_v45 = vld [vmem:[%s5248_s2 + $0x20] sm:$0xff] }
0x1846   :  { %v3626_v55 = vcombine.low %v4881_v45, %v4886_v46 }
0x1847   :  { %v1685_v17 = vmul.f32 %v4342_v15, %v1675_v13  ;;  %v1676_v18 = vmul.f32 %v4340_v56, %v1674_v16  ;;  %v4894_v56 = vld [vmem:[%s5248_s2 + $0x30] sm:$0xff] }
0x1848   :  { %4040 = vmatpush3.bf16.msra.mxu1 %v3626_v55  ;;  %v3627_v57 = vcombine.low %v4894_v56, %v4899_v10 }
0x1849   :  { %v1687_v21 = vsub.f32 1.0, %v1685_v17  ;;  %v1686_v24 = vmul.f32 %v4344_v19, %v1676_v18  ;;  %4041 = vmatprep.subr.bf16.mxu1 %v4398_v11 }
0x184b   :  { %v1691_v47 = vsub.f32 0.0, %v1687_v21  ;;  %v1688_v49 = vsub.f32 1.0, %v1686_v24 }
0x184c   :  { %4042 = vmatpush3.bf16.msra.mxu1 %v3627_v57 }
0x184d   :  { %v1693_v25 = vsel %vm1689_vm12, %v1691_v47, %v1687_v21  ;;  %v1692_v20 = vsub.f32 0.0, %v1688_v49  ;;  %4047 = vmatprep.subr.bf16.mxu1 %v4398_v11 }
0x184e   :  { %v1695_v62 = vadd.f32 1.0, %v1693_v25 }
0x184f   :  { %v1694_v26 = vsel %vm1690_vm13, %v1692_v20, %v1688_v49 }
0x1850   :  { %v1696_v30 = vadd.f32 1.0, %v1694_v26  ;;  %v1697_v33 = vmul.f32 %v1695_v62, %v1647_v27 }
0x1852   :  { %v1698_v34 = vmul.f32 %v1696_v30, %v1648_v28 }
0x1854   :  { %v1699_v35 = vpack.c.bf16 %v1698_v34, %v1697_v33 }
0x1856   :  { %4036 = vmatmul.mubr.bf16.vlgmr.msra.gmra.mrb[48].mxu0 %v1699_v35 }
0x1857   :  { %4067 = vmatprep.mubr.msk.bf16.mxu0 %vm4399_vm8, %v4398_v11 }
0x1929   :  { %v1803_v23 = vpop.f32.mrb[48].mxu0 }
0x192a   :  { %v1804_v36 = vadd.f32 %v3611_v37, %v1803_v23  ;;  %v4037_v61 = vpop.f32.mrb[49].mxu0 }
0x192b   :  { %v1806_v1 = vpop.f32.mrb[50].mxu0 }
0x192c   :  { %v4865_v39 = vadd.f32 %v1804_v36, %v4742_v29  ;;  %v1807_v38 = vadd.f32 %v3611_v37, %v1806_v1  ;;  %v4038_v40 = vpop.f32.mrb[51].mxu0 }
0x192e   :  { %v4868_v32 = vadd.f32 %v1807_v38, %v4805_v63  ;;  %v1819_v41 = vsel %vm173_vm7, %v4865_v39, 0.0 }
0x192f   :  { %1820 = vadd.xlane.f32.xlu0 %v1819_v41 }
0x1930   :  { %v1822_v42 = vsel %vm173_vm7, %v4868_v32, 0.0 }
0x1931   :  { %1823 = vadd.xlane.f32.xlu1 %v1822_v42 }
0x19bc   :  { %v1821_v43 = vpop.xlane.xlu0 %1820 }
0x19bd   :  { %v1825_v44 = vmul.f32 0.03125, %v1821_v43 }
0x19be   :  { %v1824_v48 = vpop.xlane.xlu1 %1823 }
0x19bf   :  { %v1827_v50 = vsub.f32 %v4865_v39, %v1825_v44  ;;  %v1826_v29 = vmul.f32 0.03125, %v1824_v48 }
0x19c1   :  { %v1828_v51 = vsub.f32 %v4868_v32, %v1826_v29  ;;  %v1829_v52 = vmul.f32 %v1827_v50, %v1827_v50 }
0x19c3   :  { %v1831_v63 = vsel %vm173_vm7, %v1829_v52, 0.0  ;;  %v1830_v53 = vmul.f32 %v1828_v51, %v1828_v51 }
0x19c4   :  { %1832 = vadd.xlane.f32.xlu1 %v1831_v63 }
0x19c5   :  { %v1834_v54 = vsel %vm173_vm7, %v1830_v53, 0.0 }
0x19c8   :  { %1835 = vadd.xlane.f32.xlu1 %v1834_v54 }
0x1a51   :  { %v1833_v58 = vpop.xlane.xlu1 %1832 }
0x1a52   :  { %v1837_v59 = vmul.f32 0.03125, %v1833_v58 }
0x1a54   :  { %v1839_v60 = vadd.f32 1e-05, %v1837_v59 }
0x1a55   :  { %v1836_v0 = vpop.xlane.xlu1 %1835 }
0x1a56   :  { %4345 = vrsqrt.f32 %v1839_v60  ;;  %v1838_v2 = vmul.f32 0.03125, %v1836_v0 }
0x1a58   :  { %v1840_v3 = vadd.f32 1e-05, %v1838_v2 }
0x1a5a   :  { %4347 = vrsqrt.f32 %v1840_v3  ;;  %v3633_v3 = vcombine.low %v4886_v46, %v4886_v46 }
0x1a60   :  { %v4346_v4 = vpop.eup %4345 }
0x1a61   :  { %v1843_v6 = vmul.f32 %v4346_v4, %v1827_v50 }
0x1a63   :  { %v1849_v7 = vmul.f32 %v3624_v8, %v1843_v6 }
0x1a64   :  { %v4348_v5 = vpop.eup %4347 }
0x1a65   :  { %v1844_v31 = vmul.f32 %v4348_v5, %v1828_v51  ;;  %v1855_v12 = vadd.f32 %v3625_v22, %v1849_v7 }
0x1a67   :  { %v1850_v9 = vmul.f32 %v3624_v8, %v1844_v31 }
0x1a69   :  { %v1856_v13 = vadd.f32 %v3625_v22, %v1850_v9 }
0x1a6b   :  { %v1857_v15 = vpack.c.bf16 %v1856_v13, %v1855_v12 }
0x1a6d   :  { %4044 = vmatmul.mubr.msk.bf16.vlgmr.msra.gmra.mrb[60].mxu1 %vm173_vm7, %v1857_v15 }
0x1a6e   :  { %4049 = vmatprep.mubr.msk.bf16.mxu1 %vm4399_vm8, %v4398_v11 }
0x1b40   :  { %v1907_v16 = vpop.f32.mrb[60].mxu1 }
0x1b41   :  { %v4913_v17 = vpack.c.bf16 %v1907_v16, %v1907_v16  ;;  %v4045_v18 = vpop.f32.mrb[61].mxu1 }
0x1b42   :  { %v4915_v19 = vpop.f32.mrb[62].mxu1 }
0x1b43   :  { %1977 = vrot.lane.b32.xlu0 %v4913_v17, %s4400_s7  ;;  %1916 = vrot.lane.b32.xlu1 %v4913_v17, %s4401_s8  ;;  %v4046_v21 = vpop.f32.mrb[63].mxu1 }
0x1bb5   :  { %v1917_v24 = vpop.permute.xlu1 %1916  ;;  %v1978_v49 = vpop.permute.xlu0 %1977 }
0x1bb6   :  { %v1922_v47 = vsel %vm274_vm9, %v1917_v24, 0  ;;  %v1983_v25 = vsel %vm339_vm10, %v1978_v49, 0 }
0x1bb7   :  { %4048 = vmatpush3.bf16.xpose.msra.mxu1 %v1922_v47 }
0x1bb8   :  { %4053 = vmatprep.subr.bf16.mxu1 %v4398_v11 }
0x1bbe   :  { %4050 = vmatmul.mubr.msk.bf16.vlgmr.msra.gmra.mrb[64].mxu1 %vm274_vm9, %v4913_v17 }
0x1bbf   :  { %4054 = vmatpush3.bf16.msra.mxu1 %v1983_v25  ;;  %4055 = vmatprep.mubr.msk.bf16.mxu1 %vm4399_vm8, %v4398_v11 }
0x1bc0   :  { %4059 = vmatprep.subr.bf16.mxu1 %v4398_v11 }
0x1c91   :  { %v1958_v20 = vpop.f32.mrb[64].mxu1 }
0x1c92   :  { %v1959_v62 = vadd.f32 %v1958_v20, %v4567_v14  ;;  %v4051_v26 = vpop.f32.mrb[65].mxu1 }
0x1c93   :  { %v1961_v27 = vpop.f32.mrb[66].mxu1 }
0x1c94   :  { %v1964_v28 = vmul.f32 0.35355338, %v1959_v62  ;;  %v4052_v30 = vpop.f32.mrb[67].mxu1 }
0x1c96   :  { %v1965_v33 = vsel %vm274_vm9, %v1964_v28, -inf }
0x1c97   :  { %1966 = vmax.xlane.f32.xlu1 %v1965_v33 }
0x1d24   :  { %v1967_v34 = vpop.xlane.xlu1 %1966 }
0x1d25   :  { %v1968_v35 = vsub.f32 %v1964_v28, %v1967_v34 }
0x1d27   :  { %v1969_v37 = vmul.f32 1.442695, %v1968_v35 }
0x1d29   :  { %4349 = vpow2.f32 %v1969_v37  ;;  %v3635_v37 = vcombine.low %v4881_v45, %v4881_v45 }
0x1d33   :  { %v4350_v23 = vpop.eup %4349 }
0x1d34   :  { %v1971_v36 = vsel %vm274_vm9, %v4350_v23, 0.0 }
0x1d35   :  { %1972 = vadd.xlane.f32.xlu0 %v1971_v36 }
0x1d4b   :  { %2028 = vrot.lane.b32.xlu0 %v4913_v17, %s4403_s10 }
0x1d4f   :  { %2026 = vrot.lane.b32.xlu0 %v4913_v17, %s4402_s9 }
0x1dc2   :  { %v1973_v61 = vpop.xlane.xlu0 %1972 }
0x1dc3   :  { %4351 = vrcp.f32 %v1973_v61 }
0x1dc6   :  { %v2029_v40 = vpop.permute.xlu0 %2028 }
0x1dc7   :  { %v2034_v42 = vsel %vm274_vm9, %v2029_v40, 0 }
0x1dca   :  { %v2027_v43 = vpop.permute.xlu0 %2026 }
0x1dcd   :  { %v4352_v1 = vpop.eup %4351 }
0x1dce   :  { %v1975_v38 = vmul.f32 %v4352_v1, %v4350_v23 }
0x1dd0   :  { %v1976_v41 = vpack.c.bf16 %v1975_v38, %v1975_v38 }
0x1dd2   :  { %4056 = vmatmul.mubr.msk.bf16.vlgmr.msra.gmra.mrb[68].mxu1 %vm274_vm9, %v1976_v41 }
0x1dd3   :  { %4060 = vmatpush3.bf16.xpose.msra.mxu1 %v2034_v42  ;;  %4061 = vmatprep.mubr.msk.bf16.mxu1 %vm4399_vm8, %v4398_v11 }
0x1dd4   :  { %4071 = vmatprep.subr.bf16.mxu1 %v4398_v11 }
0x1dda   :  { %4062 = vmatmul.mubr.msk.bf16.vlgmr.msra.gmra.mrb[72].mxu1 %vm274_vm9, %v2027_v43 }
0x1ddb   :  { %4073 = vmatprep.mubr.msk.bf16.mxu1 %vm4399_vm8, %v4398_v11 }
0x1ea5   :  { %v4944_v44 = vpop.f32.mrb[68].mxu1 }
0x1ea6   :  { %v4057_v48 = vpop.f32.mrb[69].mxu1  ;;  %v2025_v40 = vpack.c.bf16 %v4944_v44, %v4944_v44  ;;  %v3639_v44 = vcombine.low %v4894_v56, %v4894_v56 }
0x1ea7   :  { %v2022_v50 = vpop.f32.mrb[70].mxu1 }
0x1ea8   :  { %v4058_v29 = vpop.f32.mrb[71].mxu1 }
0x1ead   :  { %v2070_v51 = vpop.f32.mrb[72].mxu1 }
0x1eae   :  { %v2071_v52 = vadd.f32 %v2070_v51, %v4567_v14  ;;  %v4063_v63 = vpop.f32.mrb[73].mxu1 }
0x1eaf   :  { %v2073_v53 = vpop.f32.mrb[74].mxu1 }
0x1eb0   :  { %v2076_v54 = vmul.f32 0.35355338, %v2071_v52  ;;  %v4064_v55 = vpop.f32.mrb[75].mxu1 }
0x1eb2   :  { %v2077_v57 = vsel %vm274_vm9, %v2076_v54, -inf }
0x1eb3   :  { %2078 = vmax.xlane.f32.xlu0 %v2077_v57 }
0x1f40   :  { %v2079_v58 = vpop.xlane.xlu0 %2078 }
0x1f41   :  { %v2080_v59 = vsub.f32 %v2076_v54, %v2079_v58 }
0x1f43   :  { %v2081_v60 = vmul.f32 1.442695, %v2080_v59 }
0x1f45   :  { %4353 = vpow2.f32 %v2081_v60 }
0x1f4f   :  { %v4354_v0 = vpop.eup %4353 }
0x1f50   :  { %v2083_v2 = vsel %vm274_vm9, %v4354_v0, 0.0 }
0x1f51   :  { %2084 = vadd.xlane.f32.xlu1 %v2083_v2 }
0x1f62   :  { %2089 = vrot.lane.b32.xlu1 %v4913_v17, %s4404_s11 }
0x1f66   :  { %2139 = vrot.lane.b32.xlu1 %v3633_v3, %s4407_s0 }
0x1f6a   :  { %2238 = vrot.lane.b32.xlu1 %v4913_v17, %s4405_s12 }
0x1f6e   :  { %2236 = vrot.lane.b32.xlu1 %v4913_v17, %s4406_s13 }
0x1fde   :  { %v2085_v4 = vpop.xlane.xlu1 %2084 }
0x1fdf   :  { %4355 = vrcp.f32 %v2085_v4 }
0x1fe2   :  { %v2090_v6 = vpop.permute.xlu1 %2089 }
0x1fe3   :  { %v2095_v8 = vsel %vm339_vm10, %v2090_v6, 0 }
0x1fe4   :  { %4066 = vmatpush3.bf16.msra.mxu0 %v2095_v8 }
0x1fe5   :  { %4077 = vmatprep.subr.bf16.mxu0 %v4398_v11 }
0x1fe6   :  { %v2140_v5 = vpop.permute.xlu1 %2139 }
0x1fe7   :  { %v4961_v7 = vsel %vm339_vm10, %v2140_v5, 0 }
0x1fe8   :  { %4072 = vmatpush3.bf16.msra.mxu1 %v4961_v7 }
0x1fe9   :  { %v4356_v31 = vpop.eup %4355  ;;  %4083 = vmatprep.subr.bf16.mxu1 %v4398_v11 }
0x1fea   :  { %v2087_v22 = vmul.f32 %v4356_v31, %v4354_v0  ;;  %v2239_v12 = vpop.permute.xlu1 %2238 }
0x1feb   :  { %v2244_v21 = vsel %vm274_vm9, %v2239_v12, 0 }
0x1fec   :  { %v2088_v9 = vpack.c.bf16 %v2087_v22, %v2087_v22 }
0x1fee   :  { %4068 = vmatmul.mubr.msk.bf16.vlgmr.msra.gmra.mrb[52].mxu0 %vm274_vm9, %v2088_v9  ;;  %v2237_v47 = vpop.permute.xlu1 %2236 }
0x1fef   :  { %4079 = vmatprep.mubr.msk.bf16.mxu0 %vm4399_vm8, %v4398_v11 }
0x20c1   :  { %v2131_v13 = vpop.f32.mrb[52].mxu0 }
0x20c2   :  { %v2137_v15 = vpack.c.bf16 %v2131_v13, %v2131_v13  ;;  %v4069_v16 = vpop.f32.mrb[53].mxu0 }
0x20c3   :  { %v2134_v18 = vpop.f32.mrb[54].mxu0 }
0x20c4   :  { %v4070_v24 = vpop.f32.mrb[55].mxu0  ;;  %4074 = vmatmul.mubr.msk.bf16.vlgmr.msra.gmra.mrb[76].mxu1 %vm274_vm9, %v2137_v15 }
0x20c5   :  { %4084 = vmatpush3.bf16.xpose.msra.mxu1 %v2244_v21  ;;  %4085 = vmatprep.mubr.msk.bf16.mxu1 %vm4399_vm8, %v4398_v11  ;;  %v5027_v21 = vpack.c.bf16 %v4915_v19, %v4915_v19 }
0x20c6   :  { %4095 = vmatprep.subr.bf16.mxu1 %v4398_v11 }
0x20cc   :  { %4086 = vmatmul.mubr.msk.bf16.vlgmr.msra.gmra.mrb[80].mxu1 %vm274_vm9, %v2237_v47 }
0x20cd   :  { %4097 = vmatprep.mubr.msk.bf16.mxu1 %vm4399_vm8, %v4398_v11 }
0x2197   :  { %v2181_v49 = vpop.f32.mrb[76].mxu1 }
0x2198   :  { %v4075_v25 = vpop.f32.mrb[77].mxu1 }
0x2199   :  { %v2184_v20 = vpop.f32.mrb[78].mxu1 }
0x219a   :  { %v4076_v62 = vpop.f32.mrb[79].mxu1 }
0x219f   :  { %v2280_v26 = vpop.f32.mrb[80].mxu1 }
0x21a0   :  { %v2281_v27 = vadd.f32 %v2280_v26, %v4567_v14  ;;  %v4087_v28 = vpop.f32.mrb[81].mxu1 }
0x21a1   :  { %v2283_v30 = vpop.f32.mrb[82].mxu1 }
0x21a2   :  { %v2286_v33 = vmul.f32 0.35355338, %v2281_v27  ;;  %v4088_v34 = vpop.f32.mrb[83].mxu1 }
0x21a4   :  { %v2287_v35 = vsel %vm274_vm9, %v2286_v33, -inf }
0x21a5   :  { %2288 = vmax.xlane.f32.xlu0 %v2287_v35 }
0x21bb   :  { %2188 = vrot.lane.b32.xlu0 %v3635_v37, %s4407_s0 }
0x21bf   :  { %2299 = vrot.lane.b32.xlu0 %v4913_v17, %s4410_s16 }
0x21c3   :  { %2400 = vrot.lane.b32.xlu0 %v4913_v17, %s4408_s14 }
0x21c7   :  { %2398 = vrot.lane.b32.xlu0 %v4913_v17, %s4409_s15 }
0x2232   :  { %v2289_v23 = vpop.xlane.xlu0 %2288 }
0x2233   :  { %v2290_v36 = vsub.f32 %v2286_v33, %v2289_v23 }
0x2235   :  { %v2291_v61 = vmul.f32 1.442695, %v2290_v36 }
0x2236   :  { %v2189_v1 = vpop.permute.xlu0 %2188 }
0x2237   :  { %4357 = vpow2.f32 %v2291_v61  ;;  %v4988_v38 = vsel %vm339_vm10, %v2189_v1, 0 }
0x2238   :  { %4078 = vmatpush3.bf16.msra.mxu0 %v4988_v38 }
0x2239   :  { %4089 = vmatprep.subr.bf16.mxu0 %v4398_v11 }
0x223a   :  { %v2300_v41 = vpop.permute.xlu0 %2299 }
0x223b   :  { %v2305_v42 = vsel %vm339_vm10, %v2300_v41, 0  ;;  %4080 = vmatmul.mubr.msk.bf16.vlgmr.msra.gmra.mrb[56].mxu0 %vm274_vm9, %v2025_v40 }
0x223c   :  { %4090 = vmatpush3.bf16.msra.mxu0 %v2305_v42  ;;  %4091 = vmatprep.mubr.msk.bf16.mxu0 %vm4399_vm8, %v4398_v11 }
0x223d   :  { %4101 = vmatprep.subr.bf16.mxu0 %v4398_v11 }
0x223e   :  { %v2401_v53 = vpop.permute.xlu0 %2400 }
0x223f   :  { %v2406_v55 = vsel %vm274_vm9, %v2401_v53, 0 }
0x2241   :  { %v4358_v43 = vpop.eup %4357 }
0x2242   :  { %v2293_v48 = vsel %vm274_vm9, %v4358_v43, 0.0 }
0x2243   :  { %2294 = vadd.xlane.f32.xlu1 %v2293_v48 }
0x2254   :  { %2349 = vrot.lane.b32.xlu1 %v3639_v44, %s4407_s0 }
0x2258   :  { %2461 = vrot.lane.b32.xlu1 %v4913_v17, %s4411_s17  ;;  %v2399_v17 = vpop.permute.xlu0 %2398 }
0x22d0   :  { %v2295_v50 = vpop.xlane.xlu1 %2294 }
0x22d1   :  { %4359 = vrcp.f32 %v2295_v50 }
0x22d4   :  { %v2350_v29 = vpop.permute.xlu1 %2349 }
0x22d5   :  { %v5006_v51 = vsel %vm339_vm10, %v2350_v29, 0 }
0x22d6   :  { %4096 = vmatpush3.bf16.msra.mxu1 %v5006_v51 }
0x22d7   :  { %4107 = vmatprep.subr.bf16.mxu1 %v4398_v11 }
0x22d8   :  { %v2462_v2 = vpop.permute.xlu1 %2461 }
0x22d9   :  { %v2467_v5 = vsel %vm339_vm10, %v2462_v2, 0 }
0x22db   :  { %v4360_v52 = vpop.eup %4359 }
0x22dc   :  { %v2297_v63 = vmul.f32 %v4360_v52, %v4358_v43 }
0x22de   :  { %v2298_v54 = vpack.c.bf16 %v2297_v63, %v2297_v63 }
0x22e0   :  { %4092 = vmatmul.mubr.msk.bf16.vlgmr.msra.gmra.mrb[60].mxu0 %vm274_vm9, %v2298_v54 }
0x22e1   :  { %4102 = vmatpush3.bf16.xpose.msra.mxu0 %v2406_v55  ;;  %4103 = vmatprep.mubr.msk.bf16.mxu0 %vm4399_vm8, %v4398_v11 }
0x22e2   :  { %4113 = vmatprep.subr.bf16.mxu0 %v4398_v11 }
0x22e8   :  { %4104 = vmatmul.mubr.msk.bf16.vlgmr.msra.gmra.mrb[64].mxu0 %vm274_vm9, %v2399_v17 }
0x22e9   :  { %4115 = vmatprep.mubr.msk.bf16.mxu0 %vm4399_vm8, %v4398_v11 }
0x230e   :  { %v2230_v57 = vpop.f32.mrb[56].mxu0 }
0x230f   :  { %v2231_v58 = vadd.f32 %v2230_v57, %v2181_v49  ;;  %v4081_v59 = vpop.f32.mrb[57].mxu0 }
0x2310   :  { %v2233_v60 = vpop.f32.mrb[58].mxu0 }
0x2311   :  { %v4082_v0 = vpop.f32.mrb[59].mxu0  ;;  %v3643_v60 = vcombine.low %v4899_v10, %v4899_v10 }
0x23b3   :  { %v2341_v3 = vpop.f32.mrb[60].mxu0 }
0x23b4   :  { %v2347_v4 = vpack.c.bf16 %v2341_v3, %v2341_v3  ;;  %v4093_v6 = vpop.f32.mrb[61].mxu0 }
0x23b5   :  { %v2344_v8 = vpop.f32.mrb[62].mxu0 }
0x23b6   :  { %v4094_v31 = vpop.f32.mrb[63].mxu0  ;;  %4098 = vmatmul.mubr.msk.bf16.vlgmr.msra.gmra.mrb[84].mxu1 %vm274_vm9, %v2347_v4 }
0x23b7   :  { %4108 = vmatpush3.bf16.msra.mxu1 %v2467_v5  ;;  %4109 = vmatprep.mubr.msk.bf16.mxu1 %vm4399_vm8, %v4398_v11 }
0x23b8   :  { %4119 = vmatprep.subr.bf16.mxu1 %v4398_v11 }
0x23bb   :  { %v2442_v22 = vpop.f32.mrb[64].mxu0 }
0x23bc   :  { %v2443_v9 = vadd.f32 %v2442_v22, %v4567_v14  ;;  %v4105_v12 = vpop.f32.mrb[65].mxu0 }
0x23bd   :  { %v2445_v13 = vpop.f32.mrb[66].mxu0 }
0x23be   :  { %v2448_v15 = vmul.f32 0.35355338, %v2443_v9  ;;  %v4106_v16 = vpop.f32.mrb[67].mxu0 }
0x23c0   :  { %v2449_v18 = vsel %vm274_vm9, %v2448_v15, -inf }
0x23c1   :  { %2450 = vmax.xlane.f32.xlu0 %v2449_v18 }
0x23d7   :  { %2672 = vrot.lane.b32.xlu0 %v5027_v21, %s4402_s9 }
0x244e   :  { %v2451_v24 = vpop.xlane.xlu0 %2450 }
0x244f   :  { %v2452_v47 = vsub.f32 %v2448_v15, %v2451_v24 }
0x2451   :  { %v2453_v49 = vmul.f32 1.442695, %v2452_v47 }
0x2452   :  { %v2673_v1 = vpop.permute.xlu0 %2672 }
0x2453   :  { %4361 = vpow2.f32 %v2453_v49 }
0x245d   :  { %v4362_v25 = vpop.eup %4361 }
0x245e   :  { %v2455_v20 = vsel %vm274_vm9, %v4362_v25, 0.0 }
0x245f   :  { %2456 = vadd.xlane.f32.xlu1 %v2455_v20 }
0x2470   :  { %2562 = vrot.lane.b32.xlu1 %v5027_v21, %s4401_s8 }
0x2474   :  { %2674 = vrot.lane.b32.xlu1 %v5027_v21, %s4403_s10 }
0x2489   :  { %v2391_v62 = vpop.f32.mrb[84].mxu1 }
0x248a   :  { %v5036_v19 = vadd.f32 %v2391_v62, %v2231_v58  ;;  %v4099_v26 = vpop.f32.mrb[85].mxu1 }
0x248b   :  { %v2394_v27 = vpop.f32.mrb[86].mxu1 }
0x248c   :  { %v4100_v28 = vpop.f32.mrb[87].mxu1 }
0x24ec   :  { %v2457_v30 = vpop.xlane.xlu1 %2456 }
0x24ed   :  { %4363 = vrcp.f32 %v2457_v30 }
0x24f0   :  { %v2563_v35 = vpop.permute.xlu1 %2562 }
0x24f1   :  { %v2568_v23 = vsel %vm274_vm9, %v2563_v35, 0 }
0x24f4   :  { %v2675_v36 = vpop.permute.xlu1 %2674 }
0x24f5   :  { %v2680_v61 = vsel %vm274_vm9, %v2675_v36, 0 }
0x24f7   :  { %v4364_v33 = vpop.eup %4363 }
0x24f8   :  { %v2459_v34 = vmul.f32 %v4364_v33, %v4362_v25 }
0x24fa   :  { %v2460_v37 = vpack.c.bf16 %v2459_v34, %v2459_v34 }
0x24fc   :  { %4110 = vmatmul.mubr.msk.bf16.vlgmr.msra.gmra.mrb[88].mxu1 %vm274_vm9, %v2460_v37 }
0x24fd   :  { %4120 = vmatpush3.bf16.xpose.msra.mxu1 %v2568_v23  ;;  %4121 = vmatprep.mubr.msk.bf16.mxu1 %vm4399_vm8, %v4398_v11 }
0x24fe   :  { %4131 = vmatprep.subr.bf16.mxu1 %v4398_v11 }
0x2504   :  { %4122 = vmatmul.mubr.msk.bf16.vlgmr.msra.gmra.mrb[92].mxu1 %vm274_vm9, %v5027_v21 }
0x2505   :  { %4132 = vmatpush3.bf16.xpose.msra.mxu1 %v2680_v61  ;;  %4133 = vmatprep.mubr.msk.bf16.mxu1 %vm4399_vm8, %v4398_v11 }
0x2506   :  { %4143 = vmatprep.subr.bf16.mxu1 %v4398_v11 }
0x250c   :  { %4134 = vmatmul.mubr.msk.bf16.vlgmr.msra.gmra.mrb[96].mxu1 %vm274_vm9, %v2673_v1 }
0x250d   :  { %4144 = vmatpush3.bf16.msra.mxu1 %v4961_v7  ;;  %4145 = vmatprep.mubr.msk.bf16.mxu1 %vm4399_vm8, %v4398_v11 }
0x250e   :  { %4155 = vmatprep.subr.bf16.mxu1 %v4398_v11 }
0x25cf   :  { %v2503_v40 = vpop.f32.mrb[88].mxu1 }
0x25d0   :  { %v4111_v41 = vpop.f32.mrb[89].mxu1  ;;  %v2509_v8 = vpack.c.bf16 %v2503_v40, %v2503_v40 }
0x25d1   :  { %v2506_v42 = vpop.f32.mrb[90].mxu1 }
0x25d2   :  { %v4112_v43 = vpop.f32.mrb[91].mxu1 }
0x25d7   :  { %v2604_v48 = vpop.f32.mrb[92].mxu1 }
0x25d8   :  { %v2605_v44 = vadd.f32 %v2604_v48, %v4567_v14  ;;  %v4123_v50 = vpop.f32.mrb[93].mxu1 }
0x25d9   :  { %v2607_v29 = vpop.f32.mrb[94].mxu1 }
0x25da   :  { %v2610_v52 = vmul.f32 0.35355338, %v2605_v44  ;;  %v4124_v63 = vpop.f32.mrb[95].mxu1 }
0x25dc   :  { %v2611_v53 = vsel %vm274_vm9, %v2610_v52, -inf }
0x25dd   :  { %2612 = vmax.xlane.f32.xlu1 %v2611_v53 }
0x25df   :  { %v2716_v7 = vpop.f32.mrb[96].mxu1 }
0x25e0   :  { %v2717_v54 = vadd.f32 %v2716_v7, %v4567_v14  ;;  %v4135_v55 = vpop.f32.mrb[97].mxu1 }
0x25e1   :  { %v2719_v17 = vpop.f32.mrb[98].mxu1 }
0x25e2   :  { %v2722_v57 = vmul.f32 0.35355338, %v2717_v54  ;;  %v4136_v58 = vpop.f32.mrb[99].mxu1 }
0x25e4   :  { %v2723_v59 = vsel %vm274_vm9, %v2722_v57, -inf }
0x25e5   :  { %2724 = vmax.xlane.f32.xlu0 %v2723_v59 }
0x25ee   :  { %2511 = vrot.lane.b32.xlu1 %v3643_v60, %s4407_s0 }
0x25fb   :  { %2623 = vrot.lane.b32.xlu0 %v5027_v21, %s4400_s7 }
0x266a   :  { %v2613_v0 = vpop.xlane.xlu1 %2612 }
0x266b   :  { %v2614_v2 = vsub.f32 %v2610_v52, %v2613_v0 }
0x266d   :  { %v2615_v3 = vmul.f32 1.442695, %v2614_v2 }
0x266e   :  { %v2512_v4 = vpop.permute.xlu1 %2511 }
0x266f   :  { %4365 = vpow2.f32 %v2615_v3  ;;  %v5064_v6 = vsel %vm339_vm10, %v2512_v4, 0 }
0x2670   :  { %4114 = vmatpush3.bf16.msra.mxu0 %v5064_v6 }
0x2671   :  { %4125 = vmatprep.subr.bf16.mxu0 %v4398_v11 }
0x2672   :  { %v2725_v5 = vpop.xlane.xlu0 %2724 }
0x2673   :  { %v2726_v31 = vsub.f32 %v2722_v57, %v2725_v5  ;;  %4116 = vmatmul.mubr.msk.bf16.vlgmr.msra.gmra.mrb[68].mxu0 %vm274_vm9, %v2509_v8 }
0x2674   :  { %4127 = vmatprep.mubr.msk.bf16.mxu0 %vm4399_vm8, %v4398_v11 }
0x2675   :  { %v2727_v22 = vmul.f32 1.442695, %v2726_v31 }
0x2676   :  { %v2624_v9 = vpop.permute.xlu0 %2623 }
0x2677   :  { %4367 = vpow2.f32 %v2727_v22  ;;  %v2629_v12 = vsel %vm339_vm10, %v2624_v9, 0 }
0x2678   :  { %4126 = vmatpush3.bf16.msra.mxu0 %v2629_v12 }
0x2679   :  { %v4366_v13 = vpop.eup %4365  ;;  %4137 = vmatprep.subr.bf16.mxu0 %v4398_v11 }
0x267a   :  { %v2617_v15 = vsel %vm274_vm9, %v4366_v13, 0.0 }
0x267b   :  { %2618 = vadd.xlane.f32.xlu1 %v2617_v15 }
0x2681   :  { %v4368_v16 = vpop.eup %4367 }
0x2682   :  { %v2729_v18 = vsel %vm274_vm9, %v4368_v16, 0.0 }
0x2683   :  { %2730 = vadd.xlane.f32.xlu1 %v2729_v18 }
0x2694   :  { %2735 = vrot.lane.b32.xlu1 %v5027_v21, %s4404_s11 }
0x2698   :  { %2872 = vrot.lane.b32.xlu1 %v5027_v21, %s4405_s12 }
0x269c   :  { %2870 = vrot.lane.b32.xlu1 %v5027_v21, %s4406_s13 }
0x2708   :  { %v2619_v24 = vpop.xlane.xlu1 %2618 }
0x2709   :  { %4369 = vrcp.f32 %v2619_v24 }
0x2710   :  { %v2731_v47 = vpop.xlane.xlu1 %2730 }
0x2711   :  { %4371 = vrcp.f32 %v2731_v47 }
0x2713   :  { %v4370_v49 = vpop.eup %4369 }
0x2714   :  { %v2621_v25 = vmul.f32 %v4370_v49, %v4366_v13  ;;  %v2736_v20 = vpop.permute.xlu1 %2735 }
0x2715   :  { %v2741_v26 = vsel %vm339_vm10, %v2736_v20, 0 }
0x2716   :  { %v2622_v62 = vpack.c.bf16 %v2621_v25, %v2621_v25 }
0x2718   :  { %4128 = vmatmul.mubr.msk.bf16.vlgmr.msra.gmra.mrb[72].mxu0 %vm274_vm9, %v2622_v62 }
0x2719   :  { %4138 = vmatpush3.bf16.msra.mxu0 %v2741_v26  ;;  %4139 = vmatprep.mubr.msk.bf16.mxu0 %vm4399_vm8, %v4398_v11 }
0x271a   :  { %4149 = vmatprep.subr.bf16.mxu0 %v4398_v11 }
0x271b   :  { %v4372_v27 = vpop.eup %4371 }
0x271c   :  { %v2733_v28 = vmul.f32 %v4372_v27, %v4368_v16 }
0x271e   :  { %v2734_v30 = vpack.c.bf16 %v2733_v28, %v2733_v28 }
0x2720   :  { %4140 = vmatmul.mubr.msk.bf16.vlgmr.msra.gmra.mrb[76].mxu0 %vm274_vm9, %v2734_v30  ;;  %v3657_v30 = vld [vmem:[%s5249_s5 + $0x9] ss:$0 sm:$0xff] }
0x2721   :  { %4150 = vmatpush3.bf16.msra.mxu0 %v4988_v38  ;;  %4151 = vmatprep.mubr.msk.bf16.mxu0 %vm4399_vm8, %v4398_v11  ;;  %v2873_v38 = vpop.permute.xlu1 %2872 }
0x2722   :  { %4161 = vmatprep.subr.bf16.mxu0 %v4398_v11 }
0x2725   :  { %v2871_v29 = vpop.permute.xlu1 %2870 }
0x2746   :  { %v2553_v33 = vpop.f32.mrb[68].mxu0 }
0x2747   :  { %v5092_v34 = vadd.f32 %v2553_v33, %v5036_v19  ;;  %v4117_v35 = vpop.f32.mrb[69].mxu0  ;;  %v2878_v19 = vsel %vm274_vm9, %v2873_v38, 0 }
0x2748   :  { %v2556_v37 = vpop.f32.mrb[70].mxu0 }
0x2749   :  { %v4118_v23 = vpop.f32.mrb[71].mxu0  ;;  %v3187_v33 = vadd.f32 %v3657_v30, %v5092_v34 }
0x27eb   :  { %v2665_v36 = vpop.f32.mrb[72].mxu0 }
0x27ec   :  { %v2671_v61 = vpack.c.bf16 %v2665_v36, %v2665_v36  ;;  %v4129_v1 = vpop.f32.mrb[73].mxu0 }
0x27ed   :  { %v2668_v40 = vpop.f32.mrb[74].mxu0  ;;  %v5139_v1 = vadd.f32 %v3187_v33, %v4865_v39 }
0x27ee   :  { %v4130_v41 = vpop.f32.mrb[75].mxu0  ;;  %4152 = vmatmul.mubr.msk.bf16.vlgmr.msra.gmra.mrb[80].mxu0 %vm274_vm9, %v2671_v61 }
0x27ef   :  { %4163 = vmatprep.mubr.msk.bf16.mxu0 %vm4399_vm8, %v4398_v11  ;;  %v3193_v41 = vsel %vm173_vm7, %v5139_v1, 0.0 }
0x27f3   :  { %v2777_v42 = vpop.f32.mrb[76].mxu0 }
0x27f4   :  { %v2783_v43 = vpack.c.bf16 %v2777_v42, %v2777_v42  ;;  %v4141_v48 = vpop.f32.mrb[77].mxu0 }
0x27f5   :  { %v2780_v44 = vpop.f32.mrb[78].mxu0 }
0x27f6   :  { %v4142_v50 = vpop.f32.mrb[79].mxu0  ;;  %4146 = vmatmul.mubr.msk.bf16.vlgmr.msra.gmra.mrb[100].mxu1 %vm274_vm9, %v2783_v43 }
0x27f7   :  { %4156 = vmatpush3.bf16.xpose.msra.mxu1 %v2878_v19  ;;  %4157 = vmatprep.mubr.msk.bf16.mxu1 %vm4399_vm8, %v4398_v11 }
0x27f8   :  { %4167 = vmatprep.subr.bf16.mxu1 %v4398_v11 }
0x27fe   :  { %4158 = vmatmul.mubr.msk.bf16.vlgmr.msra.gmra.mrb[104].mxu1 %vm274_vm9, %v2871_v29 }
0x27ff   :  { %4168 = vmatpush3.bf16.msra.mxu1 %v5006_v51  ;;  %4169 = vmatprep.mubr.msk.bf16.mxu1 %vm4399_vm8, %v4398_v11 }
0x2800   :  { %4179 = vmatprep.subr.bf16.mxu1 %v4398_v11 }
0x28c1   :  { %v2864_v52 = vpop.f32.mrb[80].mxu0 }
0x28c2   :  { %v4153_v63 = vpop.f32.mrb[81].mxu0 }
0x28c3   :  { %v2867_v53 = vpop.f32.mrb[82].mxu0 }
0x28c4   :  { %v4154_v7 = vpop.f32.mrb[83].mxu0 }
0x28c9   :  { %v2821_v54 = vpop.f32.mrb[100].mxu1 }
0x28ca   :  { %v5107_v55 = vadd.f32 %v2864_v52, %v2821_v54  ;;  %v4147_v17 = vpop.f32.mrb[101].mxu1 }
0x28cb   :  { %v2824_v57 = vpop.f32.mrb[102].mxu1 }
0x28cc   :  { %v4148_v58 = vpop.f32.mrb[103].mxu1 }
0x28d1   :  { %v2914_v59 = vpop.f32.mrb[104].mxu1 }
0x28d2   :  { %v2915_v60 = vadd.f32 %v2914_v59, %v4567_v14  ;;  %v4159_v0 = vpop.f32.mrb[105].mxu1 }
0x28d3   :  { %v2917_v51 = vpop.f32.mrb[106].mxu1 }
0x28d4   :  { %v2920_v2 = vmul.f32 0.35355338, %v2915_v60  ;;  %v4160_v3 = vpop.f32.mrb[107].mxu1 }
0x28d6   :  { %v2921_v4 = vsel %vm274_vm9, %v2920_v2, -inf }
0x28d7   :  { %2922 = vmax.xlane.f32.xlu0 %v2921_v4 }
0x28ed   :  { %2933 = vrot.lane.b32.xlu0 %v5027_v21, %s4410_s16 }
0x28f1   :  { %3026 = vrot.lane.b32.xlu0 %v5027_v21, %s4409_s15 }
0x2964   :  { %v2923_v8 = vpop.xlane.xlu0 %2922 }
0x2965   :  { %v2924_v5 = vsub.f32 %v2920_v2, %v2923_v8 }
0x2967   :  { %v2925_v31 = vmul.f32 1.442695, %v2924_v5 }
0x2968   :  { %v2934_v22 = vpop.permute.xlu0 %2933 }
0x2969   :  { %4373 = vpow2.f32 %v2925_v31  ;;  %v2939_v9 = vsel %vm339_vm10, %v2934_v22, 0 }
0x296a   :  { %4162 = vmatpush3.bf16.msra.mxu0 %v2939_v9 }
0x296b   :  { %4173 = vmatprep.subr.bf16.mxu0 %v4398_v11 }
0x296c   :  { %v3027_v25 = vpop.permute.xlu0 %3026 }
0x2973   :  { %v4374_v12 = vpop.eup %4373 }
0x2974   :  { %v2927_v13 = vsel %vm274_vm9, %v4374_v12, 0.0 }
0x2975   :  { %2928 = vadd.xlane.f32.xlu1 %v2927_v13 }
0x2986   :  { %3028 = vrot.lane.b32.xlu1 %v5027_v21, %s4408_s14 }
0x2a02   :  { %v2929_v15 = vpop.xlane.xlu1 %2928 }
0x2a03   :  { %4375 = vrcp.f32 %v2929_v15 }
0x2a06   :  { %v3029_v24 = vpop.permute.xlu1 %3028 }
0x2a07   :  { %v3034_v49 = vsel %vm274_vm9, %v3029_v24, 0 }
0x2a0d   :  { %v4376_v16 = vpop.eup %4375 }
0x2a0e   :  { %v2931_v18 = vmul.f32 %v4376_v16, %v4374_v12 }
0x2a10   :  { %v2932_v47 = vpack.c.bf16 %v2931_v18, %v2931_v18 }
0x2a12   :  { %4164 = vmatmul.mubr.msk.bf16.vlgmr.msra.gmra.mrb[84].mxu0 %vm274_vm9, %v2932_v47  ;;  %v3662_v47 = vcombine.high %v4894_v56, %v4899_v10 }
0x2a13   :  { %4174 = vmatpush3.bf16.xpose.msra.mxu0 %v3034_v49  ;;  %4175 = vmatprep.mubr.msk.bf16.mxu0 %vm4399_vm8, %v4398_v11 }
0x2a14   :  { %4185 = vmatprep.subr.bf16.mxu0 %v4398_v11 }
0x2a1a   :  { %4176 = vmatmul.mubr.msk.bf16.vlgmr.msra.gmra.mrb[88].mxu0 %vm274_vm9, %v3027_v25 }
0x2a1b   :  { %4186 = vmatpush3.bf16.msra.mxu0 %v5064_v6  ;;  %4187 = vmatprep.mubr.msk.bf16.mxu0 %vm4399_vm8, %v4398_v11 }
0x2a1c   :  { %4199 = vmatprep.subr.bf16.mxu0 %v4398_v11 }
0x2ae5   :  { %v2975_v20 = vpop.f32.mrb[84].mxu0 }
0x2ae6   :  { %v2981_v62 = vpack.c.bf16 %v2975_v20, %v2975_v20  ;;  %v4165_v26 = vpop.f32.mrb[85].mxu0 }
0x2ae7   :  { %v2978_v27 = vpop.f32.mrb[86].mxu0 }
0x2ae8   :  { %v4166_v28 = vpop.f32.mrb[87].mxu0  ;;  %4170 = vmatmul.mubr.msk.bf16.vlgmr.msra.gmra.mrb[108].mxu1 %vm274_vm9, %v2981_v62 }
0x2ae9   :  { %4181 = vmatprep.mubr.msk.bf16.mxu1 %vm4399_vm8, %v4398_v11 }
0x2aed   :  { %v3070_v6 = vpop.f32.mrb[88].mxu0 }
0x2aee   :  { %v3071_v35 = vadd.f32 %v3070_v6, %v4567_v14  ;;  %v4177_v37 = vpop.f32.mrb[89].mxu0  ;;  %v3659_v6 = vld [vmem:[%s5249_s5 + $0xb] ss:$0 sm:$0xff] }
0x2aef   :  { %v3073_v23 = vpop.f32.mrb[90].mxu0 }
0x2af0   :  { %v3076_v36 = vmul.f32 0.35355338, %v3071_v35  ;;  %v4178_v61 = vpop.f32.mrb[91].mxu0 }
0x2af1   :  { %v4288_v61 = vld [vmem:[%s5250_s3 + $0x48] sm:$0xff]  }
0x2af2   :  { %v3077_v40 = vsel %vm274_vm9, %v3076_v36, -inf }
0x2af3   :  { %3078 = vmax.xlane.f32.xlu1 %v3077_v40  ;;  %v4289_v40 = vld [vmem:[%s5250_s3 + $0x50] sm:$0xff]  }
0x2af7   :  { %3194 = vadd.xlane.f32.xlu1 %v3193_v41  ;;  %v4290_v41 = vld [vmem:[%s5250_s3 + $0x58] sm:$0xff]  }
0x2b80   :  { %v3079_v38 = vpop.xlane.xlu1 %3078 }
0x2b81   :  { %v3080_v42 = vsub.f32 %v3076_v36, %v3079_v38  ;;  %v4287_v36 = vld [vmem:[%s5250_s3 + $0x40] sm:$0xff]  }
0x2b82   :  { %v4291_v38 = vld [vmem:[%s5250_s3 + $0x60] sm:$0xff]  }
0x2b83   :  { %v3081_v43 = vmul.f32 1.442695, %v3080_v42  ;;  %v4292_v42 = vld [vmem:[%s5250_s3 + $0x68] sm:$0xff]  }
0x2b84   :  { %v3195_v59 = vpop.xlane.xlu1 %3194 }
0x2b85   :  { %4377 = vpow2.f32 %v3081_v43  ;;  %v3199_v60 = vmul.f32 0.03125, %v3195_v59  ;;  %v4293_v43 = vld [vmem:[%s5250_s3 + $0x70] sm:$0xff]  }
0x2b87   :  { %v3201_v4 = vsub.f32 %v5139_v1, %v3199_v60 }
0x2b89   :  { %v3203_v9 = vmul.f32 %v3201_v4, %v3201_v4 }
0x2b8b   :  { %v3205_v12 = vsel %vm173_vm7, %v3203_v9, 0.0 }
0x2b8f   :  { %v4378_v34 = vpop.eup %4377 }
0x2b90   :  { %v3083_v14 = vsel %vm274_vm9, %v4378_v34, 0.0 }
0x2b91   :  { %3084 = vadd.xlane.f32.xlu0 %v3083_v14  ;;  %v3660_v14 = vld [vmem:[%s5249_s5 + $0xc] ss:$0 sm:$0xff] }
0x2ba7   :  { %3089 = vrot.lane.b32.xlu0 %v5027_v21, %s4411_s17 }
0x2bbb   :  { %v3019_v39 = vpop.f32.mrb[108].mxu1 }
0x2bbc   :  { %v3025_v48 = vadd.f32 %v3019_v39, %v5107_v55  ;;  %v4171_v44 = vpop.f32.mrb[109].mxu1 }
0x2bbd   :  { %v3022_v19 = vpop.f32.mrb[110].mxu1 }
0x2bbe   :  { %v4172_v50 = vpop.f32.mrb[111].mxu1 }
0x2c1e   :  { %v3085_v29 = vpop.xlane.xlu0 %3084 }
0x2c1f   :  { %4379 = vrcp.f32 %v3085_v29 }
0x2c22   :  { %v3090_v52 = vpop.permute.xlu0 %3089 }
0x2c23   :  { %v3095_v63 = vsel %vm339_vm10, %v3090_v52, 0 }
0x2c24   :  { %4180 = vmatpush3.bf16.msra.mxu1 %v3095_v63 }
0x2c25   :  { %4191 = vmatprep.subr.bf16.mxu1 %v4398_v11 }
0x2c29   :  { %v4380_v53 = vpop.eup %4379 }
0x2c2a   :  { %v3087_v7 = vmul.f32 %v4380_v53, %v4378_v34  ;;  %v4294_v34 = vld [vmem:[%s5250_s3 + $0x78] sm:$0xff]  }
0x2c2c   :  { %v3088_v54 = vpack.c.bf16 %v3087_v7, %v3087_v7 }
0x2c2e   :  { %4182 = vmatmul.mubr.msk.bf16.vlgmr.msra.gmra.mrb[112].mxu1 %vm274_vm9, %v3088_v54 }
0x2c2f   :  { %4195 = vmatprep.mubr.msk.bf16.mxu1 %vm4399_vm8, %v4398_v11 }
0x2d01   :  { %v3131_v21 = vpop.f32.mrb[112].mxu1 }
0x2d02   :  { %v3137_v55 = vpack.c.bf16 %v3131_v21, %v3131_v21  ;;  %v4183_v17 = vpop.f32.mrb[113].mxu1 }
0x2d03   :  { %v3134_v57 = vpop.f32.mrb[114].mxu1 }
0x2d04   :  { %v4184_v58 = vpop.f32.mrb[115].mxu1  ;;  %4188 = vmatmul.mubr.msk.bf16.vlgmr.msra.gmra.mrb[92].mxu0 %vm274_vm9, %v3137_v55 }
0x2d05   :  { %4215 = vmatprep.mubr.msk.bf16.mxu0 %vm4399_vm8, %v4398_v11  ;;  %4200 = vmatpush3.bf16.msra.mxu0 %v4287_v36 }
0x2d06   :  { %4201 = vmatprep.subr.bf16.mxu0 %v4398_v11 }
0x2d09   :  { %4202 = vmatpush3.bf16.msra.mxu0 %v4288_v61 }
0x2d0a   :  { %4203 = vmatprep.subr.bf16.mxu0 %v4398_v11 }
0x2d0d   :  { %4204 = vmatpush3.bf16.msra.mxu0 %v4289_v40 }
0x2d0e   :  { %4205 = vmatprep.subr.bf16.mxu0 %v4398_v11 }
0x2d11   :  { %4206 = vmatpush3.bf16.msra.mxu0 %v4290_v41 }
0x2d12   :  { %4207 = vmatprep.subr.bf16.mxu0 %v4398_v11 }
0x2d15   :  { %4208 = vmatpush3.bf16.msra.mxu0 %v4291_v38 }
0x2d16   :  { %4209 = vmatprep.subr.bf16.mxu0 %v4398_v11 }
0x2d19   :  { %4210 = vmatpush3.bf16.msra.mxu0 %v4292_v42  ;;  %v3680_v42 = vld [vmem:[%s5249_s5 + $0xd] ss:$0 sm:$0xff] }
0x2d1a   :  { %4211 = vmatprep.subr.bf16.mxu0 %v4398_v11 }
0x2d1d   :  { %4212 = vmatpush3.bf16.msra.mxu0 %v4293_v43 }
0x2d1e   :  { %4213 = vmatprep.subr.bf16.mxu0 %v4398_v11 }
0x2d21   :  { %4214 = vmatpush3.bf16.msra.mxu0 %v4294_v34 }
0x2dd7   :  { %v3175_v0 = vpop.f32.mrb[92].mxu0 }
0x2dd8   :  { %v3181_v51 = vadd.f32 %v3175_v0, %v3025_v48  ;;  %v4189_v2 = vpop.f32.mrb[93].mxu0 }
0x2dd9   :  { %v3178_v3 = vpop.f32.mrb[94].mxu0 }
0x2dda   :  { %v3188_v8 = vadd.f32 %v3657_v30, %v3181_v51  ;;  %v4190_v5 = vpop.f32.mrb[95].mxu0 }
0x2ddc   :  { %v5158_v31 = vadd.f32 %v3188_v8, %v4868_v32  ;;  %v3661_v32 = vcombine.high %v4881_v45, %v4886_v46  ;;  %v3658_v45 = vld [vmem:[%s5249_s5 + $0xa] ss:$0 sm:$0xff] }
0x2dde   :  { %v3196_v22 = vsel %vm173_vm7, %v5158_v31, 0.0  ;;  %4192 = vmatpush3.bf16.msra.mxu1 %v3661_v32 }
0x2ddf   :  { %3197 = vadd.xlane.f32.xlu1 %v3196_v22  ;;  %4193 = vmatprep.subr.bf16.mxu1 %v4398_v11 }
0x2de2   :  { %4194 = vmatpush3.bf16.msra.mxu1 %v3662_v47 }
0x2de3   :  { %3206 = vadd.xlane.f32.xlu1 %v3205_v12  ;;  %4219 = vmatprep.subr.bf16.mxu1 %v4398_v11 }
0x2e6c   :  { %v3198_v13 = vpop.xlane.xlu1 %3197 }
0x2e6d   :  { %v3200_v15 = vmul.f32 0.03125, %v3198_v13 }
0x2e6f   :  { %v3202_v16 = vsub.f32 %v5158_v31, %v3200_v15 }
0x2e70   :  { %v3207_v49 = vpop.xlane.xlu1 %3206 }
0x2e71   :  { %v3204_v18 = vmul.f32 %v3202_v16, %v3202_v16  ;;  %v3211_v25 = vmul.f32 0.03125, %v3207_v49 }
0x2e73   :  { %v3208_v24 = vsel %vm173_vm7, %v3204_v18, 0.0  ;;  %v3213_v20 = vadd.f32 1e-05, %v3211_v25 }
0x2e74   :  { %3209 = vadd.xlane.f32.xlu1 %v3208_v24 }
0x2e75   :  { %4381 = vrsqrt.f32 %v3213_v20 }
0x2e7f   :  { %v4382_v28 = vpop.eup %4381 }
0x2e80   :  { %v3217_v30 = vmul.f32 %v4382_v28, %v3201_v4 }
0x2e82   :  { %v3223_v56 = vmul.f32 %v3658_v45, %v3217_v30 }
0x2e84   :  { %v3229_v35 = vadd.f32 %v3659_v6, %v3223_v56 }
0x2f01   :  { %v3210_v62 = vpop.xlane.xlu1 %3209 }
0x2f02   :  { %v3212_v26 = vmul.f32 0.03125, %v3210_v62 }
0x2f04   :  { %v3214_v27 = vadd.f32 1e-05, %v3212_v26 }
0x2f06   :  { %4383 = vrsqrt.f32 %v3214_v27 }
0x2f10   :  { %v4384_v46 = vpop.eup %4383 }
0x2f11   :  { %v3218_v10 = vmul.f32 %v4384_v46, %v3202_v16 }
0x2f13   :  { %v3224_v33 = vmul.f32 %v3658_v45, %v3218_v10 }
0x2f15   :  { %v3230_v37 = vadd.f32 %v3659_v6, %v3224_v33 }
0x2f17   :  { %v3231_v23 = vpack.c.bf16 %v3230_v37, %v3229_v35 }
0x2f19   :  { %4196 = vmatmul.mubr.msk.bf16.vlgmr.msra.gmra.mrb[116].mxu1 %vm173_vm7, %v3231_v23 }
0x2f1a   :  { %4223 = vmatprep.mubr.msk.bf16.mxu1 %vm4399_vm8, %v4398_v11 }
0x2fec   :  { %v3282_v39 = vpop.f32.mrb[116].mxu1 }
0x2fed   :  { %v3283_v48 = vadd.f32 %v3660_v14, %v3282_v39  ;;  %v4197_v44 = vpop.f32.mrb[117].mxu1 }
0x2fee   :  { %v3285_v19 = vpop.f32.mrb[118].mxu1 }
0x2fef   :  { %v3291_v50 = vmul.f32 0.70710677, %v3283_v48  ;;  %v3286_v29 = vadd.f32 %v3660_v14, %v3285_v19  ;;  %v4198_v52 = vpop.f32.mrb[119].mxu1  ;;  %v3289_v23 = vmul.f32 0.5, %v3283_v48 }
0x2ff1   :  { %v3293_v63 = vand.u32 2147483647, %v3291_v50  ;;  %v3292_v53 = vmul.f32 0.70710677, %v3286_v29  ;;  %vm3331_vm14 = vcmp.lt.f32.partialorder %v3291_v50, 0.0  ;;  %v3290_v36 = vmul.f32 0.5, %v3286_v29 }
0x2ff3   :  { %v3295_v7 = vmul.f32 0.3275911, %v3293_v63  ;;  %v3294_v54 = vand.u32 2147483647, %v3292_v53  ;;  %v3319_v57 = vsub.f32 0.0, %v3293_v63  ;;  %vm3332_vm15 = vcmp.lt.f32.partialorder %v3292_v53, 0.0 }
0x2ff5   :  { %v3297_v21 = vadd.f32 1.0, %v3295_v7  ;;  %v3296_v55 = vmul.f32 0.3275911, %v3294_v54  ;;  %v3320_v58 = vsub.f32 0.0, %v3294_v54  ;;  %v3321_v60 = vmul.f32 %v3319_v57, %v3293_v63 }
0x2ff7   :  { %4385 = vrcp.f32 %v3297_v21  ;;  %v3298_v17 = vadd.f32 1.0, %v3296_v55  ;;  %v3322_v3 = vmul.f32 %v3320_v58, %v3294_v54  ;;  %v3323_v4 = vmul.f32 1.442695, %v3321_v60 }
0x2ff9   :  { %4387 = vrcp.f32 %v3298_v17  ;;  %v3325_v12 = vmul.f32 1.442695, %v3322_v3 }
0x2ffa   :  { %4389 = vpow2.f32 %v3323_v4 }
0x2ffb   :  { %4391 = vpow2.f32 %v3325_v12 }
0x3001   :  { %v4386_v59 = vpop.eup %4385 }
0x3002   :  { %v3301_v0 = vmul.f32 1.0614054, %v4386_v59 }
0x3003   :  { %v4388_v51 = vpop.eup %4387 }
0x3004   :  { %v3303_v2 = vadd.f32 -1.4531521, %v3301_v0  ;;  %v3302_v8 = vmul.f32 1.0614054, %v4388_v51  ;;  %v4390_v62 = vpop.eup %4389 }
0x3005   :  { %v4392_v30 = vpop.eup %4391 }
0x3006   :  { %v3305_v5 = vmul.f32 %v4386_v59, %v3303_v2  ;;  %v3304_v22 = vadd.f32 -1.4531521, %v3302_v8 }
0x3008   :  { %v3307_v9 = vadd.f32 1.4214138, %v3305_v5  ;;  %v3306_v13 = vmul.f32 %v4388_v51, %v3304_v22  ;;  %v3689_v22 = vld [vmem:[%s5249_s5 + $0xe] ss:$0 sm:$0xff] }
0x300a   :  { %v3309_v15 = vmul.f32 %v4386_v59, %v3307_v9  ;;  %v3308_v16 = vadd.f32 1.4214138, %v3306_v13  ;;  %v3690_v13 = vld [vmem:[%s5249_s5 + $0xf] ss:$0 sm:$0xff] }
0x300c   :  { %v3311_v18 = vadd.f32 -0.28449672, %v3309_v15  ;;  %v3310_v24 = vmul.f32 %v4388_v51, %v3308_v16 }
0x300e   :  { %v3313_v32 = vmul.f32 %v4386_v59, %v3311_v18  ;;  %v3312_v47 = vadd.f32 -0.28449672, %v3310_v24 }
0x3010   :  { %v3315_v49 = vadd.f32 0.2548296, %v3313_v32  ;;  %v3314_v25 = vmul.f32 %v4388_v51, %v3312_v47  ;;  %v3691_v32 = vld [vmem:[%s5249_s5 + $0x10] ss:$0 sm:$0xff] }
0x3012   :  { %v3317_v20 = vmul.f32 %v4386_v59, %v3315_v49  ;;  %v3316_v26 = vadd.f32 0.2548296, %v3314_v25  ;;  %v4296_v59 = vld [vmem:[%s5251_s4 + $0x8] sm:$0xff]  }
0x3014   :  { %v3327_v27 = vmul.f32 %v4390_v62, %v3317_v20  ;;  %v3318_v28 = vmul.f32 %v4388_v51, %v3316_v26 }
0x3016   :  { %v3329_v45 = vsub.f32 1.0, %v3327_v27  ;;  %v3328_v46 = vmul.f32 %v4392_v30, %v3318_v28 }
0x3018   :  { %v3333_v56 = vsub.f32 0.0, %v3329_v45  ;;  %v3330_v10 = vsub.f32 1.0, %v3328_v46 }
0x301a   :  { %v3335_v6 = vsel %vm3331_vm14, %v3333_v56, %v3329_v45  ;;  %v3334_v33 = vsub.f32 0.0, %v3330_v10 }
0x301b   :  { %v3337_v35 = vadd.f32 1.0, %v3335_v6 }
0x301c   :  { %v3336_v37 = vsel %vm3332_vm15, %v3334_v33, %v3330_v10 }
0x301d   :  { %v3338_v61 = vadd.f32 1.0, %v3336_v37  ;;  %v3339_v40 = vmul.f32 %v3337_v35, %v3289_v23 }
0x301f   :  { %v3340_v41 = vmul.f32 %v3338_v61, %v3290_v36 }
0x3021   :  { %v3341_v38 = vpack.c.bf16 %v3340_v41, %v3339_v40 }
0x3023   :  { %4216 = vmatmul.mubr.bf16.vlgmr.msra.gmra.mrb[96].mxu0 %v3341_v38 }
0x30f6   :  { %v3446_v43 = vpop.f32.mrb[96].mxu0 }
0x30f7   :  { %v3447_v34 = vadd.f32 %v3680_v42, %v3446_v43  ;;  %v4217_v14 = vpop.f32.mrb[97].mxu0 }
0x30f8   :  { %v3449_v39 = vpop.f32.mrb[98].mxu0 }
0x30f9   :  { %v3453_v44 = vadd.f32 %v3447_v34, %v5139_v1  ;;  %v3450_v19 = vadd.f32 %v3680_v42, %v3449_v39  ;;  %v4218_v50 = vpop.f32.mrb[99].mxu0 }
0x30fb   :  { %v3454_v48 = vadd.f32 %v3450_v19, %v5158_v31  ;;  %v3457_v29 = vsel %vm173_vm7, %v3453_v44, 0.0  ;;  %v4295_v31 = vld [vmem:[%s5251_s4] sm:$0xff]  }
0x30fc   :  { %3458 = vadd.xlane.f32.xlu1 %v3457_v29  ;;  %4220 = vmatpush3.bf16.msra.mxu1 %v4295_v31 }
0x30fd   :  { %v3460_v52 = vsel %vm173_vm7, %v3454_v48, 0.0  ;;  %4221 = vmatprep.subr.bf16.mxu1 %v4398_v11 }
0x3100   :  { %3461 = vadd.xlane.f32.xlu1 %v3460_v52  ;;  %4222 = vmatpush3.bf16.msra.mxu1 %v4296_v59 }
0x3189   :  { %v3459_v63 = vpop.xlane.xlu1 %3458 }
0x318a   :  { %v3463_v53 = vmul.f32 0.03125, %v3459_v63 }
0x318c   :  { %v3465_v7 = vsub.f32 %v3453_v44, %v3463_v53 }
0x318d   :  { %v3462_v54 = vpop.xlane.xlu1 %3461 }
0x318e   :  { %v3464_v21 = vmul.f32 0.03125, %v3462_v54  ;;  %v3467_v55 = vmul.f32 %v3465_v7, %v3465_v7 }
0x3190   :  { %v3466_v17 = vsub.f32 %v3454_v48, %v3464_v21  ;;  %v3469_v57 = vsel %vm173_vm7, %v3467_v55, 0.0 }
0x3191   :  { %3470 = vadd.xlane.f32.xlu0 %v3469_v57 }
0x3192   :  { %v3468_v1 = vmul.f32 %v3466_v17, %v3466_v17 }
0x3194   :  { %v3472_v58 = vsel %vm173_vm7, %v3468_v1, 0.0 }
0x3195   :  { %3473 = vadd.xlane.f32.xlu1 %v3472_v58 }
0x321e   :  { %v3471_v60 = vpop.xlane.xlu0 %3470 }
0x321f   :  { %v3475_v0 = vmul.f32 0.03125, %v3471_v60 }
0x3221   :  { %v3477_v51 = vadd.f32 1e-05, %v3475_v0 }
0x3222   :  { %v3474_v2 = vpop.xlane.xlu1 %3473 }
0x3223   :  { %4393 = vrsqrt.f32 %v3477_v51  ;;  %v3476_v3 = vmul.f32 0.03125, %v3474_v2 }
0x3225   :  { %v3478_v4 = vadd.f32 1e-05, %v3476_v3 }
0x3227   :  { %4395 = vrsqrt.f32 %v3478_v4 }
0x322d   :  { %v4394_v8 = vpop.eup %4393 }
0x322e   :  { %v3481_v5 = vmul.f32 %v4394_v8, %v3465_v7 }
0x3230   :  { %v3487_v9 = vmul.f32 %v3689_v22, %v3481_v5 }
0x3231   :  { %v4396_v11 = vpop.eup %4395 }
0x3232   :  { %v3482_v12 = vmul.f32 %v4396_v11, %v3466_v17  ;;  %v3493_v16 = vadd.f32 %v3690_v13, %v3487_v9 }
0x3234   :  { %v3488_v15 = vmul.f32 %v3689_v22, %v3482_v12 }
0x3236   :  { %v3494_v18 = vadd.f32 %v3690_v13, %v3488_v15 }
0x3238   :  { %v3495_v24 = vpack.c.bf16 %v3494_v18, %v3493_v16 }
0x323a   :  { %4224 = vmatmul.mubr.msk.bf16.vlgmr.msra.gmra.mrb[120].mxu1 %vm173_vm7, %v3495_v24 }
0x330d   :  { %v3554_v47 = vpop.f32.mrb[120].mxu1 }
0x330e   :  { %v3555_v49 = vadd.f32 %v3691_v32, %v3554_v47  ;;  %v4225_v25 = vpop.f32.mrb[121].mxu1 }
0x330f   :  { %v3557_v20 = vpop.f32.mrb[122].mxu1 }
0x3310   :  { %3561 = vst [vmem:[%s5252_s6] sm:$0xff] %v3555_v49  ;;  %v3558_v62 = vadd.f32 %v3691_v32, %v3557_v20  ;;  %v4226_v26 = vpop.f32.mrb[123].mxu1 }
0x3312   :  { %3562 = vst [vmem:[%s5252_s6 + $0x8] sm:$0xff] %v3558_v62 }

</bundles_post_ra>
